<compile_context>
chip_gen: v5e
topology: v5e:2x2
jax: 0.10.0
libtpu: 0.0.40
codegen_flags: <defaults>
</compile_context>

<pallas_src>
import math

import jax
import jax.numpy as jnp
from jax.experimental import pallas as pl
from jax.experimental.pallas import tpu as pltpu

_GELU_C = math.sqrt(2.0 / math.pi)
_LN_EPS = 1e-5                       # PyTorch nn.LayerNorm default
_VMEM_BUDGET = 20 * 1024 * 1024      # double-buffered working-set cap
_VMEM_LIMIT = 40 * 1024 * 1024       # scoped VMEM we request (< 64 MiB v7x)


def _round_up(x, m):
    return (x + m - 1) // m * m


def _pad2d(a, rows, cols):
    r, c = a.shape
    if rows == r and cols == c:
        return a
    return jnp.pad(a, ((0, rows - r), (0, cols - c)))


# ---------------------------------------------------------------------------
# Fused LayerNorm(channels) + NewGELU epilogue (f32 math)
# ---------------------------------------------------------------------------
def _ln_gelu(y, g, be, c_real, c_pad):
    if c_real == c_pad:
        # No channel padding: plain LN, no lane mask needed.
        mean = jnp.mean(y, axis=-1, keepdims=True)
        d = y - mean
        var = jnp.mean(d * d, axis=-1, keepdims=True)   # biased (torch)
    else:
        inv_c = 1.0 / float(c_real)
        lanes = jax.lax.broadcasted_iota(jnp.int32, y.shape, y.ndim - 1)
        mask = lanes < c_real
        ym = jnp.where(mask, y, 0.0)
        mean = jnp.sum(ym, axis=-1, keepdims=True) * inv_c
        d = jnp.where(mask, y - mean, 0.0)
        var = jnp.sum(d * d, axis=-1, keepdims=True) * inv_c
    z = (y - mean) * jax.lax.rsqrt(var + _LN_EPS) * g + be
    # NewGELU (tanh form); rsqrt/tanh ride on the EUP slot.
    return 0.5 * z * (1.0 + jnp.tanh(_GELU_C * (z + 0.044715 * (z * z * z))))


# ---------------------------------------------------------------------------
# Pallas kernels
# ---------------------------------------------------------------------------
def _make_fused_direct_kernel(c_real, c_pad):
    """gk == 1: one MXU pass, no accumulator scratch, fused bias+LN+GELU."""
    def kernel(p_ref, w_ref, b_ref, g_ref, be_ref, o_ref):
        y = jnp.dot(p_ref[...], w_ref[...],
                    preferred_element_type=jnp.float32) + b_ref[...]
        o_ref[...] = _ln_gelu(y, g_ref[...], be_ref[...],
                              c_real, c_pad).astype(o_ref.dtype)
    return kernel


def _make_fused_acc_kernel(c_real, c_pad):
    """gk > 1: K-split accumulation, epilogue on the last K step."""
    def kernel(p_ref, w_ref, b_ref, g_ref, be_ref, o_ref, acc_ref):
        @pl.when(pl.program_id(1) == 0)
        def _init():
            acc_ref[...] = jnp.zeros_like(acc_ref)

        acc_ref[...] += jnp.dot(p_ref[...], w_ref[...],
                                preferred_element_type=jnp.float32)

        @pl.when(pl.program_id(1) == pl.num_programs(1) - 1)
        def _fini():
            y = acc_ref[...] + b_ref[...]
            o_ref[...] = _ln_gelu(y, g_ref[...], be_ref[...],
                                  c_real, c_pad).astype(o_ref.dtype)
    return kernel


def _bias_direct_kernel(p_ref, w_ref, b_ref, o_ref):
    o_ref[...] = (jnp.dot(p_ref[...], w_ref[...],
                          preferred_element_type=jnp.float32)
                  + b_ref[...]).astype(o_ref.dtype)


def _bias_acc_kernel(p_ref, w_ref, b_ref, o_ref, acc_ref):
    @pl.when(pl.program_id(2) == 0)
    def _init():
        acc_ref[...] = jnp.zeros_like(acc_ref)

    acc_ref[...] += jnp.dot(p_ref[...], w_ref[...],
                            preferred_element_type=jnp.float32)

    @pl.when(pl.program_id(2) == pl.num_programs(2) - 1)
    def _fini():
        o_ref[...] = (acc_ref[...] + b_ref[...]).astype(o_ref.dtype)


# ---------------------------------------------------------------------------
# Tile selection (VMEM-budgeted, single-K-tile preferred, gm >= 2 preferred)
# ---------------------------------------------------------------------------
def _select_tiles(M, K, tn, out_bytes):
    """Return (tm, M_pad, tk, K_pad, gk)."""
    M8 = _round_up(M, 8)
    K128 = _round_up(K, 128)

    def working_set(tm, tk, gk):
        acc = tm * tn * 4 if gk > 1 else 0
        return (2 * (tm * tk + tk * tn) * 2      # bf16 inputs, double-buffered
                + 2 * tm * tn * out_bytes        # output, double-buffered
                + acc)                           # f32 accumulator (split-K)

    tm_cands = [t for t in (512, 256, 128, 64, 32, 16, 8) if t <= M8] or [8]
    tk_cands = [(K128, K128)]                    # single K tile: weights resident
    tk_cands += [(t, _round_up(K, t)) for t in (2048, 1024, 512) if t < K128]

    for tk, kp in tk_cands:
        gk = kp // tk
        fits = [t for t in tm_cands if working_set(t, tk, gk) <= _VMEM_BUDGET]
        if not fits:
            continue
        # Largest M tile that still gives >= 2 M tiles (dual-TC on v7x).
        tm = next((t for t in fits if _round_up(M8, t) // t >= 2), fits[0])
        return tm, _round_up(M8, tm), tk, kp, gk

    # Last resort: smallest tiles regardless of budget.
    tk = min(512, K128)
    kp = _round_up(K, tk)
    return 8, M8, tk, kp, kp // tk


# ---------------------------------------------------------------------------
# Pallas GEMM wrapper (padding / bf16 MXU inputs / fused epilogue dispatch)
# ---------------------------------------------------------------------------
def _gemm(patches, w, b, *, gamma=None, beta=None, fuse_ln_gelu=False,
          out_dtype=jnp.bfloat16):
    M, K = patches.shape
    O = w.shape[1]
    out_bytes = jnp.dtype(out_dtype).itemsize

    O_pad = _round_up(O, 128)
    if fuse_ln_gelu:
        tn = O_pad                      # LN needs the full channel axis in-tile
    else:
        tn = min(O_pad, 512)
        O_pad = _round_up(O, tn)
    gn = O_pad // tn

    tm, M_pad, tk, K_pad, gk = _select_tiles(M, K, tn, out_bytes)
    gm = M_pad // tm

    # bf16 MXU inputs, f32 accumulation/epilogue. Zero padding keeps padded
    # K rows/cols inert.
    p = _pad2d(patches, M_pad, K_pad)
    if p.dtype != jnp.bfloat16:
        p = p.astype(jnp.bfloat16)
    wp = _pad2d(w, K_pad, O_pad).astype(jnp.bfloat16)
    bp = jnp.pad(b, (0, O_pad - O)).reshape(1, O_pad).astype(jnp.float32)

    cost = pl.CostEstimate(
        flops=2 * M_pad * K_pad * O_pad,
        transcendentals=M_pad * O_pad if fuse_ln_gelu else 0,
        bytes_accessed=p.size * 2 + wp.size * 2 + M_pad * O_pad * out_bytes,
    )
    out_shape = jax.ShapeDtypeStruct((M_pad, O_pad), out_dtype)

    if fuse_ln_gelu:
        gp = jnp.pad(gamma, (0, O_pad - O), constant_values=1.0)
        gp = gp.reshape(1, O_pad).astype(jnp.float32)
        bep = jnp.pad(beta, (0, O_pad - O)).reshape(1, O_pad).astype(jnp.float32)
        if gk == 1:
            out = pl.pallas_call(
                _make_fused_direct_kernel(O, O_pad),
                out_shape=out_shape,
                grid_spec=pltpu.PrefetchScalarGridSpec(
                    num_scalar_prefetch=0,
                    grid=(gm,),
                    in_specs=[
                        pl.BlockSpec((tm, tk), lambda i: (i, 0)),
                        pl.BlockSpec((tk, tn), lambda i: (0, 0)),  # resident
                        pl.BlockSpec((1, tn), lambda i: (0, 0)),
                        pl.BlockSpec((1, tn), lambda i: (0, 0)),
                        pl.BlockSpec((1, tn), lambda i: (0, 0)),
                    ],
                    out_specs=pl.BlockSpec((tm, tn), lambda i: (i, 0)),
                ),
                compiler_params=pltpu.CompilerParams(
                    dimension_semantics=("parallel",),
                    vmem_limit_bytes=_VMEM_LIMIT),
                cost_estimate=cost,
            )(p, wp, bp, gp, bep)
        else:
            out = pl.pallas_call(
                _make_fused_acc_kernel(O, O_pad),
                out_shape=out_shape,
                grid_spec=pltpu.PrefetchScalarGridSpec(
                    num_scalar_prefetch=0,
                    grid=(gm, gk),
                    in_specs=[
                        pl.BlockSpec((tm, tk), lambda i, k: (i, k)),
                        pl.BlockSpec((tk, tn), lambda i, k: (k, 0)),
                        pl.BlockSpec((1, tn), lambda i, k: (0, 0)),
                        pl.BlockSpec((1, tn), lambda i, k: (0, 0)),
                        pl.BlockSpec((1, tn), lambda i, k: (0, 0)),
                    ],
                    out_specs=pl.BlockSpec((tm, tn), lambda i, k: (i, 0)),
                    scratch_shapes=[pltpu.VMEM((tm, tn), jnp.float32)],
                ),
                compiler_params=pltpu.CompilerParams(
                    dimension_semantics=("parallel", "arbitrary"),
                    vmem_limit_bytes=_VMEM_LIMIT),
                cost_estimate=cost,
            )(p, wp, bp, gp, bep)
    else:
        if gk == 1:
            out = pl.pallas_call(
                _bias_direct_kernel,
                out_shape=out_shape,
                grid_spec=pltpu.PrefetchScalarGridSpec(
                    num_scalar_prefetch=0,
                    grid=(gm, gn),
                    in_specs=[
                        pl.BlockSpec((tm, tk), lambda i, j: (i, 0)),
                        pl.BlockSpec((tk, tn), lambda i, j: (0, j)),
                        pl.BlockSpec((1, tn), lambda i, j: (0, j)),
                    ],
                    out_specs=pl.BlockSpec((tm, tn), lambda i, j: (i, j)),
                ),
                compiler_params=pltpu.CompilerParams(
                    dimension_semantics=("parallel", "parallel"),
                    vmem_limit_bytes=_VMEM_LIMIT),
                cost_estimate=cost,
            )(p, wp, bp)
        else:
            out = pl.pallas_call(
                _bias_acc_kernel,
                out_shape=out_shape,
                grid_spec=pltpu.PrefetchScalarGridSpec(
                    num_scalar_prefetch=0,
                    grid=(gm, gn, gk),
                    in_specs=[
                        pl.BlockSpec((tm, tk), lambda i, j, k: (i, k)),
                        pl.BlockSpec((tk, tn), lambda i, j, k: (k, j)),
                        pl.BlockSpec((1, tn), lambda i, j, k: (0, j)),
                    ],
                    out_specs=pl.BlockSpec((tm, tn), lambda i, j, k: (i, j)),
                    scratch_shapes=[pltpu.VMEM((tm, tn), jnp.float32)],
                ),
                compiler_params=pltpu.CompilerParams(
                    dimension_semantics=("parallel", "parallel", "arbitrary"),
                    vmem_limit_bytes=_VMEM_LIMIT),
                cost_estimate=cost,
            )(p, wp, bp)

    return out[:M, :O]


# ---------------------------------------------------------------------------
# im2col (channels-last) + conv wrapper
# ---------------------------------------------------------------------------
def _im2col_cl(x, kernel, stride, padding):
    # x: (N, D, H, W, C) channels-last -> patches (N*Do*Ho*Wo, C*kd*kh*kw),
    # channel-major flattening (consistent with the synthetic weight layout).
    N, D, H, W, C = x.shape
    kd, kh, kw = kernel
    sd, sh, sw = stride
    pd, ph, pw = padding
    xp = jnp.pad(x, ((0, 0), (pd, pd), (ph, ph), (pw, pw), (0, 0)))
    Dp, Hp, Wp = xp.shape[1:4]
    Do = (Dp - kd) // sd + 1
    Ho = (Hp - kh) // sh + 1
    Wo = (Wp - kw) // sw + 1
    cols = []
    for od in range(kd):
        for oh in range(kh):
            for ow in range(kw):
                cols.append(
                    xp[:,
                       od:od + sd * (Do - 1) + 1:sd,
                       oh:oh + sh * (Ho - 1) + 1:sh,
                       ow:ow + sw * (Wo - 1) + 1:sw, :]
                )
    cols = jnp.stack(cols, axis=-1)                  # (N,Do,Ho,Wo,C,Kspat)
    patches = cols.reshape(N * Do * Ho * Wo, C * kd * kh * kw)
    return patches, (N, Do, Ho, Wo)


def _conv(x_cl, w, b, kernel, stride, padding, *,
          gamma=None, beta=None, fuse_ln_gelu=False, out_dtype=jnp.bfloat16):
    patches, (N, Do, Ho, Wo) = _im2col_cl(x_cl, kernel, stride, padding)
    out = _gemm(patches, w, b, gamma=gamma, beta=beta,
                fuse_ln_gelu=fuse_ln_gelu, out_dtype=out_dtype)
    return out.reshape(N, Do, Ho, Wo, w.shape[1])    # stays channels-last


# ---------------------------------------------------------------------------
# Module forward
# ---------------------------------------------------------------------------
def era5_encode(surface_u, upper_u, params):
    B, T, Cs, H, W = surface_u.shape
    Cu, P = upper_u.shape[2], upper_u.shape[3]

    # concat_mask: [surface channels, land, soil, topo] along channel axis.
    masks = jnp.stack([params["land_mask"], params["soil_type"],
                       params["topography"]], axis=-1)            # (H, W, 3)
    masks = jnp.broadcast_to(masks[None, None], (B, T, H, W, 3))
    s_cl = jnp.transpose(surface_u, (0, 1, 3, 4, 2))              # (B,T,H,W,Cs)
    s_cl = jnp.concatenate([s_cl, masks], axis=-1)
    s_cl = s_cl.reshape(B * T, 1, H, W, Cs + 3).astype(jnp.bfloat16)

    u_cl = jnp.transpose(upper_u.reshape(B * T, Cu, P, H, W),
                         (0, 2, 3, 4, 1)).astype(jnp.bfloat16)    # (BT,P,H,W,Cu)

    # conv_surface / conv_upper; norm1 + GELU (per spatial position over
    # channels, shared params) is fused into each producing GEMM's epilogue —
    # equivalent to applying norm1 after the depth-axis concat.
    surf = _conv(s_cl, params["ws"], params["bs"],
                 (1, 15, 15), (1, 8, 8), (0, 7, 7),
                 gamma=params["g1"], beta=params["be1"], fuse_ln_gelu=True)
    up = _conv(u_cl, params["wu"], params["bu"],
               (3, 15, 15), (2, 8, 8), (1, 7, 7),
               gamma=params["g1"], beta=params["be1"], fuse_ln_gelu=True)
    x = jnp.concatenate([surf, up], axis=1)      # depth axis, channels-last, bf16

    x = _conv(x, params["w1"], params["b1"], (3, 7, 7), (2, 2, 2), (1, 3, 3),
              gamma=params["g2"], beta=params["be2"], fuse_ln_gelu=True)
    x = _conv(x, params["w2"], params["b2"], (2, 7, 7), (1, 2, 2), (0, 3, 3),
              gamma=params["g3"], beta=params["be3"], fuse_ln_gelu=True)
    x = _conv(x, params["w3"], params["b3"], (2, 3, 3), (1, 2, 2), (0, 1, 1),
              gamma=params["g4"], beta=params["be4"], fuse_ln_gelu=True)
    x = _conv(x, params["w4"], params["b4"], (2, 1, 1), (1, 2, 2), (0, 0, 0),
              out_dtype=jnp.float32)             # final conv: plain bias, f32 out

    # einops '(b t) C p h w -> b (t p h w) C' : channels-last makes this a
    # pure reshape (token order = t, p, h, w as in the reference).
    BT, p_, h, w, C = x.shape
    return x.reshape(B, T * p_ * h * w, C)


# ---------------------------------------------------------------------------
# Deterministic parameter init (synthetic; no checkpoint / .npy files)
# ---------------------------------------------------------------------------
def init_params(key, surface_in_chans, upper_in_chans, dim, final_dim, H, W):
    keys = iter(jax.random.split(key, 32))

    def conv_p(cin, kernel, cout):
        kf = cin * kernel[0] * kernel[1] * kernel[2]
        w = jax.random.normal(next(keys), (kf, cout), jnp.float32) / math.sqrt(kf)
        b = 0.01 * jax.random.normal(next(keys), (cout,), jnp.float32)
        return w, b

    ws, bs = conv_p(surface_in_chans + 3, (1, 15, 15), dim)
    wu, bu = conv_p(upper_in_chans, (3, 15, 15), dim)
    w1, b1 = conv_p(dim, (3, 7, 7), dim * 2)
    w2, b2 = conv_p(dim * 2, (2, 7, 7), dim * 4)
    w3, b3 = conv_p(dim * 4, (2, 3, 3), dim * 8)
    w4, b4 = conv_p(dim * 8, (2, 1, 1), final_dim)

    def norm_mask():
        m = jax.random.normal(next(keys), (H, W), jnp.float32)
        return (m - m.mean()) / m.std()

    return dict(
        ws=ws, bs=bs, wu=wu, bu=bu,
        w1=w1, b1=b1, w2=w2, b2=b2, w3=w3, b3=b3, w4=w4, b4=b4,
        g1=jnp.ones((dim,), jnp.float32), be1=jnp.zeros((dim,), jnp.float32),
        g2=jnp.ones((dim * 2,), jnp.float32), be2=jnp.zeros((dim * 2,), jnp.float32),
        g3=jnp.ones((dim * 4,), jnp.float32), be3=jnp.zeros((dim * 4,), jnp.float32),
        g4=jnp.ones((dim * 8,), jnp.float32), be4=jnp.zeros((dim * 8,), jnp.float32),
        land_mask=norm_mask(), soil_type=norm_mask(), topography=norm_mask(),
    )


if __name__ == "__main__":
    # Small shapes consistent with the module's forward pass.
    B, T = 2, 2
    surface_in_chans, upper_in_chans = 4, 5
    dim, final_dim = 8, 32
    H = W = 16
    P = 13  # pressure levels (>= 11 so the depth axis survives conv2-4)

    key = jax.random.PRNGKey(0)
    k_params, k_s, k_u = jax.random.split(key, 3)
    params = init_params(k_params, surface_in_chans, upper_in_chans,
                         dim, final_dim, H, W)

    surface_u = jax.random.normal(k_s, (B, T, surface_in_chans, H, W), jnp.float32)
    upper_u = jax.random.normal(k_u, (B, T, upper_in_chans, P, H, W), jnp.float32)

    out = jax.jit(era5_encode)(surface_u, upper_u, params)
    out = jax.block_until_ready(out)

    assert out.shape == (B, T * 1 * 1 * 1, final_dim), out.shape
    assert out.dtype == jnp.float32
    assert bool(jnp.all(jnp.isfinite(out)))
    print("KERNEL_OK")
</pallas_src>

<mosaic_0001>
module attributes {stable_mosaic.version = 11 : i64} {
  func.func @kernel(%arg0: i32, %arg1: memref<64x3456xbf16, #tpu.memory_space<vmem>>, %arg2: memref<3456x128xbf16, #tpu.memory_space<vmem>>, %arg3: memref<1x128xf32, #tpu.memory_space<vmem>>, %arg4: memref<1x128xf32, #tpu.memory_space<vmem>>, %arg5: memref<1x128xf32, #tpu.memory_space<vmem>>, %arg6: memref<64x128xbf16, #tpu.memory_space<vmem>>) attributes {dimension_semantics = [#tpu.dimension_semantics<parallel>], iteration_bounds = array<i64: 2>, scalar_prefetch = 0 : i64, scratch_operands = 0 : i64, tpu.core_type = #tpu.core_type<tc>, window_params = [{transform_indices = @transform_0, window_bounds = array<i64: 64, 3456>}, {pipeline_mode = #tpu.pipeline_mode<synchronous>, transform_indices = @transform_1, window_bounds = array<i64: 3456, 128>}, {pipeline_mode = #tpu.pipeline_mode<synchronous>, transform_indices = @transform_2, window_bounds = array<i64: 1, 128>}, {pipeline_mode = #tpu.pipeline_mode<synchronous>, transform_indices = @transform_3, window_bounds = array<i64: 1, 128>}, {pipeline_mode = #tpu.pipeline_mode<synchronous>, transform_indices = @transform_4, window_bounds = array<i64: 1, 128>}, {transform_indices = @transform_5, window_bounds = array<i64: 64, 128>}]} {
    %c0 = arith.constant 0 : index
    %c0_0 = arith.constant 0 : index
    %0 = vector.load %arg1[%c0, %c0_0] : memref<64x3456xbf16, #tpu.memory_space<vmem>>, vector<64x3456xbf16>
    %c0_1 = arith.constant 0 : index
    %c0_2 = arith.constant 0 : index
    %1 = vector.load %arg2[%c0_1, %c0_2] : memref<3456x128xbf16, #tpu.memory_space<vmem>>, vector<3456x128xbf16>
    %cst = arith.constant dense<0.000000e+00> : vector<64x128xf32>
    %2 = tpu.matmul %0, %1, %cst {dimension_numbers = #tpu.dot_dimension_numbers<[1], [0], [0], [1], [0, 0, 1, 1], [], []>} : vector<64x3456xbf16>, vector<3456x128xbf16>, vector<64x128xf32> -> vector<64x128xf32>
    %c0_3 = arith.constant 0 : index
    %c0_4 = arith.constant 0 : index
    %3 = vector.load %arg3[%c0_3, %c0_4] : memref<1x128xf32, #tpu.memory_space<vmem>>, vector<1x128xf32>
    %4 = vector.broadcast %3 : vector<1x128xf32> to vector<64x128xf32>
    %5 = arith.addf %2, %4 : vector<64x128xf32>
    %c0_5 = arith.constant 0 : index
    %c0_6 = arith.constant 0 : index
    %6 = vector.load %arg4[%c0_5, %c0_6] : memref<1x128xf32, #tpu.memory_space<vmem>>, vector<1x128xf32>
    %c0_7 = arith.constant 0 : index
    %c0_8 = arith.constant 0 : index
    %7 = vector.load %arg5[%c0_7, %c0_8] : memref<1x128xf32, #tpu.memory_space<vmem>>, vector<1x128xf32>
    %8 = tpu.iota {dimensions = array<i32: 1>} : vector<64x128xi32>
    %c8_i32 = arith.constant 8 : i32
    %9 = vector.broadcast %c8_i32 : i32 to vector<64x128xi32>
    %10 = arith.cmpi slt, %8, %9 : vector<64x128xi32>
    %cst_9 = arith.constant 0.000000e+00 : f32
    %11 = vector.broadcast %cst_9 : f32 to vector<64x128xf32>
    %12 = arith.select %10, %5, %11 : vector<64x128xi1>, vector<64x128xf32>
    %cst_10 = arith.constant dense<0.000000e+00> : vector<64xf32>
    %13 = vector.multi_reduction <add>, %12, %cst_10 [1] : vector<64x128xf32> to vector<64xf32>
    %14 = vector.shape_cast %13 : vector<64xf32> to vector<64x1xf32>
    %cst_11 = arith.constant 1.250000e-01 : f32
    %15 = vector.broadcast %cst_11 : f32 to vector<64x1xf32>
    %16 = arith.mulf %14, %15 : vector<64x1xf32>
    %17 = vector.broadcast %16 : vector<64x1xf32> to vector<64x128xf32>
    %18 = arith.subf %5, %17 : vector<64x128xf32>
    %cst_12 = arith.constant 0.000000e+00 : f32
    %19 = vector.broadcast %cst_12 : f32 to vector<64x128xf32>
    %20 = arith.select %10, %18, %19 : vector<64x128xi1>, vector<64x128xf32>
    %21 = arith.mulf %20, %20 : vector<64x128xf32>
    %cst_13 = arith.constant dense<0.000000e+00> : vector<64xf32>
    %22 = vector.multi_reduction <add>, %21, %cst_13 [1] : vector<64x128xf32> to vector<64xf32>
    %23 = vector.shape_cast %22 : vector<64xf32> to vector<64x1xf32>
    %cst_14 = arith.constant 1.250000e-01 : f32
    %24 = vector.broadcast %cst_14 : f32 to vector<64x1xf32>
    %25 = arith.mulf %23, %24 : vector<64x1xf32>
    %26 = vector.broadcast %16 : vector<64x1xf32> to vector<64x128xf32>
    %27 = arith.subf %5, %26 : vector<64x128xf32>
    %cst_15 = arith.constant 9.99999974E-6 : f32
    %28 = vector.broadcast %cst_15 : f32 to vector<64x1xf32>
    %29 = arith.addf %25, %28 : vector<64x1xf32>
    %30 = math.rsqrt %29 : vector<64x1xf32>
    %31 = vector.broadcast %30 : vector<64x1xf32> to vector<64x128xf32>
    %32 = arith.mulf %27, %31 : vector<64x128xf32>
    %33 = vector.broadcast %6 : vector<1x128xf32> to vector<64x128xf32>
    %34 = arith.mulf %32, %33 : vector<64x128xf32>
    %35 = vector.broadcast %7 : vector<1x128xf32> to vector<64x128xf32>
    %36 = arith.addf %34, %35 : vector<64x128xf32>
    %cst_16 = arith.constant 5.000000e-01 : f32
    %37 = vector.broadcast %cst_16 : f32 to vector<64x128xf32>
    %38 = arith.mulf %37, %36 : vector<64x128xf32>
    %39 = arith.mulf %36, %36 : vector<64x128xf32>
    %40 = arith.mulf %39, %36 : vector<64x128xf32>
    %cst_17 = arith.constant 4.471500e-02 : f32
    %41 = vector.broadcast %cst_17 : f32 to vector<64x128xf32>
    %42 = arith.mulf %41, %40 : vector<64x128xf32>
    %43 = arith.addf %36, %42 : vector<64x128xf32>
    %cst_18 = arith.constant 0.797884583 : f32
    %44 = vector.broadcast %cst_18 : f32 to vector<64x128xf32>
    %45 = arith.mulf %44, %43 : vector<64x128xf32>
    %46 = math.tanh %45 : vector<64x128xf32>
    %cst_19 = arith.constant 1.000000e+00 : f32
    %47 = vector.broadcast %cst_19 : f32 to vector<64x128xf32>
    %48 = arith.addf %47, %46 : vector<64x128xf32>
    %49 = arith.mulf %38, %48 : vector<64x128xf32>
    %50 = arith.truncf %49 : vector<64x128xf32> to vector<64x128xbf16>
    %c0_20 = arith.constant 0 : index
    %c0_21 = arith.constant 0 : index
    %51 = vector.load %arg6[%c0_20, %c0_21] : memref<64x128xbf16, #tpu.memory_space<vmem>>, vector<64x128xbf16>
    tpu.vector_store %arg6[%c0_20, %c0_21], %50 {strides = array<i32>} : memref<64x128xbf16, #tpu.memory_space<vmem>>, vector<64x128xbf16>,
    return
  }
  func.func @transform_0(%arg0: i32) -> (i32, i32) {
    %c0_i32 = arith.constant 0 : i32
    %c0_i32_0 = arith.constant 0 : i32
    return %arg0, %c0_i32 : i32, i32
  }
  func.func @transform_1(%arg0: i32) -> (i32, i32) {
    %c0_i32 = arith.constant 0 : i32
    %c0_i32_0 = arith.constant 0 : i32
    %c0_i32_1 = arith.constant 0 : i32
    return %c0_i32, %c0_i32_0 : i32, i32
  }
  func.func @transform_2(%arg0: i32) -> (i32, i32) {
    %c0_i32 = arith.constant 0 : i32
    %c0_i32_0 = arith.constant 0 : i32
    %c0_i32_1 = arith.constant 0 : i32
    return %c0_i32, %c0_i32_0 : i32, i32
  }
  func.func @transform_3(%arg0: i32) -> (i32, i32) {
    %c0_i32 = arith.constant 0 : i32
    %c0_i32_0 = arith.constant 0 : i32
    %c0_i32_1 = arith.constant 0 : i32
    return %c0_i32, %c0_i32_0 : i32, i32
  }
  func.func @transform_4(%arg0: i32) -> (i32, i32) {
    %c0_i32 = arith.constant 0 : i32
    %c0_i32_0 = arith.constant 0 : i32
    %c0_i32_1 = arith.constant 0 : i32
    return %c0_i32, %c0_i32_0 : i32, i32
  }
  func.func @transform_5(%arg0: i32) -> (i32, i32) {
    %c0_i32 = arith.constant 0 : i32
    %c0_i32_0 = arith.constant 0 : i32
    return %arg0, %c0_i32 : i32, i32
  }
}

module attributes {stable_mosaic.version = 11 : i64} {
  func.func @kernel(%arg0: i32, %arg1: memref<8x1664xbf16, #tpu.memory_space<vmem>>, %arg2: memref<1664x128xbf16, #tpu.memory_space<vmem>>, %arg3: memref<1x128xf32, #tpu.memory_space<vmem>>, %arg4: memref<1x128xf32, #tpu.memory_space<vmem>>, %arg5: memref<1x128xf32, #tpu.memory_space<vmem>>, %arg6: memref<8x128xbf16, #tpu.memory_space<vmem>>) attributes {dimension_semantics = [#tpu.dimension_semantics<parallel>], iteration_bounds = array<i64: 2>, scalar_prefetch = 0 : i64, scratch_operands = 0 : i64, tpu.core_type = #tpu.core_type<tc>, window_params = [{transform_indices = @transform_0, window_bounds = array<i64: 8, 1664>}, {pipeline_mode = #tpu.pipeline_mode<synchronous>, transform_indices = @transform_1, window_bounds = array<i64: 1664, 128>}, {pipeline_mode = #tpu.pipeline_mode<synchronous>, transform_indices = @transform_2, window_bounds = array<i64: 1, 128>}, {pipeline_mode = #tpu.pipeline_mode<synchronous>, transform_indices = @transform_3, window_bounds = array<i64: 1, 128>}, {pipeline_mode = #tpu.pipeline_mode<synchronous>, transform_indices = @transform_4, window_bounds = array<i64: 1, 128>}, {transform_indices = @transform_5, window_bounds = array<i64: 8, 128>}]} {
    %c0 = arith.constant 0 : index
    %c0_0 = arith.constant 0 : index
    %0 = vector.load %arg1[%c0, %c0_0] : memref<8x1664xbf16, #tpu.memory_space<vmem>>, vector<8x1664xbf16>
    %c0_1 = arith.constant 0 : index
    %c0_2 = arith.constant 0 : index
    %1 = vector.load %arg2[%c0_1, %c0_2] : memref<1664x128xbf16, #tpu.memory_space<vmem>>, vector<1664x128xbf16>
    %cst = arith.constant dense<0.000000e+00> : vector<8x128xf32>
    %2 = tpu.matmul %0, %1, %cst {dimension_numbers = #tpu.dot_dimension_numbers<[1], [0], [0], [1], [0, 0, 1, 1], [], []>} : vector<8x1664xbf16>, vector<1664x128xbf16>, vector<8x128xf32> -> vector<8x128xf32>
    %c0_3 = arith.constant 0 : index
    %c0_4 = arith.constant 0 : index
    %3 = vector.load %arg3[%c0_3, %c0_4] : memref<1x128xf32, #tpu.memory_space<vmem>>, vector<1x128xf32>
    %4 = vector.broadcast %3 : vector<1x128xf32> to vector<8x128xf32>
    %5 = arith.addf %2, %4 : vector<8x128xf32>
    %c0_5 = arith.constant 0 : index
    %c0_6 = arith.constant 0 : index
    %6 = vector.load %arg4[%c0_5, %c0_6] : memref<1x128xf32, #tpu.memory_space<vmem>>, vector<1x128xf32>
    %c0_7 = arith.constant 0 : index
    %c0_8 = arith.constant 0 : index
    %7 = vector.load %arg5[%c0_7, %c0_8] : memref<1x128xf32, #tpu.memory_space<vmem>>, vector<1x128xf32>
    %8 = tpu.iota {dimensions = array<i32: 1>} : vector<8x128xi32>
    %c8_i32 = arith.constant 8 : i32
    %9 = vector.broadcast %c8_i32 : i32 to vector<8x128xi32>
    %10 = arith.cmpi slt, %8, %9 : vector<8x128xi32>
    %cst_9 = arith.constant 0.000000e+00 : f32
    %11 = vector.broadcast %cst_9 : f32 to vector<8x128xf32>
    %12 = arith.select %10, %5, %11 : vector<8x128xi1>, vector<8x128xf32>
    %cst_10 = arith.constant dense<0.000000e+00> : vector<8xf32>
    %13 = vector.multi_reduction <add>, %12, %cst_10 [1] : vector<8x128xf32> to vector<8xf32>
    %14 = vector.shape_cast %13 : vector<8xf32> to vector<8x1xf32>
    %cst_11 = arith.constant 1.250000e-01 : f32
    %15 = vector.broadcast %cst_11 : f32 to vector<8x1xf32>
    %16 = arith.mulf %14, %15 : vector<8x1xf32>
    %17 = vector.broadcast %16 : vector<8x1xf32> to vector<8x128xf32>
    %18 = arith.subf %5, %17 : vector<8x128xf32>
    %cst_12 = arith.constant 0.000000e+00 : f32
    %19 = vector.broadcast %cst_12 : f32 to vector<8x128xf32>
    %20 = arith.select %10, %18, %19 : vector<8x128xi1>, vector<8x128xf32>
    %21 = arith.mulf %20, %20 : vector<8x128xf32>
    %cst_13 = arith.constant dense<0.000000e+00> : vector<8xf32>
    %22 = vector.multi_reduction <add>, %21, %cst_13 [1] : vector<8x128xf32> to vector<8xf32>
    %23 = vector.shape_cast %22 : vector<8xf32> to vector<8x1xf32>
    %cst_14 = arith.constant 1.250000e-01 : f32
    %24 = vector.broadcast %cst_14 : f32 to vector<8x1xf32>
    %25 = arith.mulf %23, %24 : vector<8x1xf32>
    %26 = vector.broadcast %16 : vector<8x1xf32> to vector<8x128xf32>
    %27 = arith.subf %5, %26 : vector<8x128xf32>
    %cst_15 = arith.constant 9.99999974E-6 : f32
    %28 = vector.broadcast %cst_15 : f32 to vector<8x1xf32>
    %29 = arith.addf %25, %28 : vector<8x1xf32>
    %30 = math.rsqrt %29 : vector<8x1xf32>
    %31 = vector.broadcast %30 : vector<8x1xf32> to vector<8x128xf32>
    %32 = arith.mulf %27, %31 : vector<8x128xf32>
    %33 = vector.broadcast %6 : vector<1x128xf32> to vector<8x128xf32>
    %34 = arith.mulf %32, %33 : vector<8x128xf32>
    %35 = vector.broadcast %7 : vector<1x128xf32> to vector<8x128xf32>
    %36 = arith.addf %34, %35 : vector<8x128xf32>
    %cst_16 = arith.constant 5.000000e-01 : f32
    %37 = vector.broadcast %cst_16 : f32 to vector<8x128xf32>
    %38 = arith.mulf %37, %36 : vector<8x128xf32>
    %39 = arith.mulf %36, %36 : vector<8x128xf32>
    %40 = arith.mulf %39, %36 : vector<8x128xf32>
    %cst_17 = arith.constant 4.471500e-02 : f32
    %41 = vector.broadcast %cst_17 : f32 to vector<8x128xf32>
    %42 = arith.mulf %41, %40 : vector<8x128xf32>
    %43 = arith.addf %36, %42 : vector<8x128xf32>
    %cst_18 = arith.constant 0.797884583 : f32
    %44 = vector.broadcast %cst_18 : f32 to vector<8x128xf32>
    %45 = arith.mulf %44, %43 : vector<8x128xf32>
    %46 = math.tanh %45 : vector<8x128xf32>
    %cst_19 = arith.constant 1.000000e+00 : f32
    %47 = vector.broadcast %cst_19 : f32 to vector<8x128xf32>
    %48 = arith.addf %47, %46 : vector<8x128xf32>
    %49 = arith.mulf %38, %48 : vector<8x128xf32>
    %50 = arith.truncf %49 : vector<8x128xf32> to vector<8x128xbf16>
    %c0_20 = arith.constant 0 : index
    %c0_21 = arith.constant 0 : index
    %51 = vector.load %arg6[%c0_20, %c0_21] : memref<8x128xbf16, #tpu.memory_space<vmem>>, vector<8x128xbf16>
    tpu.vector_store %arg6[%c0_20, %c0_21], %50 {strides = array<i32>} : memref<8x128xbf16, #tpu.memory_space<vmem>>, vector<8x128xbf16>,
    return
  }
  func.func @transform_0(%arg0: i32) -> (i32, i32) {
    %c0_i32 = arith.constant 0 : i32
    %c0_i32_0 = arith.constant 0 : i32
    return %arg0, %c0_i32 : i32, i32
  }
  func.func @transform_1(%arg0: i32) -> (i32, i32) {
    %c0_i32 = arith.constant 0 : i32
    %c0_i32_0 = arith.constant 0 : i32
    %c0_i32_1 = arith.constant 0 : i32
    return %c0_i32, %c0_i32_0 : i32, i32
  }
  func.func @transform_2(%arg0: i32) -> (i32, i32) {
    %c0_i32 = arith.constant 0 : i32
    %c0_i32_0 = arith.constant 0 : i32
    %c0_i32_1 = arith.constant 0 : i32
    return %c0_i32, %c0_i32_0 : i32, i32
  }
  func.func @transform_3(%arg0: i32) -> (i32, i32) {
    %c0_i32 = arith.constant 0 : i32
    %c0_i32_0 = arith.constant 0 : i32
    %c0_i32_1 = arith.constant 0 : i32
    return %c0_i32, %c0_i32_0 : i32, i32
  }
  func.func @transform_4(%arg0: i32) -> (i32, i32) {
    %c0_i32 = arith.constant 0 : i32
    %c0_i32_0 = arith.constant 0 : i32
    %c0_i32_1 = arith.constant 0 : i32
    return %c0_i32, %c0_i32_0 : i32, i32
  }
  func.func @transform_5(%arg0: i32) -> (i32, i32) {
    %c0_i32 = arith.constant 0 : i32
    %c0_i32_0 = arith.constant 0 : i32
    return %arg0, %c0_i32 : i32, i32
  }
}

module attributes {stable_mosaic.version = 11 : i64} {
  func.func @kernel(%arg0: i32, %arg1: memref<8x1280xbf16, #tpu.memory_space<vmem>>, %arg2: memref<1280x128xbf16, #tpu.memory_space<vmem>>, %arg3: memref<1x128xf32, #tpu.memory_space<vmem>>, %arg4: memref<1x128xf32, #tpu.memory_space<vmem>>, %arg5: memref<1x128xf32, #tpu.memory_space<vmem>>, %arg6: memref<8x128xbf16, #tpu.memory_space<vmem>>) attributes {dimension_semantics = [#tpu.dimension_semantics<parallel>], iteration_bounds = array<i64: 2>, scalar_prefetch = 0 : i64, scratch_operands = 0 : i64, tpu.core_type = #tpu.core_type<tc>, window_params = [{transform_indices = @transform_0, window_bounds = array<i64: 8, 1280>}, {pipeline_mode = #tpu.pipeline_mode<synchronous>, transform_indices = @transform_1, window_bounds = array<i64: 1280, 128>}, {pipeline_mode = #tpu.pipeline_mode<synchronous>, transform_indices = @transform_2, window_bounds = array<i64: 1, 128>}, {pipeline_mode = #tpu.pipeline_mode<synchronous>, transform_indices = @transform_3, window_bounds = array<i64: 1, 128>}, {pipeline_mode = #tpu.pipeline_mode<synchronous>, transform_indices = @transform_4, window_bounds = array<i64: 1, 128>}, {transform_indices = @transform_5, window_bounds = array<i64: 8, 128>}]} {
    %c0 = arith.constant 0 : index
    %c0_0 = arith.constant 0 : index
    %0 = vector.load %arg1[%c0, %c0_0] : memref<8x1280xbf16, #tpu.memory_space<vmem>>, vector<8x1280xbf16>
    %c0_1 = arith.constant 0 : index
    %c0_2 = arith.constant 0 : index
    %1 = vector.load %arg2[%c0_1, %c0_2] : memref<1280x128xbf16, #tpu.memory_space<vmem>>, vector<1280x128xbf16>
    %cst = arith.constant dense<0.000000e+00> : vector<8x128xf32>
    %2 = tpu.matmul %0, %1, %cst {dimension_numbers = #tpu.dot_dimension_numbers<[1], [0], [0], [1], [0, 0, 1, 1], [], []>} : vector<8x1280xbf16>, vector<1280x128xbf16>, vector<8x128xf32> -> vector<8x128xf32>
    %c0_3 = arith.constant 0 : index
    %c0_4 = arith.constant 0 : index
    %3 = vector.load %arg3[%c0_3, %c0_4] : memref<1x128xf32, #tpu.memory_space<vmem>>, vector<1x128xf32>
    %4 = vector.broadcast %3 : vector<1x128xf32> to vector<8x128xf32>
    %5 = arith.addf %2, %4 : vector<8x128xf32>
    %c0_5 = arith.constant 0 : index
    %c0_6 = arith.constant 0 : index
    %6 = vector.load %arg4[%c0_5, %c0_6] : memref<1x128xf32, #tpu.memory_space<vmem>>, vector<1x128xf32>
    %c0_7 = arith.constant 0 : index
    %c0_8 = arith.constant 0 : index
    %7 = vector.load %arg5[%c0_7, %c0_8] : memref<1x128xf32, #tpu.memory_space<vmem>>, vector<1x128xf32>
    %8 = tpu.iota {dimensions = array<i32: 1>} : vector<8x128xi32>
    %c16_i32 = arith.constant 16 : i32
    %9 = vector.broadcast %c16_i32 : i32 to vector<8x128xi32>
    %10 = arith.cmpi slt, %8, %9 : vector<8x128xi32>
    %cst_9 = arith.constant 0.000000e+00 : f32
    %11 = vector.broadcast %cst_9 : f32 to vector<8x128xf32>
    %12 = arith.select %10, %5, %11 : vector<8x128xi1>, vector<8x128xf32>
    %cst_10 = arith.constant dense<0.000000e+00> : vector<8xf32>
    %13 = vector.multi_reduction <add>, %12, %cst_10 [1] : vector<8x128xf32> to vector<8xf32>
    %14 = vector.shape_cast %13 : vector<8xf32> to vector<8x1xf32>
    %cst_11 = arith.constant 6.250000e-02 : f32
    %15 = vector.broadcast %cst_11 : f32 to vector<8x1xf32>
    %16 = arith.mulf %14, %15 : vector<8x1xf32>
    %17 = vector.broadcast %16 : vector<8x1xf32> to vector<8x128xf32>
    %18 = arith.subf %5, %17 : vector<8x128xf32>
    %cst_12 = arith.constant 0.000000e+00 : f32
    %19 = vector.broadcast %cst_12 : f32 to vector<8x128xf32>
    %20 = arith.select %10, %18, %19 : vector<8x128xi1>, vector<8x128xf32>
    %21 = arith.mulf %20, %20 : vector<8x128xf32>
    %cst_13 = arith.constant dense<0.000000e+00> : vector<8xf32>
    %22 = vector.multi_reduction <add>, %21, %cst_13 [1] : vector<8x128xf32> to vector<8xf32>
    %23 = vector.shape_cast %22 : vector<8xf32> to vector<8x1xf32>
    %cst_14 = arith.constant 6.250000e-02 : f32
    %24 = vector.broadcast %cst_14 : f32 to vector<8x1xf32>
    %25 = arith.mulf %23, %24 : vector<8x1xf32>
    %26 = vector.broadcast %16 : vector<8x1xf32> to vector<8x128xf32>
    %27 = arith.subf %5, %26 : vector<8x128xf32>
    %cst_15 = arith.constant 9.99999974E-6 : f32
    %28 = vector.broadcast %cst_15 : f32 to vector<8x1xf32>
    %29 = arith.addf %25, %28 : vector<8x1xf32>
    %30 = math.rsqrt %29 : vector<8x1xf32>
    %31 = vector.broadcast %30 : vector<8x1xf32> to vector<8x128xf32>
    %32 = arith.mulf %27, %31 : vector<8x128xf32>
    %33 = vector.broadcast %6 : vector<1x128xf32> to vector<8x128xf32>
    %34 = arith.mulf %32, %33 : vector<8x128xf32>
    %35 = vector.broadcast %7 : vector<1x128xf32> to vector<8x128xf32>
    %36 = arith.addf %34, %35 : vector<8x128xf32>
    %cst_16 = arith.constant 5.000000e-01 : f32
    %37 = vector.broadcast %cst_16 : f32 to vector<8x128xf32>
    %38 = arith.mulf %37, %36 : vector<8x128xf32>
    %39 = arith.mulf %36, %36 : vector<8x128xf32>
    %40 = arith.mulf %39, %36 : vector<8x128xf32>
    %cst_17 = arith.constant 4.471500e-02 : f32
    %41 = vector.broadcast %cst_17 : f32 to vector<8x128xf32>
    %42 = arith.mulf %41, %40 : vector<8x128xf32>
    %43 = arith.addf %36, %42 : vector<8x128xf32>
    %cst_18 = arith.constant 0.797884583 : f32
    %44 = vector.broadcast %cst_18 : f32 to vector<8x128xf32>
    %45 = arith.mulf %44, %43 : vector<8x128xf32>
    %46 = math.tanh %45 : vector<8x128xf32>
    %cst_19 = arith.constant 1.000000e+00 : f32
    %47 = vector.broadcast %cst_19 : f32 to vector<8x128xf32>
    %48 = arith.addf %47, %46 : vector<8x128xf32>
    %49 = arith.mulf %38, %48 : vector<8x128xf32>
    %50 = arith.truncf %49 : vector<8x128xf32> to vector<8x128xbf16>
    %c0_20 = arith.constant 0 : index
    %c0_21 = arith.constant 0 : index
    %51 = vector.load %arg6[%c0_20, %c0_21] : memref<8x128xbf16, #tpu.memory_space<vmem>>, vector<8x128xbf16>
    tpu.vector_store %arg6[%c0_20, %c0_21], %50 {strides = array<i32>} : memref<8x128xbf16, #tpu.memory_space<vmem>>, vector<8x128xbf16>,
    return
  }
  func.func @transform_0(%arg0: i32) -> (i32, i32) {
    %c0_i32 = arith.constant 0 : i32
    %c0_i32_0 = arith.constant 0 : i32
    return %arg0, %c0_i32 : i32, i32
  }
  func.func @transform_1(%arg0: i32) -> (i32, i32) {
    %c0_i32 = arith.constant 0 : i32
    %c0_i32_0 = arith.constant 0 : i32
    %c0_i32_1 = arith.constant 0 : i32
    return %c0_i32, %c0_i32_0 : i32, i32
  }
  func.func @transform_2(%arg0: i32) -> (i32, i32) {
    %c0_i32 = arith.constant 0 : i32
    %c0_i32_0 = arith.constant 0 : i32
    %c0_i32_1 = arith.constant 0 : i32
    return %c0_i32, %c0_i32_0 : i32, i32
  }
  func.func @transform_3(%arg0: i32) -> (i32, i32) {
    %c0_i32 = arith.constant 0 : i32
    %c0_i32_0 = arith.constant 0 : i32
    %c0_i32_1 = arith.constant 0 : i32
    return %c0_i32, %c0_i32_0 : i32, i32
  }
  func.func @transform_4(%arg0: i32) -> (i32, i32) {
    %c0_i32 = arith.constant 0 : i32
    %c0_i32_0 = arith.constant 0 : i32
    %c0_i32_1 = arith.constant 0 : i32
    return %c0_i32, %c0_i32_0 : i32, i32
  }
  func.func @transform_5(%arg0: i32) -> (i32, i32) {
    %c0_i32 = arith.constant 0 : i32
    %c0_i32_0 = arith.constant 0 : i32
    return %arg0, %c0_i32 : i32, i32
  }
}

module attributes {stable_mosaic.version = 11 : i64} {
  func.func @kernel(%arg0: i32, %arg1: memref<8x1664xbf16, #tpu.memory_space<vmem>>, %arg2: memref<1664x128xbf16, #tpu.memory_space<vmem>>, %arg3: memref<1x128xf32, #tpu.memory_space<vmem>>, %arg4: memref<1x128xf32, #tpu.memory_space<vmem>>, %arg5: memref<1x128xf32, #tpu.memory_space<vmem>>, %arg6: memref<8x128xbf16, #tpu.memory_space<vmem>>) attributes {dimension_semantics = [#tpu.dimension_semantics<parallel>], iteration_bounds = array<i64: 2>, scalar_prefetch = 0 : i64, scratch_operands = 0 : i64, tpu.core_type = #tpu.core_type<tc>, window_params = [{transform_indices = @transform_0, window_bounds = array<i64: 8, 1664>}, {pipeline_mode = #tpu.pipeline_mode<synchronous>, transform_indices = @transform_1, window_bounds = array<i64: 1664, 128>}, {pipeline_mode = #tpu.pipeline_mode<synchronous>, transform_indices = @transform_2, window_bounds = array<i64: 1, 128>}, {pipeline_mode = #tpu.pipeline_mode<synchronous>, transform_indices = @transform_3, window_bounds = array<i64: 1, 128>}, {pipeline_mode = #tpu.pipeline_mode<synchronous>, transform_indices = @transform_4, window_bounds = array<i64: 1, 128>}, {transform_indices = @transform_5, window_bounds = array<i64: 8, 128>}]} {
    %c0 = arith.constant 0 : index
    %c0_0 = arith.constant 0 : index
    %0 = vector.load %arg1[%c0, %c0_0] : memref<8x1664xbf16, #tpu.memory_space<vmem>>, vector<8x1664xbf16>
    %c0_1 = arith.constant 0 : index
    %c0_2 = arith.constant 0 : index
    %1 = vector.load %arg2[%c0_1, %c0_2] : memref<1664x128xbf16, #tpu.memory_space<vmem>>, vector<1664x128xbf16>
    %cst = arith.constant dense<0.000000e+00> : vector<8x128xf32>
    %2 = tpu.matmul %0, %1, %cst {dimension_numbers = #tpu.dot_dimension_numbers<[1], [0], [0], [1], [0, 0, 1, 1], [], []>} : vector<8x1664xbf16>, vector<1664x128xbf16>, vector<8x128xf32> -> vector<8x128xf32>
    %c0_3 = arith.constant 0 : index
    %c0_4 = arith.constant 0 : index
    %3 = vector.load %arg3[%c0_3, %c0_4] : memref<1x128xf32, #tpu.memory_space<vmem>>, vector<1x128xf32>
    %4 = vector.broadcast %3 : vector<1x128xf32> to vector<8x128xf32>
    %5 = arith.addf %2, %4 : vector<8x128xf32>
    %c0_5 = arith.constant 0 : index
    %c0_6 = arith.constant 0 : index
    %6 = vector.load %arg4[%c0_5, %c0_6] : memref<1x128xf32, #tpu.memory_space<vmem>>, vector<1x128xf32>
    %c0_7 = arith.constant 0 : index
    %c0_8 = arith.constant 0 : index
    %7 = vector.load %arg5[%c0_7, %c0_8] : memref<1x128xf32, #tpu.memory_space<vmem>>, vector<1x128xf32>
    %8 = tpu.iota {dimensions = array<i32: 1>} : vector<8x128xi32>
    %c32_i32 = arith.constant 32 : i32
    %9 = vector.broadcast %c32_i32 : i32 to vector<8x128xi32>
    %10 = arith.cmpi slt, %8, %9 : vector<8x128xi32>
    %cst_9 = arith.constant 0.000000e+00 : f32
    %11 = vector.broadcast %cst_9 : f32 to vector<8x128xf32>
    %12 = arith.select %10, %5, %11 : vector<8x128xi1>, vector<8x128xf32>
    %cst_10 = arith.constant dense<0.000000e+00> : vector<8xf32>
    %13 = vector.multi_reduction <add>, %12, %cst_10 [1] : vector<8x128xf32> to vector<8xf32>
    %14 = vector.shape_cast %13 : vector<8xf32> to vector<8x1xf32>
    %cst_11 = arith.constant 3.125000e-02 : f32
    %15 = vector.broadcast %cst_11 : f32 to vector<8x1xf32>
    %16 = arith.mulf %14, %15 : vector<8x1xf32>
    %17 = vector.broadcast %16 : vector<8x1xf32> to vector<8x128xf32>
    %18 = arith.subf %5, %17 : vector<8x128xf32>
    %cst_12 = arith.constant 0.000000e+00 : f32
    %19 = vector.broadcast %cst_12 : f32 to vector<8x128xf32>
    %20 = arith.select %10, %18, %19 : vector<8x128xi1>, vector<8x128xf32>
    %21 = arith.mulf %20, %20 : vector<8x128xf32>
    %cst_13 = arith.constant dense<0.000000e+00> : vector<8xf32>
    %22 = vector.multi_reduction <add>, %21, %cst_13 [1] : vector<8x128xf32> to vector<8xf32>
    %23 = vector.shape_cast %22 : vector<8xf32> to vector<8x1xf32>
    %cst_14 = arith.constant 3.125000e-02 : f32
    %24 = vector.broadcast %cst_14 : f32 to vector<8x1xf32>
    %25 = arith.mulf %23, %24 : vector<8x1xf32>
    %26 = vector.broadcast %16 : vector<8x1xf32> to vector<8x128xf32>
    %27 = arith.subf %5, %26 : vector<8x128xf32>
    %cst_15 = arith.constant 9.99999974E-6 : f32
    %28 = vector.broadcast %cst_15 : f32 to vector<8x1xf32>
    %29 = arith.addf %25, %28 : vector<8x1xf32>
    %30 = math.rsqrt %29 : vector<8x1xf32>
    %31 = vector.broadcast %30 : vector<8x1xf32> to vector<8x128xf32>
    %32 = arith.mulf %27, %31 : vector<8x128xf32>
    %33 = vector.broadcast %6 : vector<1x128xf32> to vector<8x128xf32>
    %34 = arith.mulf %32, %33 : vector<8x128xf32>
    %35 = vector.broadcast %7 : vector<1x128xf32> to vector<8x128xf32>
    %36 = arith.addf %34, %35 : vector<8x128xf32>
    %cst_16 = arith.constant 5.000000e-01 : f32
    %37 = vector.broadcast %cst_16 : f32 to vector<8x128xf32>
    %38 = arith.mulf %37, %36 : vector<8x128xf32>
    %39 = arith.mulf %36, %36 : vector<8x128xf32>
    %40 = arith.mulf %39, %36 : vector<8x128xf32>
    %cst_17 = arith.constant 4.471500e-02 : f32
    %41 = vector.broadcast %cst_17 : f32 to vector<8x128xf32>
    %42 = arith.mulf %41, %40 : vector<8x128xf32>
    %43 = arith.addf %36, %42 : vector<8x128xf32>
    %cst_18 = arith.constant 0.797884583 : f32
    %44 = vector.broadcast %cst_18 : f32 to vector<8x128xf32>
    %45 = arith.mulf %44, %43 : vector<8x128xf32>
    %46 = math.tanh %45 : vector<8x128xf32>
    %cst_19 = arith.constant 1.000000e+00 : f32
    %47 = vector.broadcast %cst_19 : f32 to vector<8x128xf32>
    %48 = arith.addf %47, %46 : vector<8x128xf32>
    %49 = arith.mulf %38, %48 : vector<8x128xf32>
    %50 = arith.truncf %49 : vector<8x128xf32> to vector<8x128xbf16>
    %c0_20 = arith.constant 0 : index
    %c0_21 = arith.constant 0 : index
    %51 = vector.load %arg6[%c0_20, %c0_21] : memref<8x128xbf16, #tpu.memory_space<vmem>>, vector<8x128xbf16>
    tpu.vector_store %arg6[%c0_20, %c0_21], %50 {strides = array<i32>} : memref<8x128xbf16, #tpu.memory_space<vmem>>, vector<8x128xbf16>,
    return
  }
  func.func @transform_0(%arg0: i32) -> (i32, i32) {
    %c0_i32 = arith.constant 0 : i32
    %c0_i32_0 = arith.constant 0 : i32
    return %arg0, %c0_i32 : i32, i32
  }
  func.func @transform_1(%arg0: i32) -> (i32, i32) {
    %c0_i32 = arith.constant 0 : i32
    %c0_i32_0 = arith.constant 0 : i32
    %c0_i32_1 = arith.constant 0 : i32
    return %c0_i32, %c0_i32_0 : i32, i32
  }
  func.func @transform_2(%arg0: i32) -> (i32, i32) {
    %c0_i32 = arith.constant 0 : i32
    %c0_i32_0 = arith.constant 0 : i32
    %c0_i32_1 = arith.constant 0 : i32
    return %c0_i32, %c0_i32_0 : i32, i32
  }
  func.func @transform_3(%arg0: i32) -> (i32, i32) {
    %c0_i32 = arith.constant 0 : i32
    %c0_i32_0 = arith.constant 0 : i32
    %c0_i32_1 = arith.constant 0 : i32
    return %c0_i32, %c0_i32_0 : i32, i32
  }
  func.func @transform_4(%arg0: i32) -> (i32, i32) {
    %c0_i32 = arith.constant 0 : i32
    %c0_i32_0 = arith.constant 0 : i32
    %c0_i32_1 = arith.constant 0 : i32
    return %c0_i32, %c0_i32_0 : i32, i32
  }
  func.func @transform_5(%arg0: i32) -> (i32, i32) {
    %c0_i32 = arith.constant 0 : i32
    %c0_i32_0 = arith.constant 0 : i32
    return %arg0, %c0_i32 : i32, i32
  }
}

module attributes {stable_mosaic.version = 11 : i64} {
  func.func @kernel(%arg0: i32, %arg1: memref<8x640xbf16, #tpu.memory_space<vmem>>, %arg2: memref<640x128xbf16, #tpu.memory_space<vmem>>, %arg3: memref<1x128xf32, #tpu.memory_space<vmem>>, %arg4: memref<1x128xf32, #tpu.memory_space<vmem>>, %arg5: memref<1x128xf32, #tpu.memory_space<vmem>>, %arg6: memref<8x128xbf16, #tpu.memory_space<vmem>>) attributes {dimension_semantics = [#tpu.dimension_semantics<parallel>], iteration_bounds = array<i64: 1>, scalar_prefetch = 0 : i64, scratch_operands = 0 : i64, tpu.core_type = #tpu.core_type<tc>, window_params = [{transform_indices = @transform_0, window_bounds = array<i64: 8, 640>}, {pipeline_mode = #tpu.pipeline_mode<synchronous>, transform_indices = @transform_1, window_bounds = array<i64: 640, 128>}, {pipeline_mode = #tpu.pipeline_mode<synchronous>, transform_indices = @transform_2, window_bounds = array<i64: 1, 128>}, {pipeline_mode = #tpu.pipeline_mode<synchronous>, transform_indices = @transform_3, window_bounds = array<i64: 1, 128>}, {pipeline_mode = #tpu.pipeline_mode<synchronous>, transform_indices = @transform_4, window_bounds = array<i64: 1, 128>}, {transform_indices = @transform_5, window_bounds = array<i64: 8, 128>}]} {
    %c0 = arith.constant 0 : index
    %c0_0 = arith.constant 0 : index
    %0 = vector.load %arg1[%c0, %c0_0] : memref<8x640xbf16, #tpu.memory_space<vmem>>, vector<8x640xbf16>
    %c0_1 = arith.constant 0 : index
    %c0_2 = arith.constant 0 : index
    %1 = vector.load %arg2[%c0_1, %c0_2] : memref<640x128xbf16, #tpu.memory_space<vmem>>, vector<640x128xbf16>
    %cst = arith.constant dense<0.000000e+00> : vector<8x128xf32>
    %2 = tpu.matmul %0, %1, %cst {dimension_numbers = #tpu.dot_dimension_numbers<[1], [0], [0], [1], [0, 0, 1, 1], [], []>} : vector<8x640xbf16>, vector<640x128xbf16>, vector<8x128xf32> -> vector<8x128xf32>
    %c0_3 = arith.constant 0 : index
    %c0_4 = arith.constant 0 : index
    %3 = vector.load %arg3[%c0_3, %c0_4] : memref<1x128xf32, #tpu.memory_space<vmem>>, vector<1x128xf32>
    %4 = vector.broadcast %3 : vector<1x128xf32> to vector<8x128xf32>
    %5 = arith.addf %2, %4 : vector<8x128xf32>
    %c0_5 = arith.constant 0 : index
    %c0_6 = arith.constant 0 : index
    %6 = vector.load %arg4[%c0_5, %c0_6] : memref<1x128xf32, #tpu.memory_space<vmem>>, vector<1x128xf32>
    %c0_7 = arith.constant 0 : index
    %c0_8 = arith.constant 0 : index
    %7 = vector.load %arg5[%c0_7, %c0_8] : memref<1x128xf32, #tpu.memory_space<vmem>>, vector<1x128xf32>
    %8 = tpu.iota {dimensions = array<i32: 1>} : vector<8x128xi32>
    %c64_i32 = arith.constant 64 : i32
    %9 = vector.broadcast %c64_i32 : i32 to vector<8x128xi32>
    %10 = arith.cmpi slt, %8, %9 : vector<8x128xi32>
    %cst_9 = arith.constant 0.000000e+00 : f32
    %11 = vector.broadcast %cst_9 : f32 to vector<8x128xf32>
    %12 = arith.select %10, %5, %11 : vector<8x128xi1>, vector<8x128xf32>
    %cst_10 = arith.constant dense<0.000000e+00> : vector<8xf32>
    %13 = vector.multi_reduction <add>, %12, %cst_10 [1] : vector<8x128xf32> to vector<8xf32>
    %14 = vector.shape_cast %13 : vector<8xf32> to vector<8x1xf32>
    %cst_11 = arith.constant 1.562500e-02 : f32
    %15 = vector.broadcast %cst_11 : f32 to vector<8x1xf32>
    %16 = arith.mulf %14, %15 : vector<8x1xf32>
    %17 = vector.broadcast %16 : vector<8x1xf32> to vector<8x128xf32>
    %18 = arith.subf %5, %17 : vector<8x128xf32>
    %cst_12 = arith.constant 0.000000e+00 : f32
    %19 = vector.broadcast %cst_12 : f32 to vector<8x128xf32>
    %20 = arith.select %10, %18, %19 : vector<8x128xi1>, vector<8x128xf32>
    %21 = arith.mulf %20, %20 : vector<8x128xf32>
    %cst_13 = arith.constant dense<0.000000e+00> : vector<8xf32>
    %22 = vector.multi_reduction <add>, %21, %cst_13 [1] : vector<8x128xf32> to vector<8xf32>
    %23 = vector.shape_cast %22 : vector<8xf32> to vector<8x1xf32>
    %cst_14 = arith.constant 1.562500e-02 : f32
    %24 = vector.broadcast %cst_14 : f32 to vector<8x1xf32>
    %25 = arith.mulf %23, %24 : vector<8x1xf32>
    %26 = vector.broadcast %16 : vector<8x1xf32> to vector<8x128xf32>
    %27 = arith.subf %5, %26 : vector<8x128xf32>
    %cst_15 = arith.constant 9.99999974E-6 : f32
    %28 = vector.broadcast %cst_15 : f32 to vector<8x1xf32>
    %29 = arith.addf %25, %28 : vector<8x1xf32>
    %30 = math.rsqrt %29 : vector<8x1xf32>
    %31 = vector.broadcast %30 : vector<8x1xf32> to vector<8x128xf32>
    %32 = arith.mulf %27, %31 : vector<8x128xf32>
    %33 = vector.broadcast %6 : vector<1x128xf32> to vector<8x128xf32>
    %34 = arith.mulf %32, %33 : vector<8x128xf32>
    %35 = vector.broadcast %7 : vector<1x128xf32> to vector<8x128xf32>
    %36 = arith.addf %34, %35 : vector<8x128xf32>
    %cst_16 = arith.constant 5.000000e-01 : f32
    %37 = vector.broadcast %cst_16 : f32 to vector<8x128xf32>
    %38 = arith.mulf %37, %36 : vector<8x128xf32>
    %39 = arith.mulf %36, %36 : vector<8x128xf32>
    %40 = arith.mulf %39, %36 : vector<8x128xf32>
    %cst_17 = arith.constant 4.471500e-02 : f32
    %41 = vector.broadcast %cst_17 : f32 to vector<8x128xf32>
    %42 = arith.mulf %41, %40 : vector<8x128xf32>
    %43 = arith.addf %36, %42 : vector<8x128xf32>
    %cst_18 = arith.constant 0.797884583 : f32
    %44 = vector.broadcast %cst_18 : f32 to vector<8x128xf32>
    %45 = arith.mulf %44, %43 : vector<8x128xf32>
    %46 = math.tanh %45 : vector<8x128xf32>
    %cst_19 = arith.constant 1.000000e+00 : f32
    %47 = vector.broadcast %cst_19 : f32 to vector<8x128xf32>
    %48 = arith.addf %47, %46 : vector<8x128xf32>
    %49 = arith.mulf %38, %48 : vector<8x128xf32>
    %50 = arith.truncf %49 : vector<8x128xf32> to vector<8x128xbf16>
    %c0_20 = arith.constant 0 : index
    %c0_21 = arith.constant 0 : index
    %51 = vector.load %arg6[%c0_20, %c0_21] : memref<8x128xbf16, #tpu.memory_space<vmem>>, vector<8x128xbf16>
    tpu.vector_store %arg6[%c0_20, %c0_21], %50 {strides = array<i32>} : memref<8x128xbf16, #tpu.memory_space<vmem>>, vector<8x128xbf16>,
    return
  }
  func.func @transform_0(%arg0: i32) -> (i32, i32) {
    %c0_i32 = arith.constant 0 : i32
    %c0_i32_0 = arith.constant 0 : i32
    return %arg0, %c0_i32 : i32, i32
  }
  func.func @transform_1(%arg0: i32) -> (i32, i32) {
    %c0_i32 = arith.constant 0 : i32
    %c0_i32_0 = arith.constant 0 : i32
    %c0_i32_1 = arith.constant 0 : i32
    return %c0_i32, %c0_i32_0 : i32, i32
  }
  func.func @transform_2(%arg0: i32) -> (i32, i32) {
    %c0_i32 = arith.constant 0 : i32
    %c0_i32_0 = arith.constant 0 : i32
    %c0_i32_1 = arith.constant 0 : i32
    return %c0_i32, %c0_i32_0 : i32, i32
  }
  func.func @transform_3(%arg0: i32) -> (i32, i32) {
    %c0_i32 = arith.constant 0 : i32
    %c0_i32_0 = arith.constant 0 : i32
    %c0_i32_1 = arith.constant 0 : i32
    return %c0_i32, %c0_i32_0 : i32, i32
  }
  func.func @transform_4(%arg0: i32) -> (i32, i32) {
    %c0_i32 = arith.constant 0 : i32
    %c0_i32_0 = arith.constant 0 : i32
    %c0_i32_1 = arith.constant 0 : i32
    return %c0_i32, %c0_i32_0 : i32, i32
  }
  func.func @transform_5(%arg0: i32) -> (i32, i32) {
    %c0_i32 = arith.constant 0 : i32
    %c0_i32_0 = arith.constant 0 : i32
    return %arg0, %c0_i32 : i32, i32
  }
}

module attributes {stable_mosaic.version = 11 : i64} {
  func.func @_bias_direct_kernel(%arg0: i32, %arg1: i32, %arg2: memref<8x128xbf16, #tpu.memory_space<vmem>>, %arg3: memref<128x128xbf16, #tpu.memory_space<vmem>>, %arg4: memref<1x128xf32, #tpu.memory_space<vmem>>, %arg5: memref<8x128xf32, #tpu.memory_space<vmem>>) attributes {dimension_semantics = [#tpu.dimension_semantics<parallel>, #tpu.dimension_semantics<parallel>], iteration_bounds = array<i64: 1, 1>, scalar_prefetch = 0 : i64, scratch_operands = 0 : i64, tpu.core_type = #tpu.core_type<tc>, window_params = [{transform_indices = @transform_0, window_bounds = array<i64: 8, 128>}, {transform_indices = @transform_1, window_bounds = array<i64: 128, 128>}, {transform_indices = @transform_2, window_bounds = array<i64: 1, 128>}, {transform_indices = @transform_3, window_bounds = array<i64: 8, 128>}]} {
    %c0 = arith.constant 0 : index
    %c0_0 = arith.constant 0 : index
    %0 = vector.load %arg2[%c0, %c0_0] : memref<8x128xbf16, #tpu.memory_space<vmem>>, vector<8x128xbf16>
    %c0_1 = arith.constant 0 : index
    %c0_2 = arith.constant 0 : index
    %1 = vector.load %arg3[%c0_1, %c0_2] : memref<128x128xbf16, #tpu.memory_space<vmem>>, vector<128x128xbf16>
    %cst = arith.constant dense<0.000000e+00> : vector<8x128xf32>
    %2 = tpu.matmul %0, %1, %cst {dimension_numbers = #tpu.dot_dimension_numbers<[1], [0], [0], [1], [0, 0, 1, 1], [], []>} : vector<8x128xbf16>, vector<128x128xbf16>, vector<8x128xf32> -> vector<8x128xf32>
    %c0_3 = arith.constant 0 : index
    %c0_4 = arith.constant 0 : index
    %3 = vector.load %arg4[%c0_3, %c0_4] : memref<1x128xf32, #tpu.memory_space<vmem>>, vector<1x128xf32>
    %4 = vector.broadcast %3 : vector<1x128xf32> to vector<8x128xf32>
    %5 = arith.addf %2, %4 : vector<8x128xf32>
    %c0_5 = arith.constant 0 : index
    %c0_6 = arith.constant 0 : index
    %6 = vector.load %arg5[%c0_5, %c0_6] : memref<8x128xf32, #tpu.memory_space<vmem>>, vector<8x128xf32>
    tpu.vector_store %arg5[%c0_5, %c0_6], %5 {strides = array<i32>} : memref<8x128xf32, #tpu.memory_space<vmem>>, vector<8x128xf32>,
    return
  }
  func.func @transform_0(%arg0: i32, %arg1: i32) -> (i32, i32) {
    %c0_i32 = arith.constant 0 : i32
    %c0_i32_0 = arith.constant 0 : i32
    return %arg0, %c0_i32 : i32, i32
  }
  func.func @transform_1(%arg0: i32, %arg1: i32) -> (i32, i32) {
    %c0_i32 = arith.constant 0 : i32
    %c0_i32_0 = arith.constant 0 : i32
    return %c0_i32, %arg1 : i32, i32
  }
  func.func @transform_2(%arg0: i32, %arg1: i32) -> (i32, i32) {
    %c0_i32 = arith.constant 0 : i32
    %c0_i32_0 = arith.constant 0 : i32
    return %c0_i32, %arg1 : i32, i32
  }
  func.func @transform_3(%arg0: i32, %arg1: i32) -> (i32, i32) {
    %c0_i32 = arith.constant 0 : i32
    return %arg0, %arg1 : i32, i32
  }
}

</mosaic_0001>

<bundles_post_ra>
// kernel: era5_encode.7
= control target key start
LH: loop header
LB: loop body
LE: loop exit
PB: predicated region body
PF: predicated region fallthrough
CT: control target
= control target key end

     0   :  { %s5509_s18 = smov 0   ;;  %s6773_s0 = inlined_call_operand.vmem [shape: bf16[128,3456], index: 0, kind: input, shape index: {}]   ;;  %s6774_s1 = inlined_call_operand.vmem [shape: bf16[3456,128], index: 1, kind: input, shape index: {}]   ;;  %s6775_s2 = inlined_call_operand.vmem [shape: f32[1,128], index: 2, kind: input, shape index: {}]   ;;  %s6776_s3 = inlined_call_operand.vmem [shape: f32[1,128], index: 3, kind: input, shape index: {}]   ;;  %s6777_s4 = inlined_call_operand.vmem [shape: f32[1,128], index: 4, kind: input, shape index: {}]   ;;  %s6778_s5 = inlined_call_operand.vmem [shape: bf16[128,128], index: 5, kind: output, shape index: {}]  }
   0x1 LB: > { %s3749_s19 = sadd.s32 4294967295, %s5477_s18   ;;  %p3753_p0 = scmp.ge.s32.totalorder %s5477_s18, 1  ;;  %s5477_s18 = sphi %s5509_s18, %s15_s18  }
   0x2   : > { %p189_p1 = scmp.lt.s32.totalorder %s5477_s18, 3 }
   0x4   : > { %p190_p2 = pnand %p3753_p0, %p189_p1 }
   0x5   : > { %s3754_s13 = sshll.u32 (!%p190_p2), %s3749_s19, 3 }
   0x6   : > { %193 = sbr.rel (%p190_p2) target bundleno = 905 (0x389), region = 40  ;;  %p219_p3 = scmp.lt.s32.totalorder (!%p190_p2), %s3754_s13, 15 }
   0xb   : > { %v5171_v0 = vld [vmem:[%s6774_s1 + $0x38] sm:$0xff]  ;;  %v5170_v3 = vld [vmem:[%s6774_s1 + $0x30] sm:$0xff]  ;;  %v5169_v6 = vld [vmem:[%s6774_s1 + $0x28] sm:$0xff]  ;;  %s6780_s13 = smov (!%p219_p3, %s3754_s13), 15 }
   0xc   : > { %v5179_v1 = vld [vmem:[%s6774_s1 + $0x78] sm:$0xff]  ;;  %2619 = vmatpush.bf16.msra.mxu0 %v5171_v0  ;;  %5403 = vmatpush.bf16.msra.mxu3 %v5171_v0  ;;  %v5178_v4 = vld [vmem:[%s6774_s1 + $0x70] sm:$0xff]  ;;  %v5177_v7 = vld [vmem:[%s6774_s1 + $0x68] sm:$0xff]  ;;  %s5427_s29 = smul.u32 108, %s6780_s13  ;;  %s3757_s20 = sshll.u32 %s6780_s13, 2 }
   0xd   : > { %v5187_v2 = vld [vmem:[%s6774_s1 + $0xb8] sm:$0xff]  ;;  %2648 = vmatpush.bf16.msra.mxu1 %v5179_v1  ;;  %v5186_v5 = vld [vmem:[%s6774_s1 + $0xb0] sm:$0xff]  ;;  %v5185_v8 = vld [vmem:[%s6774_s1 + $0xa8] sm:$0xff]  ;;  %s6757_s22 = scalar_lea.vmem %s6778_s5, %s3757_s20 }
   0xe   : > { %2677 = vmatpush.bf16.msra.mxu2 %v5187_v2  ;;  %v5168_v9 = vld [vmem:[%s6774_s1 + $0x20] sm:$0xff]  ;;  %v5167_v12 = vld [vmem:[%s6774_s1 + $0x18] sm:$0xff]  ;;  %v5166_v15 = vld [vmem:[%s6774_s1 + $0x10] sm:$0xff]  ;;  %s5580_s14 = scalar_lea.vmem %s6773_s0, %s5427_s29 }
   0xf   : > { %v5176_v10 = vld [vmem:[%s6774_s1 + $0x60] sm:$0xff]  ;;  %v5175_v13 = vld [vmem:[%s6774_s1 + $0x58] sm:$0xff]  ;;  %v5174_v16 = vld [vmem:[%s6774_s1 + $0x50] sm:$0xff] }
  0x10   : > { %2620 = vmatpush.bf16.msra.mxu0 %v5170_v3  ;;  %5404 = vmatpush.bf16.msra.mxu3 %v5170_v3  ;;  %v5184_v11 = vld [vmem:[%s6774_s1 + $0xa0] sm:$0xff]  ;;  %v5183_v14 = vld [vmem:[%s6774_s1 + $0x98] sm:$0xff]  ;;  %v5182_v17 = vld [vmem:[%s6774_s1 + $0x90] sm:$0xff] }
  0x11   : > { %2649 = vmatpush.bf16.msra.mxu1 %v5178_v4  ;;  %v5165_v18 = vld [vmem:[%s6774_s1 + $0x8] sm:$0xff]  ;;  %v5164_v21 = vld [vmem:[%s6774_s1] sm:$0xff]  ;;  %v3976_v26 = vld [vmem:[%s5580_s14 + $0x1b0] sm:$0xf] }
  0x12   : > { %2678 = vmatpush.bf16.msra.mxu2 %v5186_v5  ;;  %v5173_v19 = vld [vmem:[%s6774_s1 + $0x48] sm:$0xff]  ;;  %v5172_v22 = vld [vmem:[%s6774_s1 + $0x40] sm:$0xff]  ;;  %v5123_v27 = vld [vmem:[%s5580_s14 + $0x218] sm:$0xf0] }
  0x13   : > { %v5181_v20 = vld [vmem:[%s6774_s1 + $0x88] sm:$0xff]  ;;  %v5180_v23 = vld [vmem:[%s6774_s1 + $0x80] sm:$0xff]  ;;  %v3762_v29 = vld [vmem:[%s5580_s14 + $0x6c] sm:$0xf0]  ;;  %v3977_v35 = vor.u32 %v5123_v27, %v3976_v26 }
  0x14   : > { %2621 = vmatpush.bf16.msra.mxu0 %v5169_v6  ;;  %5405 = vmatpush.bf16.msra.mxu3 %v5169_v6  ;;  %v3760_v24 = vld [vmem:[%s5580_s14] sm:$0xf]  ;;  %v5069_v25 = vld [vmem:[%s5580_s14 + $0x68] sm:$0xf0]  ;;  %v5056_v28 = vld [vmem:[%s5580_s14 + $0x4] sm:$0xf] }
  0x15   : > { %2650 = vmatpush.bf16.msra.mxu1 %v5177_v7  ;;  %v3768_v30 = vld [vmem:[%s5580_s14 + $0x8] sm:$0xf]  ;;  %v5070_v31 = vld [vmem:[%s5580_s14 + $0x70] sm:$0xf0]  ;;  %v5219_v32 = vld [vmem:[%s6774_s1 + $0x1b8] sm:$0xff]  ;;  %v3761_v34 = vor.u32 %v5069_v25, %v3760_v24  ;;  %v3765_v36 = vor.u32 %v5056_v28, %v3762_v29 }
  0x16   : > { %2679 = vmatpush.bf16.msra.mxu2 %v5185_v8  ;;  %v5195_v33 = vld [vmem:[%s6774_s1 + $0xf8] sm:$0xff]  ;;  %v3769_v37 = vor.u32 %v5070_v31, %v3768_v30  ;;  %v5194_v40 = vld [vmem:[%s6774_s1 + $0xf0] sm:$0xff]  ;;  %v5193_v44 = vld [vmem:[%s6774_s1 + $0xe8] sm:$0xff] }
  0x17   : > { %v5203_v38 = vld [vmem:[%s6774_s1 + $0x138] sm:$0xff]  ;;  %v5218_v41 = vld [vmem:[%s6774_s1 + $0x1b0] sm:$0xff]  ;;  %v5217_v45 = vld [vmem:[%s6774_s1 + $0x1a8] sm:$0xff] }
  0x18   : > { %2622 = vmatpush.bf16.msra.mxu0 %v5168_v9  ;;  %5406 = vmatpush.bf16.msra.mxu3 %v5168_v9  ;;  %v5211_v39 = vld [vmem:[%s6774_s1 + $0x178] sm:$0xff]  ;;  %v5202_v42 = vld [vmem:[%s6774_s1 + $0x130] sm:$0xff]  ;;  %v5201_v46 = vld [vmem:[%s6774_s1 + $0x128] sm:$0xff] }
  0x19   : > { %2651 = vmatpush.bf16.msra.mxu1 %v5176_v10  ;;  %v5210_v43 = vld [vmem:[%s6774_s1 + $0x170] sm:$0xff]  ;;  %v5209_v47 = vld [vmem:[%s6774_s1 + $0x168] sm:$0xff]  ;;  %v5192_v48 = vld [vmem:[%s6774_s1 + $0xe0] sm:$0xff] }
  0x1a   : > { %2680 = vmatpush.bf16.msra.mxu2 %v5184_v11  ;;  %v5216_v49 = vld [vmem:[%s6774_s1 + $0x1a0] sm:$0xff]  ;;  %v3868_v51 = vld [vmem:[%s5580_s14 + $0xd8] sm:$0xf]  ;;  %v4084_v53 = vld [vmem:[%s5580_s14 + $0x288] sm:$0xf] }
  0x1b   : > { %v5200_v50 = vld [vmem:[%s6774_s1 + $0x120] sm:$0xff]  ;;  %v5150_v54 = vld [vmem:[%s5580_s14 + $0x2f0] sm:$0xf0]  ;;  %v5083_v55 = vld [vmem:[%s5580_s14 + $0xdc] sm:$0xf] }
  0x1c   : > { %2623 = vmatpush.bf16.msra.mxu0 %v5167_v12  ;;  %5407 = vmatpush.bf16.msra.mxu3 %v5167_v12  ;;  %v5096_v52 = vld [vmem:[%s5580_s14 + $0x140] sm:$0xf0]  ;;  %v3870_v56 = vld [vmem:[%s5580_s14 + $0x144] sm:$0xf0]  ;;  %v3876_v57 = vld [vmem:[%s5580_s14 + $0xe0] sm:$0xf]  ;;  %v4085_v63 = vor.u32 %v5150_v54, %v4084_v53 }
  0x1d   : > { %2652 = vmatpush.bf16.msra.mxu1 %v5175_v13  ;;  %v5097_v58 = vld [vmem:[%s5580_s14 + $0x148] sm:$0xf0]  ;;  %v5208_v59 = vld [vmem:[%s6774_s1 + $0x160] sm:$0xff]  ;;  %v5191_v60 = vld [vmem:[%s6774_s1 + $0xd8] sm:$0xff]  ;;  %v3869_v62 = vor.u32 %v5096_v52, %v3868_v51  ;;  %v3873_v0 = vor.u32 %v5083_v55, %v3870_v56 }
  0x1e   : > { %2681 = vmatpush.bf16.msra.mxu2 %v5183_v14  ;;  %v5215_v61 = vld [vmem:[%s6774_s1 + $0x198] sm:$0xff]  ;;  %v3877_v1 = vor.u32 %v5097_v58, %v3876_v57  ;;  %v5190_v4 = vld [vmem:[%s6774_s1 + $0xd0] sm:$0xff]  ;;  %v5189_v8 = vld [vmem:[%s6774_s1 + $0xc8] sm:$0xff] }
  0x1f   : > { %v5199_v2 = vld [vmem:[%s6774_s1 + $0x118] sm:$0xff]  ;;  %v5214_v5 = vld [vmem:[%s6774_s1 + $0x190] sm:$0xff]  ;;  %v5213_v9 = vld [vmem:[%s6774_s1 + $0x188] sm:$0xff] }
  0x20   : > { %2624 = vmatpush.bf16.msra.mxu0 %v5166_v15  ;;  %5408 = vmatpush.bf16.msra.mxu3 %v5166_v15  ;;  %v5207_v3 = vld [vmem:[%s6774_s1 + $0x158] sm:$0xff]  ;;  %v5198_v6 = vld [vmem:[%s6774_s1 + $0x110] sm:$0xff]  ;;  %v5197_v10 = vld [vmem:[%s6774_s1 + $0x108] sm:$0xff] }
  0x21   : > { %2653 = vmatpush.bf16.msra.mxu1 %v5174_v16  ;;  %v5206_v7 = vld [vmem:[%s6774_s1 + $0x150] sm:$0xff]  ;;  %v5205_v11 = vld [vmem:[%s6774_s1 + $0x148] sm:$0xff]  ;;  %v5188_v12 = vld [vmem:[%s6774_s1 + $0xc0] sm:$0xff] }
  0x22   : > { %2682 = vmatpush.bf16.msra.mxu2 %v5182_v17  ;;  %v5212_v13 = vld [vmem:[%s6774_s1 + $0x180] sm:$0xff]  ;;  %v5110_v15 = vld [vmem:[%s5580_s14 + $0x1b4] sm:$0xf]  ;;  %v5227_v16 = vld [vmem:[%s6774_s1 + $0x1f8] sm:$0xff] }
  0x23   : > { %v5196_v14 = vld [vmem:[%s6774_s1 + $0x100] sm:$0xff]  ;;  %v5071_v24 = vld [vmem:[%s5580_s14 + $0x78] sm:$0xf0]  ;;  %v5226_v30 = vld [vmem:[%s6774_s1 + $0x1f0] sm:$0xff] }
  0x24   : > { %2625 = vmatpush.bf16.msra.mxu0 %v5165_v18  ;;  %5409 = vmatpush.bf16.msra.mxu3 %v5165_v18  ;;  %v3978_v17 = vld [vmem:[%s5580_s14 + $0x21c] sm:$0xf0]  ;;  %v5057_v18 = vld [vmem:[%s5580_s14 + $0xc] sm:$0xf]  ;;  %v5235_v25 = vld [vmem:[%s6774_s1 + $0x238] sm:$0xff] }
  0x25   : > { %2654 = vmatpush.bf16.msra.mxu1 %v5173_v19  ;;  %v3770_v19 = vld [vmem:[%s5580_s14 + $0x74] sm:$0xf0]  ;;  %v3981_v27 = vor.u32 %v5110_v15, %v3978_v17  ;;  %v5234_v31 = vld [vmem:[%s6774_s1 + $0x230] sm:$0xff]  ;;  %v5249_v55 = vld [vmem:[%s6774_s1 + $0x2a8] sm:$0xff] }
  0x26   : > { %2683 = vmatpush.bf16.msra.mxu2 %v5181_v20  ;;  %v3984_v20 = vld [vmem:[%s5580_s14 + $0x1b8] sm:$0xf]  ;;  %v3773_v26 = vor.u32 %v5057_v18, %v3770_v19  ;;  %v5230_v53 = vld [vmem:[%s6774_s1 + $0x210] sm:$0xff]  ;;  %v5229_v56 = vld [vmem:[%s6774_s1 + $0x208] sm:$0xff] }
  0x27   : > { %v5222_v54 = vld [vmem:[%s6774_s1 + $0x1d0] sm:$0xff]  ;;  %v5221_v58 = vld [vmem:[%s6774_s1 + $0x1c8] sm:$0xff]  ;;  %v4094_v19 = vld [vmem:[%s5580_s14 + $0x2fc] sm:$0xf0] }
  0x28   : > { %2626 = vmatpush.bf16.msra.mxu0 %v5164_v21  ;;  %5410 = vmatpush.bf16.msra.mxu3 %v5164_v21  ;;  %v5124_v21 = vld [vmem:[%s5580_s14 + $0x220] sm:$0xf0]  ;;  %v5242_v57 = vld [vmem:[%s6774_s1 + $0x270] sm:$0xff] }
  0x29   : > { %2655 = vmatpush.bf16.msra.mxu1 %v5172_v22  ;;  %v5204_v22 = vld [vmem:[%s6774_s1 + $0x140] sm:$0xff]  ;;  %v3985_v28 = vor.u32 %v5124_v21, %v3984_v20  ;;  %v5246_v15 = vld [vmem:[%s6774_s1 + $0x290] sm:$0xff]  ;;  %v5085_v20 = vld [vmem:[%s5580_s14 + $0xec] sm:$0xf] }
  0x2a   : > { %2684 = vmatpush.bf16.msra.mxu2 %v5180_v23  ;;  %v3776_v23 = vld [vmem:[%s5580_s14 + $0x10] sm:$0xf]  ;;  %v5138_v18 = vld [vmem:[%s5580_s14 + $0x294] sm:$0xf]  ;;  %v3886_v21 = vld [vmem:[%s5580_s14 + $0x154] sm:$0xf0] }
  0x2b   : > { %2627 = vmatmul.bf16.vlgmr.msra.gmra.mxu0 %v3761_v34  ;;  %2637 = vmatmul.bf16.vlgmr.msra.gmra.mxu3 %v3977_v35  ;;  %v3777_v29 = vor.u32 %v5071_v24, %v3776_v23  ;;  %v5233_v34 = vld [vmem:[%s6774_s1 + $0x228] sm:$0xff]  ;;  %v5250_v35 = vld [vmem:[%s6774_s1 + $0x2b0] sm:$0xff]  ;;  %v5099_v23 = vld [vmem:[%s5580_s14 + $0x158] sm:$0xf0] }
  0x2c   : > { %2706 = vmatpush.bf16.msrb.mxu3 %v5195_v33  ;;  %2656 = vmatmul.bf16.vlgmr.msra.gmra.mxu1 %v3765_v36  ;;  %v5251_v33 = vld [vmem:[%s6774_s1 + $0x2b8] sm:$0xff]  ;;  %v5266_v17 = vld [vmem:[%s6774_s1 + $0x330] sm:$0xff] }
  0x2d   : > { %2685 = vmatmul.bf16.vlgmr.msra.gmra.mxu2 %v3769_v37  ;;  %2735 = vmatpush.bf16.msrb.mxu0 %v5203_v38  ;;  %v5243_v36 = vld [vmem:[%s6774_s1 + $0x278] sm:$0xff]  ;;  %v5224_v37 = vld [vmem:[%s6774_s1 + $0x1e0] sm:$0xff] }
  0x2e   : > { %2793 = vmatpush.bf16.msrb.mxu2 %v5219_v32  ;;  %2764 = vmatpush.bf16.msrb.mxu1 %v5211_v39  ;;  %v5225_v32 = vld [vmem:[%s6774_s1 + $0x1e8] sm:$0xff]  ;;  %v5232_v38 = vld [vmem:[%s6774_s1 + $0x220] sm:$0xff]  ;;  %v4100_v24 = vld [vmem:[%s5580_s14 + $0x298] sm:$0xf] }
  0x2f   : > { %v5137_v39 = vld [vmem:[%s5580_s14 + $0x28c] sm:$0xf] }
  0x30   : > { %2707 = vmatpush.bf16.msrb.mxu3 %v5194_v40  ;;  %v4086_v40 = vld [vmem:[%s5580_s14 + $0x2f4] sm:$0xf0] }
  0x31   : > { %2736 = vmatpush.bf16.msrb.mxu0 %v5202_v42  ;;  %v3878_v42 = vld [vmem:[%s5580_s14 + $0x14c] sm:$0xf0] }
  0x32   : > { %2794 = vmatpush.bf16.msrb.mxu2 %v5218_v41  ;;  %2765 = vmatpush.bf16.msrb.mxu1 %v5210_v43  ;;  %v5084_v41 = vld [vmem:[%s5580_s14 + $0xe4] sm:$0xf]  ;;  %v4092_v43 = vld [vmem:[%s5580_s14 + $0x290] sm:$0xf] }
  0x34   : > { %2708 = vmatpush.bf16.msrb.mxu3 %v5193_v44  ;;  %v5151_v44 = vld [vmem:[%s5580_s14 + $0x2f8] sm:$0xf0] }
  0x35   : > { %2737 = vmatpush.bf16.msrb.mxu0 %v5201_v46  ;;  %v3884_v46 = vld [vmem:[%s5580_s14 + $0xe8] sm:$0xf]  ;;  %v4093_v51 = vor.u32 %v5151_v44, %v4092_v43  ;;  %v5126_v43 = vld [vmem:[%s5580_s14 + $0x230] sm:$0xf0]  ;;  %v3792_v44 = vld [vmem:[%s5580_s14 + $0x20] sm:$0xf] }
  0x36   : > { %2795 = vmatpush.bf16.msrb.mxu2 %v5217_v45  ;;  %2766 = vmatpush.bf16.msrb.mxu1 %v5209_v47  ;;  %v5223_v45 = vld [vmem:[%s6774_s1 + $0x1d8] sm:$0xff]  ;;  %v5098_v47 = vld [vmem:[%s5580_s14 + $0x150] sm:$0xf0] }
  0x37   : > { %v3885_v52 = vor.u32 %v5098_v47, %v3884_v46 }
  0x38   : > { %2709 = vmatpush.bf16.msrb.mxu3 %v5192_v48  ;;  %v5231_v48 = vld [vmem:[%s6774_s1 + $0x218] sm:$0xff] }
  0x39   : > { %2738 = vmatpush.bf16.msrb.mxu0 %v5200_v50  ;;  %v4089_v50 = vor.u32 %v5137_v39, %v4086_v40  ;;  %v5059_v39 = vld [vmem:[%s5580_s14 + $0x1c] sm:$0xf]  ;;  %v3786_v40 = vld [vmem:[%s5580_s14 + $0x84] sm:$0xf0] }
  0x3a   : > { %2796 = vmatpush.bf16.msrb.mxu2 %v5216_v49  ;;  %2767 = vmatpush.bf16.msrb.mxu1 %v5208_v59  ;;  %v3881_v49 = vor.u32 %v5084_v41, %v3878_v42  ;;  %v5248_v59 = vld [vmem:[%s6774_s1 + $0x2a0] sm:$0xff]  ;;  %v3994_v41 = vld [vmem:[%s5580_s14 + $0x22c] sm:$0xf0]  ;;  %v4000_v42 = vld [vmem:[%s5580_s14 + $0x1c8] sm:$0xf]  ;;  %v3789_v46 = vor.u32 %v5059_v39, %v3786_v40 }
  0x3b   : > { %2632 = vmatmul.bf16.gmra.mxu0 %v3869_v62  ;;  %2642 = vmatmul.bf16.gmra.mxu3 %v4085_v63  ;;  %v5220_v62 = vld [vmem:[%s6774_s1 + $0x1c0] sm:$0xff]  ;;  %v5111_v63 = vld [vmem:[%s5580_s14 + $0x1bc] sm:$0xf] }
  0x3c   : > { %2710 = vmatpush.bf16.msrb.mxu3 %v5191_v60  ;;  %2661 = vmatmul.bf16.gmra.mxu1 %v3873_v0  ;;  %v5241_v60 = vld [vmem:[%s6774_s1 + $0x268] sm:$0xff] }
  0x3d   : > { %2690 = vmatmul.bf16.gmra.mxu2 %v3877_v1  ;;  %2739 = vmatpush.bf16.msrb.mxu0 %v5199_v2  ;;  %v3986_v0 = vld [vmem:[%s5580_s14 + $0x224] sm:$0xf0]  ;;  %v5058_v1 = vld [vmem:[%s5580_s14 + $0x14] sm:$0xf]  ;;  %v3778_v2 = vld [vmem:[%s5580_s14 + $0x7c] sm:$0xf0] }
  0x3e   : > { %2797 = vmatpush.bf16.msrb.mxu2 %v5215_v61  ;;  %2768 = vmatpush.bf16.msrb.mxu1 %v5207_v3  ;;  %v5228_v61 = vld [vmem:[%s6774_s1 + $0x200] sm:$0xff]  ;;  %v3784_v3 = vld [vmem:[%s5580_s14 + $0x18] sm:$0xf] }
  0x40   : > { %2711 = vmatpush.bf16.msrb.mxu3 %v5190_v4  ;;  %v5072_v4 = vld [vmem:[%s5580_s14 + $0x80] sm:$0xf0] }
  0x41   : > { %2740 = vmatpush.bf16.msrb.mxu0 %v5198_v6  ;;  %v5125_v6 = vld [vmem:[%s5580_s14 + $0x228] sm:$0xf0] }
  0x42   : > { %2798 = vmatpush.bf16.msrb.mxu2 %v5214_v5  ;;  %2769 = vmatpush.bf16.msrb.mxu1 %v5206_v7  ;;  %v3992_v5 = vld [vmem:[%s5580_s14 + $0x1c0] sm:$0xf]  ;;  %v3989_v7 = vor.u32 %v5111_v63, %v3986_v0  ;;  %v5100_v63 = vld [vmem:[%s5580_s14 + $0x160] sm:$0xf0] }
  0x44   : > { %2712 = vmatpush.bf16.msrb.mxu3 %v5189_v8  ;;  %v3781_v8 = vor.u32 %v5058_v1, %v3778_v2 }
  0x45   : > { %2741 = vmatpush.bf16.msrb.mxu0 %v5197_v10  ;;  %v3993_v10 = vor.u32 %v5125_v6, %v3992_v5  ;;  %v5254_v6 = vld [vmem:[%s6774_s1 + $0x2d0] sm:$0xff] }
  0x46   : > { %2799 = vmatpush.bf16.msrb.mxu2 %v5213_v9  ;;  %2770 = vmatpush.bf16.msrb.mxu1 %v5205_v11  ;;  %v3785_v9 = vor.u32 %v5072_v4, %v3784_v3  ;;  %v5247_v11 = vld [vmem:[%s6774_s1 + $0x298] sm:$0xff]  ;;  %v5262_v3 = vld [vmem:[%s6774_s1 + $0x310] sm:$0xff] }
  0x47   : > { %v5275_v4 = vld [vmem:[%s6774_s1 + $0x378] sm:$0xff] }
  0x48   : > { %2713 = vmatpush.bf16.msrb.mxu3 %v5188_v12  ;;  %v5240_v12 = vld [vmem:[%s6774_s1 + $0x260] sm:$0xff] }
  0x49   : > { %2742 = vmatpush.bf16.msrb.mxu0 %v5196_v14  ;;  %v5259_v14 = vld [vmem:[%s6774_s1 + $0x2f8] sm:$0xff] }
  0x4a   : > { %2800 = vmatpush.bf16.msrb.mxu2 %v5212_v13  ;;  %2771 = vmatpush.bf16.msrb.mxu1 %v5204_v22  ;;  %v5267_v13 = vld [vmem:[%s6774_s1 + $0x338] sm:$0xff]  ;;  %v3892_v22 = vld [vmem:[%s5580_s14 + $0xf0] sm:$0xf] }
  0x4b   : > { %2714 = vmatmul.bf16.vlgmr.msrb.gmra.mxu3 %v3773_v26  ;;  %v4097_v26 = vor.u32 %v5138_v18, %v4094_v19  ;;  %v5074_v18 = vld [vmem:[%s5580_s14 + $0x90] sm:$0xf0]  ;;  %v4008_v19 = vld [vmem:[%s5580_s14 + $0x1d0] sm:$0xf] }
  0x4c   : > { %2822 = vmatpush.bf16.msra.mxu3 %v5227_v16  ;;  %2666 = vmatmul.bf16.gmra.mxu1 %v3981_v27  ;;  %v5239_v16 = vld [vmem:[%s6774_s1 + $0x258] sm:$0xff]  ;;  %v3889_v27 = vor.u32 %v5085_v20, %v3886_v21 }
  0x4d   : > { %2851 = vmatpush.bf16.msra.mxu0 %v5235_v25  ;;  %2695 = vmatmul.bf16.gmra.mxu2 %v3985_v28  ;;  %v5152_v25 = vld [vmem:[%s5580_s14 + $0x300] sm:$0xf0]  ;;  %v3893_v28 = vor.u32 %v5099_v23, %v3892_v22  ;;  %v5127_v20 = vld [vmem:[%s5580_s14 + $0x238] sm:$0xf0] }
  0x4e   : > { %2743 = vmatmul.bf16.vlgmr.msrb.gmra.mxu0 %v3777_v29  ;;  %2909 = vmatpush.bf16.msra.mxu2 %v5251_v33  ;;  %v4101_v29 = vor.u32 %v5152_v25, %v4100_v24  ;;  %v5265_v33 = vld [vmem:[%s6774_s1 + $0x328] sm:$0xff]  ;;  %v5260_v25 = vld [vmem:[%s6774_s1 + $0x300] sm:$0xff] }
  0x4f   : > { %2880 = vmatpush.bf16.msra.mxu1 %v5243_v36  ;;  %v5237_v36 = vld [vmem:[%s6774_s1 + $0x248] sm:$0xff] }
  0x50   : > { %2823 = vmatpush.bf16.msra.mxu3 %v5226_v30  ;;  %v5245_v30 = vld [vmem:[%s6774_s1 + $0x288] sm:$0xff] }
  0x51   : > { %2852 = vmatpush.bf16.msra.mxu0 %v5234_v31  ;;  %v5258_v31 = vld [vmem:[%s6774_s1 + $0x2f0] sm:$0xff] }
  0x52   : > { %2910 = vmatpush.bf16.msra.mxu2 %v5250_v35  ;;  %v5257_v35 = vld [vmem:[%s6774_s1 + $0x2e8] sm:$0xff] }
  0x53   : > { %2881 = vmatpush.bf16.msra.mxu1 %v5242_v57  ;;  %v5086_v57 = vld [vmem:[%s5580_s14 + $0xf4] sm:$0xf] }
  0x54   : > { %2824 = vmatpush.bf16.msra.mxu3 %v5225_v32  ;;  %v5238_v32 = vld [vmem:[%s6774_s1 + $0x250] sm:$0xff] }
  0x55   : > { %2853 = vmatpush.bf16.msra.mxu0 %v5233_v34  ;;  %v5244_v34 = vld [vmem:[%s6774_s1 + $0x280] sm:$0xff] }
  0x56   : > { %2911 = vmatpush.bf16.msra.mxu2 %v5249_v55  ;;  %v5282_v55 = vld [vmem:[%s6774_s1 + $0x3b0] sm:$0xff] }
  0x57   : > { %2882 = vmatpush.bf16.msra.mxu1 %v5241_v60  ;;  %v4108_v60 = vld [vmem:[%s5580_s14 + $0x2a0] sm:$0xf] }
  0x58   : > { %2825 = vmatpush.bf16.msra.mxu3 %v5224_v37  ;;  %v5264_v37 = vld [vmem:[%s6774_s1 + $0x320] sm:$0xff] }
  0x59   : > { %2854 = vmatpush.bf16.msra.mxu0 %v5232_v38  ;;  %v5112_v38 = vld [vmem:[%s5580_s14 + $0x1c4] sm:$0xf] }
  0x5a   : > { %2912 = vmatpush.bf16.msra.mxu2 %v5248_v59  ;;  %v3997_v47 = vor.u32 %v5112_v38, %v3994_v41  ;;  %v4102_v59 = vld [vmem:[%s5580_s14 + $0x304] sm:$0xf0]  ;;  %v5299_v38 = vld [vmem:[%s6774_s1 + $0x438] sm:$0xff]  ;;  %v5278_v41 = vld [vmem:[%s6774_s1 + $0x390] sm:$0xff] }
  0x5b   : > { %2719 = vmatmul.bf16.gmra.mxu3 %v3881_v49  ;;  %2883 = vmatpush.bf16.msra.mxu1 %v5240_v12  ;;  %v5236_v49 = vld [vmem:[%s6774_s1 + $0x240] sm:$0xff] }
  0x5c   : > { %2826 = vmatpush.bf16.msra.mxu3 %v5223_v45  ;;  %2671 = vmatmul.bf16.gmra.mxu1 %v4089_v50  ;;  %v5073_v45 = vld [vmem:[%s5580_s14 + $0x88] sm:$0xf0]  ;;  %v5280_v12 = vld [vmem:[%s6774_s1 + $0x3a0] sm:$0xff] }
  0x5d   : > { %2855 = vmatpush.bf16.msra.mxu0 %v5231_v48  ;;  %2700 = vmatmul.bf16.gmra.mxu2 %v4093_v51  ;;  %v4001_v48 = vor.u32 %v5126_v43, %v4000_v42  ;;  %v3793_v50 = vor.u32 %v5073_v45, %v3792_v44  ;;  %v5256_v51 = vld [vmem:[%s6774_s1 + $0x2e0] sm:$0xff]  ;;  %v5291_v42 = vld [vmem:[%s6774_s1 + $0x3f8] sm:$0xff]  ;;  %v4110_v45 = vld [vmem:[%s5580_s14 + $0x30c] sm:$0xf0] }
  0x5e   : > { %2748 = vmatmul.bf16.gmra.mxu0 %v3885_v52  ;;  %2913 = vmatpush.bf16.msra.mxu2 %v5247_v11  ;;  %v5283_v52 = vld [vmem:[%s6774_s1 + $0x3b8] sm:$0xff]  ;;  %v5253_v11 = vld [vmem:[%s6774_s1 + $0x2c8] sm:$0xff]  ;;  %v5140_v44 = vld [vmem:[%s5580_s14 + $0x2a4] sm:$0xf] }
  0x5f   : > { %2884 = vmatpush.bf16.msra.mxu1 %v5239_v16  ;;  %v3794_v16 = vld [vmem:[%s5580_s14 + $0x8c] sm:$0xf0] }
  0x60   : > { %2827 = vmatpush.bf16.msra.mxu3 %v5222_v54  ;;  %v5255_v54 = vld [vmem:[%s6774_s1 + $0x2d8] sm:$0xff] }
  0x61   : > { %2856 = vmatpush.bf16.msra.mxu0 %v5230_v53  ;;  %v5263_v53 = vld [vmem:[%s6774_s1 + $0x318] sm:$0xff] }
  0x62   : > { %2914 = vmatpush.bf16.msra.mxu2 %v5246_v15  ;;  %v5060_v15 = vld [vmem:[%s5580_s14 + $0x24] sm:$0xf] }
  0x63   : > { %2885 = vmatpush.bf16.msra.mxu1 %v5238_v32  ;;  %v3797_v23 = vor.u32 %v5060_v15, %v3794_v16  ;;  %v5279_v32 = vld [vmem:[%s6774_s1 + $0x398] sm:$0xff]  ;;  %v5114_v16 = vld [vmem:[%s5580_s14 + $0x1d4] sm:$0xf] }
  0x64   : > { %2828 = vmatpush.bf16.msra.mxu3 %v5221_v58  ;;  %v3894_v58 = vld [vmem:[%s5580_s14 + $0x15c] sm:$0xf0] }
  0x65   : > { %2857 = vmatpush.bf16.msra.mxu0 %v5229_v56  ;;  %v5139_v56 = vld [vmem:[%s5580_s14 + $0x29c] sm:$0xf]  ;;  %v3897_v0 = vor.u32 %v5086_v57, %v3894_v58 }
  0x66   : > { %2915 = vmatpush.bf16.msra.mxu2 %v5245_v30  ;;  %v4105_v1 = vor.u32 %v5139_v56, %v4102_v59  ;;  %v5252_v30 = vld [vmem:[%s6774_s1 + $0x2c0] sm:$0xff]  ;;  %v5271_v59 = vld [vmem:[%s6774_s1 + $0x358] sm:$0xff] }
  0x67   : > { %2886 = vmatpush.bf16.msra.mxu1 %v5237_v36 }
  0x68   : > { %2829 = vmatpush.bf16.msra.mxu3 %v5220_v62  ;;  %v3900_v62 = vld [vmem:[%s5580_s14 + $0xf8] sm:$0xf] }
  0x69   : > { %2858 = vmatpush.bf16.msra.mxu0 %v5228_v61  ;;  %v5153_v61 = vld [vmem:[%s5580_s14 + $0x308] sm:$0xf0]  ;;  %v3901_v5 = vor.u32 %v5100_v63, %v3900_v62 }
  0x6a   : > { %2916 = vmatpush.bf16.msra.mxu2 %v5244_v34  ;;  %v4109_v2 = vor.u32 %v5153_v61, %v4108_v60  ;;  %v5298_v60 = vld [vmem:[%s6774_s1 + $0x430] sm:$0xff] }
  0x6b   : > { %2724 = vmatmul.bf16.gmra.mxu3 %v3989_v7  ;;  %2887 = vmatpush.bf16.msra.mxu1 %v5236_v49  ;;  %v5281_v7 = vld [vmem:[%s6774_s1 + $0x3a8] sm:$0xff] }
  0x6c   : > { %2772 = vmatmul.bf16.vlgmr.msrb.gmra.mxu1 %v3781_v8  ;;  %2938 = vmatpush.bf16.msrb.mxu3 %v5259_v14  ;;  %v5261_v8 = vld [vmem:[%s6774_s1 + $0x308] sm:$0xff]  ;;  %v4002_v14 = vld [vmem:[%s5580_s14 + $0x234] sm:$0xf0] }
  0x6d   : > { %2801 = vmatmul.bf16.vlgmr.msrb.gmra.mxu2 %v3785_v9  ;;  %2967 = vmatpush.bf16.msrb.mxu0 %v5267_v13  ;;  %v5274_v9 = vld [vmem:[%s6774_s1 + $0x370] sm:$0xff]  ;;  %v5113_v13 = vld [vmem:[%s5580_s14 + $0x1cc] sm:$0xf] }
  0x6e   : > { %2753 = vmatmul.bf16.gmra.mxu0 %v3993_v10  ;;  %3025 = vmatpush.bf16.msrb.mxu2 %v5283_v52  ;;  %v5910_v10 = vld [vmem:[%s6775_s2] ss:$0 sm:$0xff]  ;;  %v4005_v21 = vor.u32 %v5113_v13, %v4002_v14  ;;  %v5101_v49 = vld [vmem:[%s5580_s14 + $0x168] sm:$0xf0]  ;;  %v5154_v52 = vld [vmem:[%s5580_s14 + $0x310] sm:$0xf0] }
  0x6f   : > { %2996 = vmatpush.bf16.msrb.mxu1 %v5275_v4  ;;  %v5289_v13 = vld [vmem:[%s6774_s1 + $0x3e8] sm:$0xff] }
  0x70   : > { %2939 = vmatpush.bf16.msrb.mxu3 %v5258_v31  ;;  %v5269_v14 = vld [vmem:[%s6774_s1 + $0x348] sm:$0xff] }
  0x71   : > { %2968 = vmatpush.bf16.msrb.mxu0 %v5266_v17  ;;  %v3800_v17 = vld [vmem:[%s5580_s14 + $0x28] sm:$0xf] }
  0x72   : > { %3026 = vmatpush.bf16.msrb.mxu2 %v5282_v55  ;;  %v3801_v24 = vor.u32 %v5074_v18, %v3800_v17  ;;  %v5061_v17 = vld [vmem:[%s5580_s14 + $0x2c] sm:$0xf]  ;;  %v3802_v18 = vld [vmem:[%s5580_s14 + $0x94] sm:$0xf0] }
  0x73   : > { %2997 = vmatpush.bf16.msrb.mxu1 %v5274_v9 }
  0x74   : > { %2940 = vmatpush.bf16.msrb.mxu3 %v5257_v35 }
  0x75   : > { %2969 = vmatpush.bf16.msrb.mxu0 %v5265_v33 }
  0x76   : > { %3027 = vmatpush.bf16.msrb.mxu2 %v5281_v7  ;;  %v5270_v7 = vld [vmem:[%s6774_s1 + $0x350] sm:$0xff] }
  0x78   : > { %2941 = vmatpush.bf16.msrb.mxu3 %v5256_v51  ;;  %v4116_v51 = vld [vmem:[%s5580_s14 + $0x2a8] sm:$0xf] }
  0x79   : > { %2970 = vmatpush.bf16.msrb.mxu0 %v5264_v37  ;;  %v5272_v37 = vld [vmem:[%s6774_s1 + $0x360] sm:$0xff]  ;;  %v4117_v63 = vor.u32 %v5154_v52, %v4116_v51  ;;  %v5141_v51 = vld [vmem:[%s5580_s14 + $0x2ac] sm:$0xf] }
  0x7a   : > { %3028 = vmatpush.bf16.msrb.mxu2 %v5280_v12  ;;  %v5276_v12 = vld [vmem:[%s6774_s1 + $0x380] sm:$0xff] }
  0x7b   : > { %2729 = vmatmul.bf16.gmra.mxu3 %v4097_v26  ;;  %v5273_v26 = vld [vmem:[%s6774_s1 + $0x368] sm:$0xff]  ;;  %v5088_v52 = vld [vmem:[%s5580_s14 + $0x104] sm:$0xf] }
  0x7c   : > { %2777 = vmatmul.bf16.gmra.mxu1 %v3889_v27  ;;  %2942 = vmatpush.bf16.msrb.mxu3 %v5255_v54  ;;  %v4113_v54 = vor.u32 %v5140_v44, %v4110_v45  ;;  %v5295_v45 = vld [vmem:[%s6774_s1 + $0x418] sm:$0xff] }
  0x7d   : > { %2806 = vmatmul.bf16.gmra.mxu2 %v3893_v28  ;;  %2971 = vmatpush.bf16.msrb.mxu0 %v5263_v53 }
  0x7e   : > { %2758 = vmatmul.bf16.gmra.mxu0 %v4101_v29  ;;  %v4009_v29 = vor.u32 %v5127_v20, %v4008_v19  ;;  %2998 = vmatpush.bf16.msrb.mxu1 %v5273_v26  ;;  %v4010_v19 = vld [vmem:[%s5580_s14 + $0x23c] sm:$0xf0]  ;;  %v4016_v20 = vld [vmem:[%s5580_s14 + $0x1d8] sm:$0xf]  ;;  %v3805_v26 = vor.u32 %v5061_v17, %v3802_v18 }
  0x7f   : > { %3029 = vmatpush.bf16.msrb.mxu2 %v5279_v32  ;;  %v5268_v32 = vld [vmem:[%s6774_s1 + $0x340] sm:$0xff] }
  0x80   : > { %2943 = vmatpush.bf16.msrb.mxu3 %v5254_v6 }
  0x81   : > { %2972 = vmatpush.bf16.msrb.mxu0 %v5262_v3 }
  0x82   : > { %2999 = vmatpush.bf16.msrb.mxu1 %v5272_v37 }
  0x83   : > { %3030 = vmatpush.bf16.msrb.mxu2 %v5278_v41 }
  0x84   : > { %2944 = vmatpush.bf16.msrb.mxu3 %v5253_v11 }
  0x85   : > { %2973 = vmatpush.bf16.msrb.mxu0 %v5261_v8  ;;  %v5297_v8 = vld [vmem:[%s6774_s1 + $0x428] sm:$0xff] }
  0x86   : > { %3000 = vmatpush.bf16.msrb.mxu1 %v5271_v59  ;;  %v3916_v59 = vld [vmem:[%s5580_s14 + $0x108] sm:$0xf] }
  0x88   : > { %2945 = vmatpush.bf16.msrb.mxu3 %v5252_v30 }
  0x89   : > { %2974 = vmatpush.bf16.msrb.mxu0 %v5260_v25 }
  0x8a   : > { %3001 = vmatpush.bf16.msrb.mxu1 %v5270_v7  ;;  %v5307_v7 = vld [vmem:[%s6774_s1 + $0x478] sm:$0xff] }
  0x8b   : > { %2830 = vmatmul.bf16.vlgmr.msra.gmra.mxu3 %v3789_v46  ;;  %v5087_v46 = vld [vmem:[%s5580_s14 + $0xfc] sm:$0xf] }
  0x8c   : > { %2782 = vmatmul.bf16.gmra.mxu1 %v3997_v47  ;;  %3054 = vmatpush.bf16.msra.mxu3 %v5291_v42  ;;  %v3902_v47 = vld [vmem:[%s5580_s14 + $0x164] sm:$0xf0] }
  0x8d   : > { %2811 = vmatmul.bf16.gmra.mxu2 %v4001_v48  ;;  %v3908_v48 = vld [vmem:[%s5580_s14 + $0x100] sm:$0xf]  ;;  %v3905_v57 = vor.u32 %v5087_v46, %v3902_v47 }
  0x8e   : > { %2859 = vmatmul.bf16.vlgmr.msra.gmra.mxu0 %v3793_v50  ;;  %v3909_v58 = vor.u32 %v5101_v49, %v3908_v48  ;;  %3002 = vmatpush.bf16.msrb.mxu1 %v5269_v14  ;;  %v5287_v49 = vld [vmem:[%s6774_s1 + $0x3d8] sm:$0xff] }
  0x8f   : > { %3083 = vmatpush.bf16.msra.mxu0 %v5299_v38 }
  0x92   : > { %3003 = vmatpush.bf16.msrb.mxu1 %v5268_v32 }
  0x93   : > { %3084 = vmatpush.bf16.msra.mxu0 %v5298_v60  ;;  %v5102_v60 = vld [vmem:[%s5580_s14 + $0x170] sm:$0xf0] }
  0x97   : > { %3085 = vmatpush.bf16.msra.mxu0 %v5297_v8 }
  0x9b   : > { %2835 = vmatmul.bf16.gmra.mxu3 %v3897_v0 }
  0x9c   : > { %2787 = vmatmul.bf16.gmra.mxu1 %v4105_v1  ;;  %v5277_v1 = vld [vmem:[%s6774_s1 + $0x388] sm:$0xff] }
  0x9d   : > { %2816 = vmatmul.bf16.gmra.mxu2 %v4109_v2  ;;  %v5290_v2 = vld [vmem:[%s6774_s1 + $0x3f0] sm:$0xff] }
  0x9e   : > { %2864 = vmatmul.bf16.gmra.mxu0 %v3901_v5  ;;  %3031 = vmatpush.bf16.msrb.mxu2 %v5277_v1 }
  0x9f   : > { %3055 = vmatpush.bf16.msra.mxu3 %v5290_v2 }
  0xa2   : > { %3032 = vmatpush.bf16.msrb.mxu2 %v5276_v12 }
  0xa3   : > { %3056 = vmatpush.bf16.msra.mxu3 %v5289_v13  ;;  %v5313_v13 = vld [vmem:[%s6774_s1 + $0x4a8] sm:$0xff] }
  0xa8   : > { %v2628_v22 = vpop.f32.mrf.mxu0 }
  0xa9   : > { %v2629_v27 = vadd.f32 %v5910_v10, %v2628_v22  ;;  %v2657_v28 = vpop.f32.mrf.mxu1 }
  0xab   : > { %v2658_v31 = vadd.f32 %v2657_v28, %v2629_v27  ;;  %2840 = vmatmul.bf16.gmra.mxu3 %v4005_v21  ;;  %v5128_v21 = vld [vmem:[%s5580_s14 + $0x240] sm:$0xf0] }
  0xac   : > { %2888 = vmatmul.bf16.vlgmr.msra.gmra.mxu1 %v3797_v23  ;;  %v3808_v23 = vld [vmem:[%s5580_s14 + $0x30] sm:$0xf]  ;;  %v4017_v30 = vor.u32 %v5128_v21, %v4016_v20 }
  0xad   : > { %2917 = vmatmul.bf16.vlgmr.msra.gmra.mxu2 %v3801_v24  ;;  %v5075_v24 = vld [vmem:[%s5580_s14 + $0x98] sm:$0xf0]  ;;  %3112 = vmatpush.bf16.msra.mxu1 %v5307_v7  ;;  %v5306_v20 = vld [vmem:[%s6774_s1 + $0x470] sm:$0xff] }
  0xae   : > { %2869 = vmatmul.bf16.gmra.mxu0 %v4009_v29  ;;  %v5939_v33 = vpop.f32.mrf.mxu3  ;;  %v4013_v29 = vor.u32 %v5114_v16, %v4010_v19  ;;  %v5293_v19 = vld [vmem:[%s6774_s1 + $0x408] sm:$0xff] }
  0xaf   : > { %v2639_v27 = vadd.f32 %v5910_v10, %v5939_v33  ;;  %v5288_v33 = vld [vmem:[%s6774_s1 + $0x3e0] sm:$0xff] }
  0xb0   : > { %v2686_v34 = vpop.f32.mrf.mxu2  ;;  %v2630_v36 = vpop.f32.mrf.mxu0  ;;  %3057 = vmatpush.bf16.msra.mxu3 %v5288_v33 }
  0xb1   : > { %v5941_v35 = vadd.f32 %v2686_v34, %v2658_v31  ;;  %v2631_v39 = vadd.f32 %v5910_v10, %v2630_v36  ;;  %v2659_v40 = vpop.f32.mrf.mxu1  ;;  %v5296_v31 = vld [vmem:[%s6774_s1 + $0x420] sm:$0xff]  ;;  %v3809_v36 = vor.u32 %v5075_v24, %v3808_v23  ;;  %3113 = vmatpush.bf16.msra.mxu1 %v5306_v20 }
  0xb2   : > { %3086 = vmatpush.bf16.msra.mxu0 %v5296_v31  ;;  %v5312_v24 = vld [vmem:[%s6774_s1 + $0x4a0] sm:$0xff] }
  0xb3   : > { %v2660_v43 = vadd.f32 %v2659_v40, %v2631_v39  ;;  %v5315_v39 = vld [vmem:[%s6774_s1 + $0x4b8] sm:$0xff]  ;;  %v5076_v31 = vld [vmem:[%s5580_s14 + $0xa0] sm:$0xf0] }
  0xb4   : > { %3141 = vmatpush.bf16.msra.mxu2 %v5315_v39  ;;  %3058 = vmatpush.bf16.msra.mxu3 %v5287_v49 }
  0xb6   : > { %v5962_v50 = vpop.f32.mrf.mxu3  ;;  %3087 = vmatpush.bf16.msra.mxu0 %v5295_v45 }
  0xb8   : > { %v2688_v53 = vpop.f32.mrf.mxu2  ;;  %v2633_v56 = vpop.f32.mrf.mxu0 }
  0xb9   : > { %v5966_v55 = vadd.f32 %v2688_v53, %v2660_v43  ;;  %v2634_v61 = vadd.f32 %v5910_v10, %v2633_v56  ;;  %v2662_v62 = vpop.f32.mrf.mxu1  ;;  %v2641_v43 = vadd.f32 %v5910_v10, %v5962_v50  ;;  %v5314_v50 = vld [vmem:[%s6774_s1 + $0x4b0] sm:$0xff] }
  0xba   : > { %v3910_v53 = vld [vmem:[%s5580_s14 + $0x16c] sm:$0xf0]  ;;  %3142 = vmatpush.bf16.msra.mxu2 %v5314_v50  ;;  %v5311_v50 = vld [vmem:[%s6774_s1 + $0x498] sm:$0xff] }
  0xbb   : > { %v2663_v0 = vadd.f32 %v2662_v62, %v2634_v61  ;;  %2845 = vmatmul.bf16.gmra.mxu3 %v4113_v54  ;;  %v4118_v54 = vld [vmem:[%s5580_s14 + $0x314] sm:$0xf0]  ;;  %v4124_v56 = vld [vmem:[%s5580_s14 + $0x2b0] sm:$0xf] }
  0xbc   : > { %2893 = vmatmul.bf16.gmra.mxu1 %v3905_v57  ;;  %v5155_v57 = vld [vmem:[%s5580_s14 + $0x318] sm:$0xf0]  ;;  %v4121_v2 = vor.u32 %v5141_v51, %v4118_v54  ;;  %v5304_v54 = vld [vmem:[%s6774_s1 + $0x460] sm:$0xff] }
  0xbd   : > { %2922 = vmatmul.bf16.gmra.mxu2 %v3909_v58 }
  0xbe   : > { %2874 = vmatmul.bf16.gmra.mxu0 %v4117_v63  ;;  %v5981_v3 = vpop.f32.mrf.mxu3  ;;  %v3913_v63 = vor.u32 %v5088_v52, %v3910_v53  ;;  %3143 = vmatpush.bf16.msra.mxu2 %v5313_v13 }
  0xc0   : > { %v2691_v4 = vpop.f32.mrf.mxu2  ;;  %v2635_v6 = vpop.f32.mrf.mxu0 }
  0xc1   : > { %v5983_v5 = vadd.f32 %v2691_v4, %v2663_v0  ;;  %v2636_v9 = vadd.f32 %v5910_v10, %v2635_v6  ;;  %v2664_v11 = vpop.f32.mrf.mxu1  ;;  %v2644_v0 = vadd.f32 %v5910_v10, %v5981_v3  ;;  %v4125_v4 = vor.u32 %v5155_v57, %v4124_v56  ;;  %v5294_v6 = vld [vmem:[%s6774_s1 + $0x410] sm:$0xff]  ;;  %v5331_v56 = vld [vmem:[%s6774_s1 + $0x538] sm:$0xff] }
  0xc2   : > { %3088 = vmatpush.bf16.msra.mxu0 %v5294_v6  ;;  %v5286_v3 = vld [vmem:[%s6774_s1 + $0x3d0] sm:$0xff]  ;;  %3144 = vmatpush.bf16.msra.mxu2 %v5312_v24  ;;  %v5103_v6 = vld [vmem:[%s5580_s14 + $0x178] sm:$0xf0] }
  0xc3   : > { %v2665_v15 = vadd.f32 %v2664_v11, %v2636_v9  ;;  %v3917_v9 = vor.u32 %v5102_v60, %v3916_v59  ;;  %3059 = vmatpush.bf16.msra.mxu3 %v5286_v3  ;;  %v5310_v60 = vld [vmem:[%s6774_s1 + $0x490] sm:$0xff] }
  0xc6   : > { %v6007_v22 = vpop.f32.mrf.mxu3  ;;  %3089 = vmatpush.bf16.msra.mxu0 %v5293_v19  ;;  %3145 = vmatpush.bf16.msra.mxu2 %v5311_v50 }
  0xc7   : > { %v2646_v17 = vadd.f32 %v5910_v10, %v6007_v22  ;;  %v5285_v22 = vld [vmem:[%s6774_s1 + $0x3c8] sm:$0xff] }
  0xc8   : > { %v2693_v25 = vpop.f32.mrf.mxu2  ;;  %3060 = vmatpush.bf16.msra.mxu3 %v5285_v22 }
  0xc9   : > { %v6013_v28 = vadd.f32 %v2693_v25, %v2665_v15  ;;  %v2667_v34 = vpop.f32.mrf.mxu1  ;;  %v5115_v25 = vld [vmem:[%s5580_s14 + $0x1dc] sm:$0xf] }
  0xca   : > { %v2668_v37 = vadd.f32 %v2667_v34, %v2639_v27  ;;  %v5062_v27 = vld [vmem:[%s5580_s14 + $0x34] sm:$0xf]  ;;  %v4024_v34 = vld [vmem:[%s5580_s14 + $0x1e0] sm:$0xf]  ;;  %3146 = vmatpush.bf16.msra.mxu2 %v5310_v60  ;;  %v5347_v60 = vld [vmem:[%s6774_s1 + $0x5b8] sm:$0xff] }
  0xcb   : > { %v2744_v38 = vpop.f32.mrf.mxu0  ;;  %2946 = vmatmul.bf16.vlgmr.msrb.gmra.mxu3 %v3805_v26  ;;  %v4018_v26 = vld [vmem:[%s5580_s14 + $0x244] sm:$0xf0] }
  0xcc   : > { %2898 = vmatmul.bf16.gmra.mxu1 %v4013_v29  ;;  %v3810_v29 = vld [vmem:[%s5580_s14 + $0x9c] sm:$0xf0]  ;;  %v4021_v33 = vor.u32 %v5115_v25, %v4018_v26  ;;  %v5302_v26 = vld [vmem:[%s6774_s1 + $0x450] sm:$0xff] }
  0xcd   : > { %2927 = vmatmul.bf16.gmra.mxu2 %v4017_v30  ;;  %v3816_v30 = vld [vmem:[%s5580_s14 + $0x38] sm:$0xf] }
  0xce   : > { %2975 = vmatmul.bf16.vlgmr.msrb.gmra.mxu0 %v3809_v36  ;;  %v2715_v40 = vpop.f32.mrf.mxu3  ;;  %v5129_v36 = vld [vmem:[%s5580_s14 + $0x248] sm:$0xf0] }
  0xcf   : > { %v2716_v42 = vadd.f32 %v2715_v40, %v5941_v35  ;;  %v3813_v40 = vor.u32 %v5062_v27, %v3810_v29  ;;  %v5329_v27 = vld [vmem:[%s6774_s1 + $0x528] sm:$0xff] }
  0xd0   : > { %v2696_v41 = vpop.f32.mrf.mxu2 }
  0xd1   : > { %v6030_v44 = vadd.f32 %v2696_v41, %v2668_v37  ;;  %v2669_v46 = vpop.f32.mrf.mxu1  ;;  %v6035_v47 = vadd.f32 %v2744_v38, %v2716_v42  ;;  %v3817_v41 = vor.u32 %v5076_v31, %v3816_v30  ;;  %v5292_v42 = vld [vmem:[%s6774_s1 + $0x400] sm:$0xff] }
  0xd2   : > { %v2670_v35 = vadd.f32 %v2669_v46, %v2641_v43  ;;  %v5305_v43 = vld [vmem:[%s6774_s1 + $0x468] sm:$0xff]  ;;  %v4025_v46 = vor.u32 %v5129_v36, %v4024_v34  ;;  %3090 = vmatpush.bf16.msra.mxu0 %v5292_v42  ;;  %v5130_v42 = vld [vmem:[%s5580_s14 + $0x250] sm:$0xf0] }
  0xd3   : > { %v2746_v48 = vpop.f32.mrf.mxu0  ;;  %3114 = vmatpush.bf16.msra.mxu1 %v5305_v43  ;;  %v5321_v34 = vld [vmem:[%s6774_s1 + $0x4e8] sm:$0xff] }
  0xd4   : > { %v5301_v36 = vld [vmem:[%s6774_s1 + $0x448] sm:$0xff] }
  0xd6   : > { %v2717_v58 = vpop.f32.mrf.mxu3  ;;  %3199 = vmatpush.bf16.msrb.mxu0 %v5331_v56 }
  0xd7   : > { %v2718_v62 = vadd.f32 %v2717_v58, %v5966_v55  ;;  %3115 = vmatpush.bf16.msra.mxu1 %v5304_v54 }
  0xd8   : > { %v2698_v61 = vpop.f32.mrf.mxu2 }
  0xd9   : > { %v6054_v1 = vadd.f32 %v2698_v61, %v2670_v35  ;;  %v2672_v8 = vpop.f32.mrf.mxu1  ;;  %v6062_v11 = vadd.f32 %v2746_v48, %v2718_v62  ;;  %v5323_v61 = vld [vmem:[%s6774_s1 + $0x4f8] sm:$0xff]  ;;  %v5142_v62 = vld [vmem:[%s5580_s14 + $0x2b4] sm:$0xf] }
  0xda   : > { %v2673_v55 = vadd.f32 %v2672_v8, %v2644_v0  ;;  %v5089_v0 = vld [vmem:[%s5580_s14 + $0x10c] sm:$0xf]  ;;  %v4132_v8 = vld [vmem:[%s5580_s14 + $0x2b8] sm:$0xf] }
  0xdb   : > { %v2749_v12 = vpop.f32.mrf.mxu0  ;;  %2951 = vmatmul.bf16.gmra.mxu3 %v3913_v63  ;;  %v4126_v63 = vld [vmem:[%s5580_s14 + $0x31c] sm:$0xf0] }
  0xdc   : > { %2903 = vmatmul.bf16.gmra.mxu1 %v4121_v2  ;;  %v3918_v2 = vld [vmem:[%s5580_s14 + $0x174] sm:$0xf0] }
  0xdd   : > { %2932 = vmatmul.bf16.gmra.mxu2 %v4125_v4  ;;  %v3924_v4 = vld [vmem:[%s5580_s14 + $0x110] sm:$0xf]  ;;  %v3921_v13 = vor.u32 %v5089_v0, %v3918_v2  ;;  %v5327_v0 = vld [vmem:[%s6774_s1 + $0x518] sm:$0xff] }
  0xde   : > { %2980 = vmatmul.bf16.gmra.mxu0 %v3917_v9  ;;  %v2720_v14 = vpop.f32.mrf.mxu3  ;;  %v5156_v9 = vld [vmem:[%s5580_s14 + $0x320] sm:$0xf0] }
  0xdf   : > { %v2721_v16 = vadd.f32 %v2720_v14, %v5983_v5  ;;  %v3925_v14 = vor.u32 %v5103_v6, %v3924_v4  ;;  %v4133_v19 = vor.u32 %v5156_v9, %v4132_v8  ;;  %v5346_v8 = vld [vmem:[%s6774_s1 + $0x5b0] sm:$0xff]  ;;  %v5143_v9 = vld [vmem:[%s5580_s14 + $0x2bc] sm:$0xf] }
  0xe0   : > { %v2701_v15 = vpop.f32.mrf.mxu2 }
  0xe1   : > { %v6073_v18 = vadd.f32 %v2701_v15, %v2673_v55  ;;  %v2674_v5 = vpop.f32.mrf.mxu1  ;;  %v6081_v21 = vadd.f32 %v2749_v12, %v2721_v16  ;;  %v4129_v12 = vor.u32 %v5142_v62, %v4126_v63  ;;  %v5303_v15 = vld [vmem:[%s6774_s1 + $0x458] sm:$0xff]  ;;  %v5330_v16 = vld [vmem:[%s6774_s1 + $0x530] sm:$0xff] }
  0xe2   : > { %v2675_v23 = vadd.f32 %v2674_v5, %v2646_v17  ;;  %3116 = vmatpush.bf16.msra.mxu1 %v5303_v15  ;;  %3200 = vmatpush.bf16.msrb.mxu0 %v5330_v16  ;;  %v3932_v16 = vld [vmem:[%s5580_s14 + $0x118] sm:$0xf] }
  0xe3   : > { %v2751_v10 = vpop.f32.mrf.mxu0 }
  0xe6   : > { %v2722_v32 = vpop.f32.mrf.mxu3  ;;  %3117 = vmatpush.bf16.msra.mxu1 %v5302_v26  ;;  %3201 = vmatpush.bf16.msrb.mxu0 %v5329_v27 }
  0xe7   : > { %v2723_v38 = vadd.f32 %v2722_v32, %v6013_v28  ;;  %v5284_v28 = vld [vmem:[%s6774_s1 + $0x3c0] sm:$0xff] }
  0xe8   : > { %v2703_v37 = vpop.f32.mrf.mxu2  ;;  %3061 = vmatpush.bf16.msra.mxu3 %v5284_v28  ;;  %v5308_v32 = vld [vmem:[%s6774_s1 + $0x480] sm:$0xff] }
  0xe9   : > { %v6098_v39 = vadd.f32 %v2703_v37, %v2675_v23  ;;  %v2773_v45 = vpop.f32.mrf.mxu1  ;;  %v6106_v35 = vadd.f32 %v2751_v10, %v2723_v38  ;;  %v5309_v23 = vld [vmem:[%s6774_s1 + $0x488] sm:$0xff]  ;;  %v5322_v10 = vld [vmem:[%s6774_s1 + $0x4f0] sm:$0xff]  ;;  %v5116_v37 = vld [vmem:[%s5580_s14 + $0x1e4] sm:$0xf] }
  0xea   : > { %v2774_v49 = vadd.f32 %v2773_v45, %v6035_v47  ;;  %3147 = vmatpush.bf16.msra.mxu2 %v5309_v23  ;;  %v5063_v38 = vld [vmem:[%s5580_s14 + $0x3c] sm:$0xf]  ;;  %v3824_v45 = vld [vmem:[%s5580_s14 + $0x40] sm:$0xf]  ;;  %3118 = vmatpush.bf16.msra.mxu1 %v5301_v36 }
  0xeb   : > { %v2754_v48 = vpop.f32.mrf.mxu0  ;;  %2956 = vmatmul.bf16.gmra.mxu3 %v4021_v33  ;;  %v3818_v33 = vld [vmem:[%s5580_s14 + $0xa4] sm:$0xf0] }
  0xec   : > { %3004 = vmatmul.bf16.vlgmr.msrb.gmra.mxu1 %v3813_v40  ;;  %3170 = vmatpush.bf16.msrb.mxu3 %v5323_v61  ;;  %v4026_v40 = vld [vmem:[%s5580_s14 + $0x24c] sm:$0xf0] }
  0xed   : > { %3033 = vmatmul.bf16.vlgmr.msrb.gmra.mxu2 %v3817_v41  ;;  %v4032_v41 = vld [vmem:[%s5580_s14 + $0x1e8] sm:$0xf]  ;;  %v4029_v50 = vor.u32 %v5116_v37, %v4026_v40 }
  0xee   : > { %2985 = vmatmul.bf16.gmra.mxu0 %v4025_v46  ;;  %v2725_v51 = vpop.f32.mrf.mxu3  ;;  %3148 = vmatpush.bf16.msra.mxu2 %v5308_v32  ;;  %v5077_v46 = vld [vmem:[%s5580_s14 + $0xa8] sm:$0xf0] }
  0xef   : > { %v2726_v52 = vadd.f32 %v2725_v51, %v6030_v44  ;;  %v4033_v51 = vor.u32 %v5130_v42, %v4032_v41  ;;  %v3825_v56 = vor.u32 %v5077_v46, %v3824_v45  ;;  %v5325_v37 = vld [vmem:[%s6774_s1 + $0x508] sm:$0xff]  ;;  %v4034_v46 = vld [vmem:[%s5580_s14 + $0x254] sm:$0xf0] }
  0xf0   : > { %v2802_v53 = vpop.f32.mrf.mxu2  ;;  %3171 = vmatpush.bf16.msrb.mxu3 %v5322_v10  ;;  %v5317_v42 = vld [vmem:[%s6774_s1 + $0x4c8] sm:$0xff] }
  0xf1   : > { %v6116_v47 = vadd.f32 %v2802_v53, %v2774_v49  ;;  %v2775_v57 = vpop.f32.mrf.mxu1  ;;  %v6124_v58 = vadd.f32 %v2754_v48, %v2726_v52  ;;  %v3821_v48 = vor.u32 %v5063_v38, %v3818_v33  ;;  %v5328_v52 = vld [vmem:[%s6774_s1 + $0x520] sm:$0xff]  ;;  %v5338_v38 = vld [vmem:[%s6774_s1 + $0x570] sm:$0xff]  ;;  %v5117_v45 = vld [vmem:[%s5580_s14 + $0x1ec] sm:$0xf] }
  0xf2   : > { %v2776_v59 = vadd.f32 %v2775_v57, %v6062_v11  ;;  %v5300_v53 = vld [vmem:[%s6774_s1 + $0x440] sm:$0xff]  ;;  %3202 = vmatpush.bf16.msrb.mxu0 %v5328_v52  ;;  %3257 = vmatpush.bf16.msrb.mxu2 %v5347_v60  ;;  %v4040_v52 = vld [vmem:[%s5580_s14 + $0x1f0] sm:$0xf] }
  0xf3   : > { %v2756_v44 = vpop.f32.mrf.mxu0  ;;  %3119 = vmatpush.bf16.msra.mxu1 %v5300_v53  ;;  %v5131_v53 = vld [vmem:[%s5580_s14 + $0x258] sm:$0xf0]  ;;  %v5324_v60 = vld [vmem:[%s6774_s1 + $0x500] sm:$0xff] }
  0xf4   : > { %3172 = vmatpush.bf16.msrb.mxu3 %v5321_v34 }
  0xf6   : > { %v2727_v7 = vpop.f32.mrf.mxu3  ;;  %3203 = vmatpush.bf16.msrb.mxu0 %v5327_v0  ;;  %3258 = vmatpush.bf16.msrb.mxu2 %v5346_v8 }
  0xf7   : > { %v2728_v11 = vadd.f32 %v2727_v7, %v6054_v1 }
  0xf8   : > { %v2804_v55 = vpop.f32.mrf.mxu2 }
  0xf9   : > { %v6142_v3 = vadd.f32 %v2804_v55, %v2776_v59  ;;  %v2778_v17 = vpop.f32.mrf.mxu1  ;;  %v6150_v20 = vadd.f32 %v2756_v44, %v2728_v11  ;;  %v5320_v59 = vld [vmem:[%s6774_s1 + $0x4e0] sm:$0xff]  ;;  %v5090_v11 = vld [vmem:[%s5580_s14 + $0x114] sm:$0xf] }
  0xfa   : > { %v2779_v1 = vadd.f32 %v2778_v17, %v6081_v21  ;;  %3173 = vmatpush.bf16.msrb.mxu3 %v5320_v59  ;;  %v3926_v55 = vld [vmem:[%s5580_s14 + $0x17c] sm:$0xf0]  ;;  %v5104_v17 = vld [vmem:[%s5580_s14 + $0x180] sm:$0xf0] }
  0xfb   : > { %v2759_v5 = vpop.f32.mrf.mxu0  ;;  %2961 = vmatmul.bf16.gmra.mxu3 %v4129_v12  ;;  %v4134_v12 = vld [vmem:[%s5580_s14 + $0x324] sm:$0xf0]  ;;  %v3933_v26 = vor.u32 %v5104_v17, %v3932_v16  ;;  %v5355_v16 = vld [vmem:[%s6774_s1 + $0x5f8] sm:$0xff]  ;;  %v5144_v17 = vld [vmem:[%s5580_s14 + $0x2c4] sm:$0xf] }
  0xfc   : > { %3009 = vmatmul.bf16.gmra.mxu1 %v3921_v13  ;;  %v4140_v13 = vld [vmem:[%s5580_s14 + $0x2c0] sm:$0xf]  ;;  %v4137_v23 = vor.u32 %v5143_v9, %v4134_v12 }
  0xfd   : > { %3038 = vmatmul.bf16.gmra.mxu2 %v3925_v14  ;;  %v5157_v14 = vld [vmem:[%s5580_s14 + $0x328] sm:$0xf0] }
  0xfe   : > { %2990 = vmatmul.bf16.gmra.mxu0 %v4133_v19  ;;  %v2730_v22 = vpop.f32.mrf.mxu3  ;;  %v4141_v10 = vor.u32 %v5157_v14, %v4140_v13 }
  0xff   : > { %v2731_v24 = vadd.f32 %v2730_v22, %v6073_v18  ;;  %v5326_v22 = vld [vmem:[%s6774_s1 + $0x510] sm:$0xff] }
 0x100   : > { %v2807_v25 = vpop.f32.mrf.mxu2  ;;  %3204 = vmatpush.bf16.msrb.mxu0 %v5326_v22 }
 0x101   : > { %v6160_v21 = vadd.f32 %v2807_v25, %v2779_v1  ;;  %v2780_v29 = vpop.f32.mrf.mxu1  ;;  %v6168_v18 = vadd.f32 %v2759_v5, %v2731_v24  ;;  %v3929_v5 = vor.u32 %v5090_v11, %v3926_v55  ;;  %v5339_v24 = vld [vmem:[%s6774_s1 + $0x578] sm:$0xff]  ;;  %v5336_v11 = vld [vmem:[%s6774_s1 + $0x560] sm:$0xff] }
 0x102   : > { %v2781_v31 = vadd.f32 %v2780_v29, %v6106_v35  ;;  %3228 = vmatpush.bf16.msrb.mxu1 %v5339_v24  ;;  %v5363_v55 = vld [vmem:[%s6774_s1 + $0x638] sm:$0xff]  ;;  %v4148_v24 = vld [vmem:[%s5580_s14 + $0x2c8] sm:$0xf] }
 0x103   : > { %v2761_v30 = vpop.f32.mrf.mxu0 }
 0x104   : > { %3205 = vmatpush.bf16.msrb.mxu0 %v5325_v37 }
 0x106   : > { %v2732_v43 = vpop.f32.mrf.mxu3  ;;  %3229 = vmatpush.bf16.msrb.mxu1 %v5338_v38 }
 0x107   : > { %v2733_v35 = vadd.f32 %v2732_v43, %v6098_v39  ;;  %v5344_v43 = vld [vmem:[%s6774_s1 + $0x5a0] sm:$0xff] }
 0x108   : > { %v2809_v28 = vpop.f32.mrf.mxu2  ;;  %3206 = vmatpush.bf16.msrb.mxu0 %v5324_v60  ;;  %v5132_v60 = vld [vmem:[%s5580_s14 + $0x260] sm:$0xf0] }
 0x109   : > { %v6189_v49 = vadd.f32 %v2809_v28, %v2781_v31  ;;  %v2783_v54 = vpop.f32.mrf.mxu1  ;;  %v6197_v57 = vadd.f32 %v2761_v30, %v2733_v35  ;;  %v5318_v30 = vld [vmem:[%s6774_s1 + $0x4d0] sm:$0xff]  ;;  %v5345_v31 = vld [vmem:[%s6774_s1 + $0x5a8] sm:$0xff]  ;;  %v5064_v35 = vld [vmem:[%s5580_s14 + $0x44] sm:$0xf] }
 0x10a   : > { %v2784_v39 = vadd.f32 %v2783_v54, %v6124_v58  ;;  %3259 = vmatpush.bf16.msrb.mxu2 %v5345_v31  ;;  %v3826_v28 = vld [vmem:[%s5580_s14 + $0xac] sm:$0xf0] }
 0x10b   : > { %v2860_v44 = vpop.f32.mrf.mxu0  ;;  %3062 = vmatmul.bf16.vlgmr.msra.gmra.mxu3 %v3821_v48  ;;  %v3832_v48 = vld [vmem:[%s5580_s14 + $0x48] sm:$0xf] }
 0x10c   : > { %3014 = vmatmul.bf16.gmra.mxu1 %v4029_v50  ;;  %v5078_v50 = vld [vmem:[%s5580_s14 + $0xb0] sm:$0xf0] }
 0x10d   : > { %3043 = vmatmul.bf16.gmra.mxu2 %v4033_v51  ;;  %v3833_v59 = vor.u32 %v5078_v50, %v3832_v48 }
 0x10e   : > { %3091 = vmatmul.bf16.vlgmr.msra.gmra.mxu0 %v3825_v56  ;;  %v2831_v61 = vpop.f32.mrf.mxu3  ;;  %3260 = vmatpush.bf16.msrb.mxu2 %v5344_v43 }
 0x10f   : > { %v2832_v62 = vadd.f32 %v2831_v61, %v6116_v47  ;;  %v5319_v47 = vld [vmem:[%s6774_s1 + $0x4d8] sm:$0xff]  ;;  %v5337_v61 = vld [vmem:[%s6774_s1 + $0x568] sm:$0xff]  ;;  %3315 = vmatpush.bf16.msra.mxu0 %v5363_v55 }
 0x110   : > { %v2812_v58 = vpop.f32.mrf.mxu2  ;;  %3174 = vmatpush.bf16.msrb.mxu3 %v5319_v47  ;;  %3230 = vmatpush.bf16.msrb.mxu1 %v5337_v61 }
 0x111   : > { %v6207_v63 = vadd.f32 %v2812_v58, %v2784_v39  ;;  %v2785_v2 = vpop.f32.mrf.mxu1  ;;  %v6212_v4 = vadd.f32 %v2860_v44, %v2832_v62  ;;  %v3829_v44 = vor.u32 %v5064_v35, %v3826_v28  ;;  %v4041_v62 = vor.u32 %v5131_v53, %v4040_v52  ;;  %v5361_v35 = vld [vmem:[%s6774_s1 + $0x628] sm:$0xff] }
 0x112   : > { %v2786_v6 = vadd.f32 %v2785_v2, %v6150_v20  ;;  %v5353_v52 = vld [vmem:[%s6774_s1 + $0x5e8] sm:$0xff] }
 0x113   : > { %v2862_v7 = vpop.f32.mrf.mxu0  ;;  %v5333_v53 = vld [vmem:[%s6774_s1 + $0x548] sm:$0xff] }
 0x114   : > { %3175 = vmatpush.bf16.msrb.mxu3 %v5318_v30  ;;  %3231 = vmatpush.bf16.msrb.mxu1 %v5336_v11 }
 0x116   : > { %v2833_v15 = vpop.f32.mrf.mxu3 }
 0x117   : > { %v2834_v20 = vadd.f32 %v2833_v15, %v6142_v3  ;;  %v5342_v15 = vld [vmem:[%s6774_s1 + $0x590] sm:$0xff] }
 0x118   : > { %v2814_v19 = vpop.f32.mrf.mxu2  ;;  %3176 = vmatpush.bf16.msrb.mxu3 %v5317_v42 }
 0x119   : > { %v6230_v1 = vadd.f32 %v2814_v19, %v2786_v6  ;;  %v2788_v25 = vpop.f32.mrf.mxu1  ;;  %v6238_v27 = vadd.f32 %v2862_v7, %v2834_v20  ;;  %v5343_v7 = vld [vmem:[%s6774_s1 + $0x598] sm:$0xff]  ;;  %v4142_v19 = vld [vmem:[%s5580_s14 + $0x32c] sm:$0xf0] }
 0x11a   : > { %v2789_v29 = vadd.f32 %v2788_v25, %v6168_v18  ;;  %3261 = vmatpush.bf16.msrb.mxu2 %v5343_v7  ;;  %v5091_v20 = vld [vmem:[%s5580_s14 + $0x11c] sm:$0xf]  ;;  %v5158_v25 = vld [vmem:[%s5580_s14 + $0x330] sm:$0xf0] }
 0x11b   : > { %v2865_v3 = vpop.f32.mrf.mxu0  ;;  %3067 = vmatmul.bf16.gmra.mxu3 %v3929_v5  ;;  %v3934_v5 = vld [vmem:[%s5580_s14 + $0x184] sm:$0xf0]  ;;  %v4149_v37 = vor.u32 %v5158_v25, %v4148_v24  ;;  %v6400_v24 = vld [vmem:[%s6774_s1 + $0x6b0] sm:$0xff]  ;;  %v5145_v25 = vld [vmem:[%s5580_s14 + $0x2cc] sm:$0xf] }
 0x11c   : > { %3019 = vmatmul.bf16.gmra.mxu1 %v4137_v23  ;;  %v3940_v23 = vld [vmem:[%s5580_s14 + $0x120] sm:$0xf]  ;;  %v3937_v30 = vor.u32 %v5091_v20, %v3934_v5  ;;  %v5359_v20 = vld [vmem:[%s6774_s1 + $0x618] sm:$0xff] }
 0x11d   : > { %3048 = vmatmul.bf16.gmra.mxu2 %v4141_v10  ;;  %v5105_v10 = vld [vmem:[%s5580_s14 + $0x188] sm:$0xf0] }
 0x11e   : > { %3096 = vmatmul.bf16.gmra.mxu0 %v3933_v26  ;;  %v2836_v32 = vpop.f32.mrf.mxu3  ;;  %3262 = vmatpush.bf16.msrb.mxu2 %v5342_v15  ;;  %v3941_v31 = vor.u32 %v5105_v10, %v3940_v23  ;;  %v6382_v15 = vld [vmem:[%s6774_s1 + $0x6b8] sm:$0xff] }
 0x11f   : > { %v2837_v18 = vadd.f32 %v2836_v32, %v6160_v21  ;;  %v5335_v32 = vld [vmem:[%s6774_s1 + $0x558] sm:$0xff] }
 0x120   : > { %v2817_v34 = vpop.f32.mrf.mxu2  ;;  %3232 = vmatpush.bf16.msrb.mxu1 %v5335_v32 }
 0x121   : > { %v6248_v36 = vadd.f32 %v2817_v34, %v2789_v29  ;;  %v2790_v33 = vpop.f32.mrf.mxu1  ;;  %v6256_v40 = vadd.f32 %v2865_v3, %v2837_v18  ;;  %v4145_v29 = vor.u32 %v5144_v17, %v4142_v19  ;;  %v5362_v34 = vld [vmem:[%s6774_s1 + $0x630] sm:$0xff] }
 0x122   : > { %v2791_v21 = vadd.f32 %v2790_v33, %v6197_v57  ;;  %v4037_v57 = vor.u32 %v5117_v45, %v4034_v46  ;;  %3316 = vmatpush.bf16.msra.mxu0 %v5362_v34  ;;  %v5334_v46 = vld [vmem:[%s6774_s1 + $0x550] sm:$0xff]  ;;  %v3948_v34 = vld [vmem:[%s5580_s14 + $0x128] sm:$0xf] }
 0x123   : > { %v2867_v41 = vpop.f32.mrf.mxu0 }
 0x124   : > { %3233 = vmatpush.bf16.msrb.mxu1 %v5334_v46 }
 0x126   : > { %v2838_v51 = vpop.f32.mrf.mxu3  ;;  %3317 = vmatpush.bf16.msra.mxu0 %v5361_v35 }
 0x127   : > { %v2839_v56 = vadd.f32 %v2838_v51, %v6189_v49  ;;  %v5316_v49 = vld [vmem:[%s6774_s1 + $0x4c0] sm:$0xff] }
 0x128   : > { %v2819_v54 = vpop.f32.mrf.mxu2  ;;  %3177 = vmatpush.bf16.msrb.mxu3 %v5316_v49  ;;  %v5340_v51 = vld [vmem:[%s6774_s1 + $0x580] sm:$0xff]  ;;  %3234 = vmatpush.bf16.msrb.mxu1 %v5333_v53 }
 0x129   : > { %v6274_v39 = vadd.f32 %v2819_v54, %v2791_v21  ;;  %v2889_v58 = vpop.f32.mrf.mxu1  ;;  %v6282_v0 = vadd.f32 %v2867_v41, %v2839_v56  ;;  %v5341_v21 = vld [vmem:[%s6774_s1 + $0x588] sm:$0xff]  ;;  %v5354_v41 = vld [vmem:[%s6774_s1 + $0x5f0] sm:$0xff] }
 0x12a   : > { %v2890_v6 = vadd.f32 %v2889_v58, %v6212_v4  ;;  %3263 = vmatpush.bf16.msrb.mxu2 %v5341_v21  ;;  %v5118_v54 = vld [vmem:[%s5580_s14 + $0x1f4] sm:$0xf]  ;;  %v5065_v56 = vld [vmem:[%s5580_s14 + $0x4c] sm:$0xf]  ;;  %v3840_v58 = vld [vmem:[%s5580_s14 + $0x50] sm:$0xf] }
 0x12b   : > { %v2870_v2 = vpop.f32.mrf.mxu0  ;;  %3072 = vmatmul.bf16.gmra.mxu3 %v4037_v57  ;;  %v3834_v57 = vld [vmem:[%s5580_s14 + $0xb4] sm:$0xf0] }
 0x12c   : > { %3120 = vmatmul.bf16.vlgmr.msra.gmra.mxu1 %v3829_v44  ;;  %3286 = vmatpush.bf16.msra.mxu3 %v5355_v16  ;;  %v4042_v44 = vld [vmem:[%s5580_s14 + $0x25c] sm:$0xf0] }
 0x12d   : > { %3149 = vmatmul.bf16.vlgmr.msra.gmra.mxu2 %v3833_v59  ;;  %v4048_v59 = vld [vmem:[%s5580_s14 + $0x1f8] sm:$0xf]  ;;  %v4045_v7 = vor.u32 %v5118_v54, %v4042_v44  ;;  %v5357_v54 = vld [vmem:[%s6774_s1 + $0x608] sm:$0xff] }
 0x12e   : > { %3101 = vmatmul.bf16.gmra.mxu0 %v4041_v62  ;;  %v2841_v47 = vpop.f32.mrf.mxu3  ;;  %3264 = vmatpush.bf16.msrb.mxu2 %v5340_v51  ;;  %v5079_v62 = vld [vmem:[%s5580_s14 + $0xb8] sm:$0xf0] }
 0x12f   : > { %v2842_v8 = vadd.f32 %v2841_v47, %v6207_v63  ;;  %v4049_v47 = vor.u32 %v5132_v60, %v4048_v59  ;;  %v3841_v55 = vor.u32 %v5079_v62, %v3840_v58  ;;  %v5349_v60 = vld [vmem:[%s6774_s1 + $0x5c8] sm:$0xff]  ;;  %v5119_v58 = vld [vmem:[%s5580_s14 + $0x1fc] sm:$0xf] }
 0x130   : > { %v2918_v9 = vpop.f32.mrf.mxu2  ;;  %3287 = vmatpush.bf16.msra.mxu3 %v5354_v41  ;;  %v4050_v62 = vld [vmem:[%s5580_s14 + $0x264] sm:$0xf0] }
 0x131   : > { %v6292_v4 = vadd.f32 %v2918_v9, %v2890_v6  ;;  %v2891_v12 = vpop.f32.mrf.mxu1  ;;  %v6300_v13 = vadd.f32 %v2870_v2, %v2842_v8  ;;  %v3837_v2 = vor.u32 %v5065_v56, %v3834_v57  ;;  %v5360_v8 = vld [vmem:[%s6774_s1 + $0x620] sm:$0xff]  ;;  %v5370_v56 = vld [vmem:[%s6774_s1 + $0x670] sm:$0xff] }
 0x132   : > { %v2892_v14 = vadd.f32 %v2891_v12, %v6238_v27  ;;  %v5332_v9 = vld [vmem:[%s6774_s1 + $0x540] sm:$0xff]  ;;  %3318 = vmatpush.bf16.msra.mxu0 %v5360_v8  ;;  %3373 = vmatpush.bf16.msra.mxu2 %v6382_v15 }
 0x133   : > { %v2872_v63 = vpop.f32.mrf.mxu0  ;;  %3235 = vmatpush.bf16.msrb.mxu1 %v5332_v9  ;;  %v4056_v8 = vld [vmem:[%s5580_s14 + $0x200] sm:$0xf]  ;;  %v5133_v9 = vld [vmem:[%s5580_s14 + $0x268] sm:$0xf0] }
 0x134   : > { %3288 = vmatpush.bf16.msra.mxu3 %v5353_v52 }
 0x136   : > { %v2843_v22 = vpop.f32.mrf.mxu3  ;;  %3319 = vmatpush.bf16.msra.mxu0 %v5359_v20  ;;  %3374 = vmatpush.bf16.msra.mxu2 %v6400_v24  ;;  %v4057_v20 = vor.u32 %v5133_v9, %v4056_v8  ;;  %v4064_v8 = vld [vmem:[%s5580_s14 + $0x208] sm:$0xf]  ;;  %v5134_v9 = vld [vmem:[%s5580_s14 + $0x270] sm:$0xf0] }
 0x137   : > { %v2844_v26 = vadd.f32 %v2843_v22, %v6230_v1  ;;  %v5351_v22 = vld [vmem:[%s6774_s1 + $0x5d8] sm:$0xff] }
 0x138   : > { %v2920_v27 = vpop.f32.mrf.mxu2 }
 0x139   : > { %v6318_v3 = vadd.f32 %v2920_v27, %v2892_v14  ;;  %v2894_v18 = vpop.f32.mrf.mxu1  ;;  %v6326_v38 = vadd.f32 %v2872_v63, %v2844_v26  ;;  %v5352_v14 = vld [vmem:[%s6774_s1 + $0x5e0] sm:$0xff]  ;;  %v3942_v27 = vld [vmem:[%s5580_s14 + $0x18c] sm:$0xf0] }
 0x13a   : > { %v2895_v1 = vadd.f32 %v2894_v18, %v6256_v40  ;;  %3289 = vmatpush.bf16.msra.mxu3 %v5352_v14  ;;  %v5092_v26 = vld [vmem:[%s5580_s14 + $0x124] sm:$0xf]  ;;  %v5106_v18 = vld [vmem:[%s5580_s14 + $0x190] sm:$0xf0] }
 0x13b   : > { %v2875_v33 = vpop.f32.mrf.mxu0  ;;  %3077 = vmatmul.bf16.gmra.mxu3 %v4145_v29  ;;  %v4150_v29 = vld [vmem:[%s5580_s14 + $0x334] sm:$0xf0]  ;;  %v3949_v46 = vor.u32 %v5106_v18, %v3948_v34  ;;  %v5146_v34 = vld [vmem:[%s5580_s14 + $0x2d4] sm:$0xf]  ;;  %v4158_v18 = vld [vmem:[%s5580_s14 + $0x33c] sm:$0xf0] }
 0x13c   : > { %3125 = vmatmul.bf16.gmra.mxu1 %v3937_v30  ;;  %v4156_v30 = vld [vmem:[%s5580_s14 + $0x2d0] sm:$0xf]  ;;  %v4153_v21 = vor.u32 %v5145_v25, %v4150_v29  ;;  %v5368_v29 = vld [vmem:[%s6774_s1 + $0x660] sm:$0xff] }
 0x13d   : > { %3154 = vmatmul.bf16.gmra.mxu2 %v3941_v31  ;;  %v5159_v31 = vld [vmem:[%s5580_s14 + $0x338] sm:$0xf0] }
 0x13e   : > { %3106 = vmatmul.bf16.gmra.mxu0 %v4149_v37  ;;  %v2846_v42 = vpop.f32.mrf.mxu3  ;;  %3290 = vmatpush.bf16.msra.mxu3 %v5351_v22  ;;  %v4157_v41 = vor.u32 %v5159_v31, %v4156_v30  ;;  %v5375_v22 = vld [vmem:[%s6774_s1 + $0x698] sm:$0xff] }
 0x13f   : > { %v2847_v43 = vadd.f32 %v2846_v42, %v6248_v36  ;;  %v5358_v42 = vld [vmem:[%s6774_s1 + $0x610] sm:$0xff] }
 0x140   : > { %v2923_v45 = vpop.f32.mrf.mxu2  ;;  %3320 = vmatpush.bf16.msra.mxu0 %v5358_v42  ;;  %v4164_v42 = vld [vmem:[%s5580_s14 + $0x2d8] sm:$0xf] }
 0x141   : > { %v6336_v40 = vadd.f32 %v2923_v45, %v2895_v1  ;;  %v2896_v28 = vpop.f32.mrf.mxu1  ;;  %v6344_v36 = vadd.f32 %v2875_v33, %v2847_v43  ;;  %v3945_v33 = vor.u32 %v5092_v26, %v3942_v27  ;;  %v5371_v43 = vld [vmem:[%s6774_s1 + $0x678] sm:$0xff] }
 0x142   : > { %v2897_v50 = vadd.f32 %v2896_v28, %v6282_v0  ;;  %5411 = vmatpush.bf16.msra.mxu1 %v5371_v43 }
 0x143   : > { %v2877_v48 = vpop.f32.mrf.mxu0 }
 0x144   : > { %3321 = vmatpush.bf16.msra.mxu0 %v5357_v54 }
 0x146   : > { %v2848_v61 = vpop.f32.mrf.mxu3  ;;  %5412 = vmatpush.bf16.msra.mxu1 %v5370_v56 }
 0x147   : > { %v2849_v0 = vadd.f32 %v2848_v61, %v6274_v39  ;;  %v6450_v61 = vld [vmem:[%s6774_s1 + $0x6a0] sm:$0xff] }
 0x148   : > { %v2925_v49 = vpop.f32.mrf.mxu2 }
 0x149   : > { %v6365_v6 = vadd.f32 %v2925_v49, %v2897_v50  ;;  %v2899_v11 = vpop.f32.mrf.mxu1  ;;  %v6373_v12 = vadd.f32 %v2877_v48, %v2849_v0  ;;  %v5350_v48 = vld [vmem:[%s6774_s1 + $0x5d0] sm:$0xff]  ;;  %v6429_v50 = vld [vmem:[%s6774_s1 + $0x6a8] sm:$0xff]  ;;  %v3842_v49 = vld [vmem:[%s5580_s14 + $0xbc] sm:$0xf0] }
 0x14a   : > { %v2900_v39 = vadd.f32 %v2899_v11, %v6300_v13  ;;  %3291 = vmatpush.bf16.msra.mxu3 %v5350_v48  ;;  %3375 = vmatpush.bf16.msra.mxu2 %v6429_v50  ;;  %v5066_v0 = vld [vmem:[%s5580_s14 + $0x54] sm:$0xf]  ;;  %v5367_v48 = vld [vmem:[%s6774_s1 + $0x658] sm:$0xff] }
 0x14b   : > { %v2976_v63 = vpop.f32.mrf.mxu0  ;;  %3178 = vmatmul.bf16.vlgmr.msrb.gmra.mxu3 %v3837_v2  ;;  %v3848_v2 = vld [vmem:[%s5580_s14 + $0x58] sm:$0xf] }
 0x14c   : > { %3130 = vmatmul.bf16.gmra.mxu1 %v4045_v7  ;;  %v5080_v7 = vld [vmem:[%s5580_s14 + $0xc0] sm:$0xf0] }
 0x14d   : > { %3159 = vmatmul.bf16.gmra.mxu2 %v4049_v47  ;;  %v3849_v14 = vor.u32 %v5080_v7, %v3848_v2  ;;  %v5067_v2 = vld [vmem:[%s5580_s14 + $0x5c] sm:$0xf]  ;;  %v3850_v7 = vld [vmem:[%s5580_s14 + $0xc4] sm:$0xf0] }
 0x14e   : > { %3207 = vmatmul.bf16.vlgmr.msrb.gmra.mxu0 %v3841_v55  ;;  %v2947_v16 = vpop.f32.mrf.mxu3  ;;  %3292 = vmatpush.bf16.msra.mxu3 %v5349_v60 }
 0x14f   : > { %v2948_v17 = vadd.f32 %v2947_v16, %v6292_v4  ;;  %3376 = vmatpush.bf16.msra.mxu2 %v6450_v61  ;;  %v5356_v16 = vld [vmem:[%s6774_s1 + $0x600] sm:$0xff] }
 0x150   : > { %v2928_v13 = vpop.f32.mrf.mxu2  ;;  %3322 = vmatpush.bf16.msra.mxu0 %v5356_v16  ;;  %v3853_v16 = vor.u32 %v5067_v2, %v3850_v7  ;;  %v4072_v2 = vld [vmem:[%s5580_s14 + $0x210] sm:$0xf]  ;;  %v5135_v7 = vld [vmem:[%s5580_s14 + $0x278] sm:$0xf0] }
 0x151   : > { %v6386_v19 = vadd.f32 %v2928_v13, %v2900_v39  ;;  %v2901_v5 = vpop.f32.mrf.mxu1  ;;  %v6391_v23 = vadd.f32 %v2976_v63, %v2948_v17  ;;  %v3845_v63 = vor.u32 %v5066_v0, %v3842_v49  ;;  %v5369_v13 = vld [vmem:[%s6774_s1 + $0x668] sm:$0xff]  ;;  %v5120_v49 = vld [vmem:[%s5580_s14 + $0x204] sm:$0xf] }
 0x152   : > { %v2902_v10 = vadd.f32 %v2901_v5, %v6326_v38  ;;  %5413 = vmatpush.bf16.msra.mxu1 %v5369_v13  ;;  %v5365_v0 = vld [vmem:[%s6774_s1 + $0x648] sm:$0xff] }
 0x153   : > { %v2978_v4 = vpop.f32.mrf.mxu0  ;;  %3377 = vmatpush.bf16.msra.mxu2 %v5375_v22 }
 0x154   : > { %3344 = vmatpush.bf16.msrb.mxu0 %v5371_v43  ;;  %v5160_v43 = vld [vmem:[%s5580_s14 + $0x340] sm:$0xf0] }
 0x156   : > { %v2949_v32 = vpop.f32.mrf.mxu3  ;;  %5414 = vmatpush.bf16.msra.mxu1 %v5368_v29 }
 0x157   : > { %v2950_v38 = vadd.f32 %v2949_v32, %v6318_v3  ;;  %v5374_v32 = vld [vmem:[%s6774_s1 + $0x690] sm:$0xff] }
 0x158   : > { %v2930_v37 = vpop.f32.mrf.mxu2  ;;  %3345 = vmatpush.bf16.msrb.mxu0 %v5370_v56  ;;  %3378 = vmatpush.bf16.msra.mxu2 %v5374_v32 }
 0x159   : > { %v6412_v1 = vadd.f32 %v2930_v37, %v2902_v10  ;;  %v2904_v45 = vpop.f32.mrf.mxu1  ;;  %v6420_v35 = vadd.f32 %v2978_v4, %v2950_v38  ;;  %v5093_v37 = vld [vmem:[%s5580_s14 + $0x12c] sm:$0xf]  ;;  %v3950_v38 = vld [vmem:[%s5580_s14 + $0x194] sm:$0xf0] }
 0x15a   : > { %v2905_v28 = vadd.f32 %v2904_v45, %v6344_v36  ;;  %5415 = vmatpush.bf16.msra.mxu1 %v5367_v48 }
 0x15b   : > { %v2981_v3 = vpop.f32.mrf.mxu0  ;;  %3183 = vmatmul.bf16.gmra.mxu3 %v3945_v33  ;;  %v3956_v33 = vld [vmem:[%s5580_s14 + $0x130] sm:$0xf] }
 0x15c   : > { %3135 = vmatmul.bf16.gmra.mxu1 %v4153_v21  ;;  %3346 = vmatpush.bf16.msrb.mxu0 %v5369_v13  ;;  %v5107_v21 = vld [vmem:[%s5580_s14 + $0x198] sm:$0xf0] }
 0x15d   : > { %3164 = vmatmul.bf16.gmra.mxu2 %v4157_v41 }
 0x15e   : > { %3212 = vmatmul.bf16.gmra.mxu0 %v3949_v46  ;;  %v2952_v51 = vpop.f32.mrf.mxu3 }
 0x15f   : > { %v2953_v36 = vadd.f32 %v2952_v51, %v6336_v40 }
 0x160   : > { %v2933_v52 = vpop.f32.mrf.mxu2  ;;  %3347 = vmatpush.bf16.msrb.mxu0 %v5368_v29 }
 0x161   : > { %v6433_v53 = vadd.f32 %v2933_v52, %v2905_v28  ;;  %v2906_v57 = vpop.f32.mrf.mxu1  ;;  %v6441_v44 = vadd.f32 %v2981_v3, %v2953_v36  ;;  %v3957_v3 = vor.u32 %v5107_v21, %v3956_v33  ;;  %v4165_v52 = vor.u32 %v5160_v43, %v4164_v42  ;;  %v5161_v33 = vld [vmem:[%s5580_s14 + $0x348] sm:$0xf0]  ;;  %v5108_v42 = vld [vmem:[%s5580_s14 + $0x1a0] sm:$0xf0] }
 0x162   : > { %v2907_v40 = vadd.f32 %v2906_v57, %v6373_v12  ;;  %v4053_v12 = vor.u32 %v5119_v58, %v4050_v62  ;;  %v5372_v62 = vld [vmem:[%s6774_s1 + $0x680] sm:$0xff] }
 0x163   : > { %v2983_v59 = vpop.f32.mrf.mxu0 }
 0x164   : > { %3348 = vmatpush.bf16.msrb.mxu0 %v5367_v48 }
 0x166   : > { %v2954_v47 = vpop.f32.mrf.mxu3 }
 0x167   : > { %v2955_v55 = vadd.f32 %v2954_v47, %v6365_v6  ;;  %v5348_v6 = vld [vmem:[%s6774_s1 + $0x5c0] sm:$0xff]  ;;  %v4058_v47 = vld [vmem:[%s5580_s14 + $0x26c] sm:$0xf0] }
 0x168   : > { %v2935_v11 = vpop.f32.mrf.mxu2  ;;  %3293 = vmatpush.bf16.msra.mxu3 %v5348_v6 }
 0x169   : > { %v6462_v39 = vadd.f32 %v2935_v11, %v2907_v40  ;;  %v3005_v17 = vpop.f32.mrf.mxu1  ;;  %v6470_v5 = vadd.f32 %v2983_v59, %v2955_v55  ;;  %v5366_v59 = vld [vmem:[%s6774_s1 + $0x650] sm:$0xff]  ;;  %v3856_v55 = vld [vmem:[%s5580_s14 + $0x60] sm:$0xf] }
 0x16a   : > { %v3006_v4 = vadd.f32 %v3005_v17, %v6391_v23  ;;  %5416 = vmatpush.bf16.msra.mxu1 %v5366_v59  ;;  %3349 = vmatpush.bf16.msrb.mxu0 %v5366_v59  ;;  %v4061_v17 = vor.u32 %v5120_v49, %v4058_v47 }
 0x16b   : > { %v2986_v10 = vpop.f32.mrf.mxu0  ;;  %3188 = vmatmul.bf16.gmra.mxu3 %v4053_v12  ;;  %v5081_v12 = vld [vmem:[%s5580_s14 + $0xc8] sm:$0xf0] }
 0x16c   : > { %3236 = vmatmul.bf16.vlgmr.msrb.gmra.mxu1 %v3845_v63  ;;  %5419 = vmatpush.bf16.msrb.mxu3 %v6382_v15 }
 0x16d   : > { %3265 = vmatmul.bf16.vlgmr.msrb.gmra.mxu2 %v3849_v14 }
 0x16e   : > { %3217 = vmatmul.bf16.gmra.mxu0 %v4057_v20  ;;  %v2957_v25 = vpop.f32.mrf.mxu3  ;;  %5417 = vmatpush.bf16.msra.mxu1 %v5365_v0  ;;  %v4065_v20 = vor.u32 %v5134_v9, %v4064_v8 }
 0x16f   : > { %v2958_v26 = vadd.f32 %v2957_v25, %v6386_v19  ;;  %3350 = vmatpush.bf16.msrb.mxu0 %v5365_v0  ;;  %v5082_v0 = vld [vmem:[%s5580_s14 + $0xd0] sm:$0xf0] }
 0x170   : > { %v3034_v23 = vpop.f32.mrf.mxu2  ;;  %5420 = vmatpush.bf16.msrb.mxu3 %v6400_v24  ;;  %v3953_v24 = vor.u32 %v5093_v37, %v3950_v38  ;;  %v4166_v37 = vld [vmem:[%s5580_s14 + $0x344] sm:$0xf0]  ;;  %v4172_v38 = vld [vmem:[%s5580_s14 + $0x2e0] sm:$0xf] }
 0x171   : > { %v6481_v27 = vadd.f32 %v3034_v23, %v3006_v4  ;;  %v3007_v30 = vpop.f32.mrf.mxu1  ;;  %v6486_v31 = vadd.f32 %v2986_v10, %v2958_v26  ;;  %v3857_v10 = vor.u32 %v5081_v12, %v3856_v55 }
 0x172   : > { %v3008_v19 = vadd.f32 %v3007_v30, %v6420_v35  ;;  %v4161_v35 = vor.u32 %v5146_v34, %v4158_v18  ;;  %v5094_v34 = vld [vmem:[%s5580_s14 + $0x134] sm:$0xf]  ;;  %v3958_v18 = vld [vmem:[%s5580_s14 + $0x19c] sm:$0xf0] }
 0x173   : > { %v2988_v15 = vpop.f32.mrf.mxu0 }
 0x174   : > { %5421 = vmatpush.bf16.msrb.mxu3 %v6429_v50 }
 0x176   : > { %v2959_v41 = vpop.f32.mrf.mxu3 }
 0x177   : > { %v2960_v45 = vadd.f32 %v2959_v41, %v6412_v1  ;;  %v5373_v1 = vld [vmem:[%s6774_s1 + $0x688] sm:$0xff]  ;;  %v3964_v41 = vld [vmem:[%s5580_s14 + $0x138] sm:$0xf] }
 0x178   : > { %v3036_v46 = vpop.f32.mrf.mxu2  ;;  %5422 = vmatpush.bf16.msrb.mxu3 %v6450_v61  ;;  %3379 = vmatpush.bf16.msra.mxu2 %v5373_v1  ;;  %v3965_v48 = vor.u32 %v5108_v42, %v3964_v41 }
 0x179   : > { %v6503_v28 = vadd.f32 %v3036_v46, %v3008_v19  ;;  %v3010_v51 = vpop.f32.mrf.mxu1  ;;  %v6508_v36 = vadd.f32 %v2988_v15, %v2960_v45  ;;  %v3961_v46 = vor.u32 %v5094_v34, %v3958_v18  ;;  %v5162_v34 = vld [vmem:[%s5580_s14 + $0x350] sm:$0xf0] }
 0x17a   : > { %v3011_v50 = vadd.f32 %v3010_v51, %v6441_v44 }
 0x17b   : > { %v2991_v54 = vpop.f32.mrf.mxu0  ;;  %3193 = vmatmul.bf16.gmra.mxu3 %v4161_v35 }
 0x17c   : > { %3241 = vmatmul.bf16.gmra.mxu1 %v3953_v24  ;;  %5423 = vmatpush.bf16.msrb.mxu3 %v5375_v22  ;;  %v4173_v24 = vor.u32 %v5161_v33, %v4172_v38 }
 0x17d   : > { %3270 = vmatmul.bf16.gmra.mxu2 %v3957_v3 }
 0x17e   : > { %3222 = vmatmul.bf16.gmra.mxu0 %v4165_v52  ;;  %v2962_v56 = vpop.f32.mrf.mxu3  ;;  %3380 = vmatpush.bf16.msra.mxu2 %v5372_v62 }
 0x17f   : > { %v2963_v57 = vadd.f32 %v2962_v56, %v6433_v53 }
 0x180   : > { %v3039_v44 = vpop.f32.mrf.mxu2  ;;  %5424 = vmatpush.bf16.msrb.mxu3 %v5374_v32  ;;  %v5147_v32 = vld [vmem:[%s5580_s14 + $0x2dc] sm:$0xf] }
 0x181   : > { %v6516_v40 = vadd.f32 %v3039_v44, %v3011_v50  ;;  %v3012_v60 = vpop.f32.mrf.mxu1  ;;  %v6521_v61 = vadd.f32 %v2991_v54, %v2963_v57  ;;  %v4169_v35 = vor.u32 %v5147_v32, %v4166_v37  ;;  %v4180_v32 = vld [vmem:[%s5580_s14 + $0x2e8] sm:$0xf] }
 0x182   : > { %v3013_v53 = vadd.f32 %v3012_v60, %v6470_v5  ;;  %v5364_v5 = vld [vmem:[%s6774_s1 + $0x640] sm:$0xff]  ;;  %v5121_v60 = vld [vmem:[%s5580_s14 + $0x20c] sm:$0xf]  ;;  %v4181_v42 = vor.u32 %v5162_v34, %v4180_v32 }
 0x183   : > { %v2993_v58 = vpop.f32.mrf.mxu0  ;;  %5418 = vmatpush.bf16.msra.mxu1 %v5364_v5  ;;  %3351 = vmatpush.bf16.msrb.mxu0 %v5364_v5 }
 0x184   : > { %5425 = vmatpush.bf16.msrb.mxu3 %v5373_v1 }
 0x186   : > { %v2964_v11 = vpop.f32.mrf.mxu3 }
 0x187   : > { %v2965_v63 = vadd.f32 %v2964_v11, %v6462_v39 }
 0x188   : > { %v3041_v14 = vpop.f32.mrf.mxu2  ;;  %5426 = vmatpush.bf16.msrb.mxu3 %v5372_v62  ;;  %v3864_v62 = vld [vmem:[%s5580_s14 + $0x68] sm:$0xf] }
 0x189   : > { %v6539_v13 = vadd.f32 %v3041_v14, %v3013_v53  ;;  %v3015_v6 = vpop.f32.mrf.mxu1  ;;  %v2994_v4 = vadd.f32 %v2993_v58, %v2965_v63  ;;  %v5095_v58 = vld [vmem:[%s5580_s14 + $0x13c] sm:$0xf]  ;;  %v3966_v53 = vld [vmem:[%s5580_s14 + $0x1a4] sm:$0xf0]  ;;  %v3865_v55 = vor.u32 %v5082_v0, %v3864_v62  ;;  %v4073_v63 = vor.u32 %v5135_v7, %v4072_v2 }
 0x18a   : > { %v3016_v22 = vadd.f32 %v3015_v6, %v6486_v31 }
 0x18b   : > { %v3092_v25 = vpop.f32.mrf.mxu0  ;;  %3294 = vmatmul.bf16.vlgmr.msra.gmra.mxu3 %v3853_v16 }
 0x18c   : > { %3246 = vmatmul.bf16.gmra.mxu1 %v4061_v17 }
 0x18d   : > { %3275 = vmatmul.bf16.gmra.mxu2 %v4065_v20 }
 0x18e   : > { %3323 = vmatmul.bf16.vlgmr.msra.gmra.mxu0 %v3857_v10  ;;  %v3063_v39 = vpop.f32.mrf.mxu3 }
 0x18f   : > { %v3064_v23 = vadd.f32 %v3063_v39, %v6481_v27  ;;  %v5148_v39 = vld [vmem:[%s5580_s14 + $0x2e4] sm:$0xf] }
 0x190   : > { %v3044_v26 = vpop.f32.mrf.mxu2 }
 0x191   : > { %v3045_v29 = vadd.f32 %v3044_v26, %v3016_v22  ;;  %v3017_v30 = vpop.f32.mrf.mxu1  ;;  %v3093_v31 = vadd.f32 %v3092_v25, %v3064_v23  ;;  %v4174_v26 = vld [vmem:[%s5580_s14 + $0x34c] sm:$0xf0]  ;;  %v5122_v23 = vld [vmem:[%s5580_s14 + $0x214] sm:$0xf] }
 0x192   : > { %v3018_v15 = vadd.f32 %v3017_v30, %v6508_v36  ;;  %v4074_v30 = vld [vmem:[%s5580_s14 + $0x27c] sm:$0xf0]  ;;  %v4177_v38 = vor.u32 %v5148_v39, %v4174_v26 }
 0x193   : > { %v3094_v19 = vpop.f32.mrf.mxu0  ;;  %v4077_v33 = vor.u32 %v5122_v23, %v4074_v30 }
 0x196   : > { %v3065_v21 = vpop.f32.mrf.mxu3 }
 0x197   : > { %v3066_v45 = vadd.f32 %v3065_v21, %v6503_v28 }
 0x198   : > { %v3046_v43 = vpop.f32.mrf.mxu2 }
 0x199   : > { %v3047_v27 = vadd.f32 %v3046_v43, %v3018_v15  ;;  %v3020_v3 = vpop.f32.mrf.mxu1  ;;  %v3095_v51 = vadd.f32 %v3094_v19, %v3066_v45  ;;  %v5109_v15 = vld [vmem:[%s5580_s14 + $0x1a8] sm:$0xf0] }
 0x19a   : > { %v3021_v52 = vadd.f32 %v3020_v3, %v6521_v61  ;;  %v4066_v61 = vld [vmem:[%s5580_s14 + $0x274] sm:$0xf0] }
 0x19b   : > { %v3097_v36 = vpop.f32.mrf.mxu0  ;;  %3299 = vmatmul.bf16.gmra.mxu3 %v3961_v46  ;;  %v4069_v9 = vor.u32 %v5121_v60, %v4066_v61  ;;  %v5068_v60 = vld [vmem:[%s5580_s14 + $0x64] sm:$0xf]  ;;  %v3858_v61 = vld [vmem:[%s5580_s14 + $0xcc] sm:$0xf0] }
 0x19c   : > { %3251 = vmatmul.bf16.gmra.mxu1 %v4169_v35  ;;  %v3861_v7 = vor.u32 %v5068_v60, %v3858_v61 }
 0x19d   : > { %3280 = vmatmul.bf16.gmra.mxu2 %v4173_v24 }
 0x19e   : > { %3328 = vmatmul.bf16.gmra.mxu0 %v3965_v48  ;;  %v3068_v28 = vpop.f32.mrf.mxu3 }
 0x19f   : > { %v3069_v50 = vadd.f32 %v3068_v28, %v6516_v40  ;;  %v3969_v40 = vor.u32 %v5095_v58, %v3966_v53  ;;  %v5149_v28 = vld [vmem:[%s5580_s14 + $0x2ec] sm:$0xf] }
 0x1a0   : > { %v3049_v54 = vpop.f32.mrf.mxu2 }
 0x1a1   : > { %v3050_v1 = vadd.f32 %v3049_v54, %v3021_v52  ;;  %v3022_v56 = vpop.f32.mrf.mxu1  ;;  %v3098_v57 = vadd.f32 %v3097_v36, %v3069_v50  ;;  %v4188_v54 = vld [vmem:[%s5580_s14 + $0x2f0] sm:$0xf]  ;;  %v5163_v50 = vld [vmem:[%s5580_s14 + $0x358] sm:$0xf0] }
 0x1a2   : > { %v3023_v44 = vadd.f32 %v3022_v56, %v2994_v4  ;;  %v4182_v56 = vld [vmem:[%s5580_s14 + $0x354] sm:$0xf0]  ;;  %v4189_v62 = vor.u32 %v5163_v50, %v4188_v54 }
 0x1a3   : > { %v3099_v59 = vpop.f32.mrf.mxu0 }
 0x1a6   : > { %v3070_v49 = vpop.f32.mrf.mxu3 }
 0x1a7   : > { %v3071_v8 = vadd.f32 %v3070_v49, %v6539_v13 }
 0x1a8   : > { %v3051_v47 = vpop.f32.mrf.mxu2 }
 0x1a9   : > { %v3052_v11 = vadd.f32 %v3051_v47, %v3023_v44  ;;  %v3121_v12 = vpop.f32.mrf.mxu1  ;;  %v3100_v14 = vadd.f32 %v3099_v59, %v3071_v8  ;;  %v5136_v44 = vld [vmem:[%s5580_s14 + $0x280] sm:$0xf0] }
 0x1aa   : > { %v3122_v17 = vadd.f32 %v3121_v12, %v3093_v31  ;;  %v3972_v31 = vld [vmem:[%s5580_s14 + $0x140] sm:$0xf] }
 0x1ab   : > { %v3102_v16 = vpop.f32.mrf.mxu0  ;;  %3304 = vmatmul.bf16.gmra.mxu3 %v4069_v9  ;;  %v3973_v21 = vor.u32 %v5109_v15, %v3972_v31 }
 0x1ac   : > { %3357 = vmatmul.bf16.vlgmr.msra.gmra.mxu1 %v3969_v40 }
 0x1ad   : > { %3381 = vmatmul.bf16.vlgmr.msra.gmra.mxu2 %v3865_v55 }
 0x1ae   : > { %3333 = vmatmul.bf16.gmra.mxu0 %v4073_v63  ;;  %v3073_v13 = vpop.f32.mrf.mxu3 }
 0x1af   : > { %v3074_v20 = vadd.f32 %v3073_v13, %v3045_v29 }
 0x1b0   : > { %v3150_v5 = vpop.f32.mrf.mxu2 }
 0x1b1   : > { %v6567_v6 = vadd.f32 %v3150_v5, %v3122_v17  ;;  %v3123_v10 = vpop.f32.mrf.mxu1  ;;  %v3103_v4 = vadd.f32 %v3102_v16, %v3074_v20 }
 0x1b2   : > { %v3124_v25 = vadd.f32 %v3123_v10, %v3095_v51 }
 0x1b3   : > { %v3104_v22 = vpop.f32.mrf.mxu0 }
 0x1b6   : > { %v3075_v19 = vpop.f32.mrf.mxu3 }
 0x1b7   : > { %v3076_v18 = vadd.f32 %v3075_v19, %v3047_v27 }
 0x1b8   : > { %v3152_v37 = vpop.f32.mrf.mxu2 }
 0x1b9   : > { %v3153_v29 = vadd.f32 %v3152_v37, %v3124_v25  ;;  %v3126_v41 = vpop.f32.mrf.mxu1  ;;  %v3105_v43 = vadd.f32 %v3104_v22, %v3076_v18 }
 0x1ba   : > { %v3127_v46 = vadd.f32 %v3126_v41, %v3098_v57  ;;  %v4080_v57 = vld [vmem:[%s5580_s14 + $0x218] sm:$0xf] }
 0x1bb   : > { %v3107_v45 = vpop.f32.mrf.mxu0  ;;  %3309 = vmatmul.bf16.gmra.mxu3 %v4177_v38  ;;  %v4081_v49 = vor.u32 %v5136_v44, %v4080_v57 }
 0x1bc   : > { %3362 = vmatmul.bf16.gmra.mxu1 %v4077_v33 }
 0x1bd   : > { %3386 = vmatmul.bf16.gmra.mxu2 %v3973_v21 }
 0x1be   : > { %3338 = vmatmul.bf16.gmra.mxu0 %v4181_v42  ;;  %v3078_v27 = vpop.f32.mrf.mxu3 }
 0x1bf   : > { %v3079_v35 = vadd.f32 %v3078_v27, %v3050_v1  ;;  %v4185_v1 = vor.u32 %v5149_v28, %v4182_v56 }
 0x1c0   : > { %v3155_v24 = vpop.f32.mrf.mxu2 }
 0x1c1   : > { %v3156_v3 = vadd.f32 %v3155_v24, %v3127_v46  ;;  %v3128_v48 = vpop.f32.mrf.mxu1  ;;  %v3108_v51 = vadd.f32 %v3107_v45, %v3079_v35 }
 0x1c2   : > { %v3129_v36 = vadd.f32 %v3128_v48, %v3100_v14 }
 0x1c3   : > { %v3109_v52 = vpop.f32.mrf.mxu0 }
 0x1c6   : > { %v3080_v59 = vpop.f32.mrf.mxu3 }
 0x1c7   : > { %v3081_v58 = vadd.f32 %v3080_v59, %v3052_v11 }
 0x1c8   : > { %v3157_v53 = vpop.f32.mrf.mxu2 }
 0x1c9   : > { %v3158_v0 = vadd.f32 %v3157_v53, %v3129_v36  ;;  %v3131_v2 = vpop.f32.mrf.mxu1  ;;  %v3110_v47 = vadd.f32 %v3109_v52, %v3081_v58 }
 0x1ca   : > { %v3132_v8 = vadd.f32 %v3131_v2, %v3103_v4 }
 0x1cb   : > { %v3208_v9 = vpop.f32.mrf.mxu0  ;;  %3396 = vmatmul.bf16.vlgmr.msrb.gmra.mxu3 %v4189_v62 }
 0x1cc   : > { %3367 = vmatmul.bf16.gmra.mxu1 %v4185_v1 }
 0x1cd   : > { %3391 = vmatmul.bf16.gmra.mxu2 %v4081_v49 }
 0x1ce   : > { %3352 = vmatmul.bf16.vlgmr.msrb.gmra.mxu0 %v3861_v7  ;;  %v3179_v40 = vpop.f32.mrf.mxu3 }
 0x1cf   : > { %v3180_v12 = vadd.f32 %v3179_v40, %v6567_v6 }
 0x1d0   : > { %v3160_v55 = vpop.f32.mrf.mxu2 }
 0x1d1   : > { %v3161_v63 = vadd.f32 %v3160_v55, %v3132_v8  ;;  %v3133_v11 = vpop.f32.mrf.mxu1  ;;  %v3209_v14 = vadd.f32 %v3208_v9, %v3180_v12 }
 0x1d2   : > { %v3134_v16 = vadd.f32 %v3133_v11, %v3105_v43 }
 0x1d3   : > { %v3210_v17 = vpop.f32.mrf.mxu0 }
 0x1d6   : > { %v3181_v13 = vpop.f32.mrf.mxu3 }
 0x1d7   : > { %v3182_v5 = vadd.f32 %v3181_v13, %v3153_v29 }
 0x1d8   : > { %v3162_v20 = vpop.f32.mrf.mxu2 }
 0x1d9   : > { %v3163_v10 = vadd.f32 %v3162_v20, %v3134_v16  ;;  %v3136_v22 = vpop.f32.mrf.mxu1  ;;  %v3211_v4 = vadd.f32 %v3210_v17, %v3182_v5 }
 0x1da   : > { %v3137_v25 = vadd.f32 %v3136_v22, %v3108_v51 }
 0x1db   : > { %v3213_v39 = vpop.f32.mrf.mxu0 }
 0x1de   : > { %v3184_v26 = vpop.f32.mrf.mxu3 }
 0x1df   : > { %v3185_v30 = vadd.f32 %v3184_v26, %v3156_v3 }
 0x1e0   : > { %v3165_v23 = vpop.f32.mrf.mxu2 }
 0x1e1   : > { %v3166_v31 = vadd.f32 %v3165_v23, %v3137_v25  ;;  %v3138_v15 = vpop.f32.mrf.mxu1  ;;  %v3214_v19 = vadd.f32 %v3213_v39, %v3185_v30 }
 0x1e2   : > { %v3139_v6 = vadd.f32 %v3138_v15, %v3110_v47 }
 0x1e3   : > { %v3215_v32 = vpop.f32.mrf.mxu0 }
 0x1e6   : > { %v3186_v34 = vpop.f32.mrf.mxu3 }
 0x1e7   : > { %v3187_v37 = vadd.f32 %v3186_v34, %v3158_v0 }
 0x1e8   : > { %v3167_v18 = vpop.f32.mrf.mxu2 }
 0x1e9   : > { %v3168_v38 = vadd.f32 %v3167_v18, %v3139_v6  ;;  %v3237_v33 = vpop.f32.mrf.mxu1  ;;  %v3216_v21 = vadd.f32 %v3215_v32, %v3187_v37 }
 0x1ea   : > { %v3238_v41 = vadd.f32 %v3237_v33, %v3209_v14 }
 0x1eb   : > { %v3218_v29 = vpop.f32.mrf.mxu0 }
 0x1ee   : > { %v3189_v42 = vpop.f32.mrf.mxu3 }
 0x1ef   : > { %v3190_v43 = vadd.f32 %v3189_v42, %v3161_v63 }
 0x1f0   : > { %v3266_v45 = vpop.f32.mrf.mxu2 }
 0x1f1   : > { %v6586_v46 = vadd.f32 %v3266_v45, %v3238_v41  ;;  %v3239_v27 = vpop.f32.mrf.mxu1  ;;  %v6588_v35 = vadd.f32 %v3218_v29, %v3190_v43 }
 0x1f2   : > { %v3240_v3 = vadd.f32 %v3239_v27, %v3211_v4 }
 0x1f3   : > { %v3220_v24 = vpop.f32.mrf.mxu0 }
 0x1f6   : > { %v3191_v48 = vpop.f32.mrf.mxu3 }
 0x1f7   : > { %v3192_v51 = vadd.f32 %v3191_v48, %v3163_v10 }
 0x1f8   : > { %v3268_v52 = vpop.f32.mrf.mxu2 }
 0x1f9   : > { %v6590_v36 = vadd.f32 %v3268_v52, %v3240_v3  ;;  %v3242_v28 = vpop.f32.mrf.mxu1  ;;  %v6592_v54 = vadd.f32 %v3220_v24, %v3192_v51 }
 0x1fa   : > { %v3243_v39 = vadd.f32 %v3242_v28, %v3214_v19 }
 0x1fb   : > { %v3223_v50 = vpop.f32.mrf.mxu0 }
 0x1fe   : > { %v3194_v56 = vpop.f32.mrf.mxu3 }
 0x1ff   : > { %v3195_v57 = vadd.f32 %v3194_v56, %v3166_v31  ;;  %v3404_v31 = vlaneseq }
 0x200   : > { %v3271_v44 = vpop.f32.mrf.mxu2 }
 0x201   : > { %v3244_v59 = vpop.f32.mrf.mxu1  ;;  %v6594_v60 = vadd.f32 %v3223_v50, %v3195_v57  ;;  %v3272_v26 = vadd.f32 %v3271_v44, %v3243_v39  ;;  %v6602_v34 = vand.u32 127, %v3404_v31 }
 0x202   : > { %v3245_v18 = vadd.f32 %v3244_v59, %v3216_v21 }
 0x203   : > { %v3225_v61 = vpop.f32.mrf.mxu0  ;;  %vm3406_vm0 = vcmp.lt.s32.totalorder %v6602_v34, 8 }
 0x206   : > { %v3196_v58 = vpop.f32.mrf.mxu3 }
 0x207   : > { %v3197_v53 = vadd.f32 %v3196_v58, %v3168_v38 }
 0x208   : > { %v3273_v62 = vpop.f32.mrf.mxu2 }
 0x209   : > { %v3247_v0 = vpop.f32.mrf.mxu1  ;;  %v3226_v1 = vadd.f32 %v3225_v61, %v3197_v53  ;;  %v3274_v38 = vadd.f32 %v3273_v62, %v3245_v18 }
 0x20a   : > { %v3248_v24 = vadd.f32 %v3247_v0, %v6588_v35 }
 0x20b   : > { %v3324_v49 = vpop.f32.mrf.mxu0 }
 0x20e   : > { %v3295_v2 = vpop.f32.mrf.mxu3 }
 0x20f   : > { %v3296_v3 = vadd.f32 %v3295_v2, %v6586_v46 }
 0x210   : > { %v3276_v7 = vpop.f32.mrf.mxu2 }
 0x211   : > { %v3249_v47 = vpop.f32.mrf.mxu1  ;;  %v3277_v48 = vadd.f32 %v3276_v7, %v3248_v24  ;;  %v3325_v57 = vadd.f32 %v3324_v49, %v3296_v3 }
 0x212   : > { %v3250_v35 = vadd.f32 %v3249_v47, %v6592_v54 }
 0x213   : > { %v6596_v8 = vpop.f32.mrf.mxu0 }
 0x216   : > { %v3297_v9 = vpop.f32.mrf.mxu3 }
 0x217   : > { %v3298_v46 = vadd.f32 %v3297_v9, %v6590_v36 }
 0x218   : > { %v3278_v40 = vpop.f32.mrf.mxu2 }
 0x219   : > { %v3252_v55 = vpop.f32.mrf.mxu1  ;;  %v3279_v7 = vadd.f32 %v3278_v40, %v3250_v35  ;;  %v3327_v47 = vadd.f32 %v6596_v8, %v3298_v46 }
 0x21a   : > { %v3253_v49 = vadd.f32 %v3252_v55, %v6594_v60 }
 0x21b   : > { %v3329_v12 = vpop.f32.mrf.mxu0 }
 0x21e   : > { %v3300_v63 = vpop.f32.mrf.mxu3 }
 0x21f   : > { %v3301_v15 = vadd.f32 %v3300_v63, %v3272_v26 }
 0x220   : > { %v6598_v11 = vpop.f32.mrf.mxu2 }
 0x221   : > { %v3254_v14 = vpop.f32.mrf.mxu1  ;;  %v3330_v37 = vadd.f32 %v3329_v12, %v3301_v15  ;;  %v3282_v54 = vadd.f32 %v6598_v11, %v3253_v49 }
 0x222   : > { %v3255_v58 = vadd.f32 %v3254_v14, %v3226_v1 }
 0x223   : > { %v3331_v16 = vpop.f32.mrf.mxu0 }
 0x226   : > { %v3302_v17 = vpop.f32.mrf.mxu3 }
 0x227   : > { %v3303_v42 = vadd.f32 %v3302_v17, %v3274_v38 }
 0x228   : > { %v3283_v13 = vpop.f32.mrf.mxu2 }
 0x229   : > { %v3358_v20 = vpop.f32.mrf.mxu1  ;;  %v3332_v21 = vadd.f32 %v3331_v16, %v3303_v42  ;;  %v3284_v0 = vadd.f32 %v3283_v13, %v3255_v58 }
 0x22a   : > { %v3359_v33 = vadd.f32 %v3358_v20, %v3330_v37 }
 0x22b   : > { %v3334_v5 = vpop.f32.mrf.mxu0 }
 0x22e   : > { %v3305_v10 = vpop.f32.mrf.mxu3 }
 0x22f   : > { %v3306_v50 = vadd.f32 %v3305_v10, %v3277_v48 }
 0x230   : > { %v3382_v22 = vpop.f32.mrf.mxu2 }
 0x231   : > { %v3360_v4 = vpop.f32.mrf.mxu1  ;;  %v3335_v62 = vadd.f32 %v3334_v5, %v3306_v50 }
 0x232   : > { %v3361_v51 = vadd.f32 %v3360_v4, %v3332_v21 }
 0x233   : > { %v6600_v25 = vpop.f32.mrf.mxu0 }
 0x236   : > { %v3307_v23 = vpop.f32.mrf.mxu3 }
 0x237   : > { %v3308_v1 = vadd.f32 %v3307_v23, %v3279_v7 }
 0x238   : > { %v3384_v30 = vpop.f32.mrf.mxu2 }
 0x239   : > { %v3363_v6 = vpop.f32.mrf.mxu1  ;;  %v3337_v55 = vadd.f32 %v6600_v25, %v3308_v1 }
 0x23a   : > { %v3364_v12 = vadd.f32 %v3363_v6, %v3335_v62 }
 0x23b   : > { %v3339_v32 = vpop.f32.mrf.mxu0 }
 0x23e   : > { %v3310_v29 = vpop.f32.mrf.mxu3 }
 0x23f   : > { %v3311_v13 = vadd.f32 %v3310_v29, %v3282_v54 }
 0x240   : > { %v3387_v41 = vpop.f32.mrf.mxu2 }
 0x241   : > { %v6605_v43 = vadd.f32 %v3387_v41, %v3359_v33  ;;  %v3365_v19 = vpop.f32.mrf.mxu1  ;;  %v3340_v26 = vadd.f32 %v3339_v32, %v3311_v13 }
 0x242   : > { %v3366_v4 = vadd.f32 %v3365_v19, %v3337_v55 }
 0x243   : > { %v3341_v45 = vpop.f32.mrf.mxu0  ;;  %v3409_v27 = vsel %vm3406_vm0, %v6605_v43, 0.0 }
 0x244   : > { %3419 = vadd.xlane.f32.xlu1 %v3409_v27 }
 0x246   : > { %v3312_v52 = vpop.f32.mrf.mxu3 }
 0x247   : > { %v3313_v16 = vadd.f32 %v3312_v52, %v3284_v0 }
 0x248   : > { %v3389_v28 = vpop.f32.mrf.mxu2 }
 0x249   : > { %v3390_v56 = vadd.f32 %v3389_v28, %v3361_v51  ;;  %v3368_v44 = vpop.f32.mrf.mxu1  ;;  %v3342_v60 = vadd.f32 %v3341_v45, %v3313_v16 }
 0x24a   : > { %v3369_v15 = vadd.f32 %v3368_v44, %v3340_v26 }
 0x24b   : > { %v3353_v59 = vpop.f32.mrf.mxu0  ;;  %v3410_v61 = vsel %vm3406_vm0, %v3390_v56, 0.0 }
 0x24c   : > { %v3354_v53 = vadd.f32 %v3353_v59, %v3325_v57  ;;  %3421 = vadd.xlane.f32.xlu1 %v3410_v61 }
 0x24e   : > { %v3383_v2 = vadd.f32 %v3382_v22, %v3354_v53  ;;  %v3397_v63 = vpop.f32.mrf.mxu3 }
 0x24f   : > { %v3398_v25 = vadd.f32 %v3397_v63, %v3369_v15 }
 0x250   : > { %v3392_v17 = vpop.f32.mrf.mxu2  ;;  %v3407_v20 = vsel %vm3406_vm0, %v3383_v2, 0.0 }
 0x251   : > { %v3393_v14 = vadd.f32 %v3392_v17, %v3364_v12  ;;  %3415 = vadd.xlane.f32.xlu0 %v3407_v20  ;;  %v3370_v9 = vpop.f32.mrf.mxu1 }
 0x252   : > { %v3371_v10 = vadd.f32 %v3370_v9, %v3342_v60 }
 0x253   : > { %v3355_v36 = vpop.f32.mrf.mxu0  ;;  %v3411_v40 = vsel %vm3406_vm0, %v3393_v14, 0.0 }
 0x254   : > { %v3356_v5 = vadd.f32 %v3355_v36, %v3327_v47  ;;  %3423 = vadd.xlane.f32.xlu2 %v3411_v40 }
 0x256   : > { %v3385_v22 = vadd.f32 %v3384_v30, %v3356_v5  ;;  %v3399_v39 = vpop.f32.mrf.mxu3  ;;  %v3413_v30 = vsel %vm3406_vm0, %v3398_v25, 0.0 }
 0x257   : > { %v3400_v11 = vadd.f32 %v3399_v39, %v3371_v10 }
 0x258   : > { %v3394_v23 = vpop.f32.mrf.mxu2  ;;  %v3408_v8 = vsel %vm3406_vm0, %v3385_v22, 0.0 }
 0x259   : > { %v3395_v31 = vadd.f32 %v3394_v23, %v3366_v4  ;;  %3417 = vadd.xlane.f32.xlu0 %v3408_v8  ;;  %v3414_v6 = vsel %vm3406_vm0, %v3400_v11, 0.0 }
 0x25a   : > { %3429 = vadd.xlane.f32.xlu1 %v3414_v6  ;;  %v6678_v6 = vld [vmem:[%s6776_s3] ss:$0 sm:$0xff] }
 0x25b   : > { %v3412_v18 = vsel %vm3406_vm0, %v3395_v31, 0.0 }
 0x25c   : > { %3425 = vadd.xlane.f32.xlu2 %v3412_v18 }
 0x261   : > { %3427 = vadd.xlane.f32.xlu0 %v3413_v30  ;;  %v6684_v30 = vld [vmem:[%s6777_s4] ss:$0 sm:$0xff] }
 0x2b7   : > { %v3420_v32 = vpop.xlane.xlu1 %3419 }
 0x2b8   : > { %v3433_v37 = vmul.f32 0.125, %v3420_v32 }
 0x2ba   : > { %v6633_v38 = vsub.f32 %v6605_v43, %v3433_v37 }
 0x2bc   : > { %v3449_v33 = vsel %vm3406_vm0, %v6633_v38, 0.0 }
 0x2bd   : > { %v3457_v29 = vmul.f32 %v3449_v33, %v3449_v33 }
 0x2bf   : > { %3467 = vadd.xlane.f32.xlu1 %v3457_v29  ;;  %v3422_v41 = vpop.xlane.xlu1 %3421 }
 0x2c0   : > { %v3434_v42 = vmul.f32 0.125, %v3422_v41 }
 0x2c2   : > { %v6638_v19 = vsub.f32 %v3390_v56, %v3434_v42 }
 0x2c4   : > { %v3416_v45 = vpop.xlane.xlu0 %3415  ;;  %v3450_v27 = vsel %vm3406_vm0, %v6638_v19, 0.0 }
 0x2c5   : > { %v3431_v24 = vmul.f32 0.125, %v3416_v45  ;;  %v3458_v21 = vmul.f32 %v3450_v27, %v3450_v27 }
 0x2c7   : > { %v6643_v3 = vsub.f32 %v3383_v2, %v3431_v24  ;;  %v3424_v43 = vpop.xlane.xlu2 %3423  ;;  %3469 = vadd.xlane.f32.xlu2 %v3458_v21 }
 0x2c8   : > { %v3435_v48 = vmul.f32 0.125, %v3424_v43 }
 0x2c9   : > { %v3447_v52 = vsel %vm3406_vm0, %v6643_v3, 0.0 }
 0x2ca   : > { %v6645_v51 = vsub.f32 %v3393_v14, %v3435_v48  ;;  %v3455_v44 = vmul.f32 %v3447_v52, %v3447_v52 }
 0x2cc   : > { %v3418_v28 = vpop.xlane.xlu0 %3417  ;;  %v3451_v50 = vsel %vm3406_vm0, %v6645_v51, 0.0 }
 0x2cd   : > { %v3432_v56 = vmul.f32 0.125, %v3418_v28  ;;  %v3459_v57 = vmul.f32 %v3451_v50, %v3451_v50  ;;  %v3430_v58 = vpop.xlane.xlu1 %3429 }
 0x2ce   : > { %v3438_v62 = vmul.f32 0.125, %v3430_v58 }
 0x2cf   : > { %v6653_v59 = vsub.f32 %v3385_v22, %v3432_v56  ;;  %v3426_v61 = vpop.xlane.xlu2 %3425  ;;  %3471 = vadd.xlane.f32.xlu0 %v3459_v57  ;;  %3463 = vadd.xlane.f32.xlu2 %v3455_v44 }
 0x2d0   : > { %v3436_v53 = vmul.f32 0.125, %v3426_v61  ;;  %v6663_v49 = vsub.f32 %v3400_v11, %v3438_v62 }
 0x2d1   : > { %v3448_v46 = vsel %vm3406_vm0, %v6653_v59, 0.0 }
 0x2d2   : > { %v6655_v35 = vsub.f32 %v3395_v31, %v3436_v53  ;;  %v3456_v63 = vmul.f32 %v3448_v46, %v3448_v46  ;;  %v3454_v1 = vsel %vm3406_vm0, %v6663_v49, 0.0 }
 0x2d3   : > { %v3462_v14 = vmul.f32 %v3454_v1, %v3454_v1 }
 0x2d4   : > { %v3428_v0 = vpop.xlane.xlu0 %3427  ;;  %v3452_v2 = vsel %vm3406_vm0, %v6655_v35, 0.0 }
 0x2d5   : > { %v3437_v7 = vmul.f32 0.125, %v3428_v0  ;;  %v3460_v12 = vmul.f32 %v3452_v2, %v3452_v2 }
 0x2d7   : > { %v6665_v16 = vsub.f32 %v3398_v25, %v3437_v7  ;;  %3473 = vadd.xlane.f32.xlu1 %v3460_v12  ;;  %3465 = vadd.xlane.f32.xlu0 %v3456_v63 }
 0x2d9   : > { %v3453_v17 = vsel %vm3406_vm0, %v6665_v16, 0.0 }
 0x2da   : > { %v3461_v20 = vmul.f32 %v3453_v17, %v3453_v17 }
 0x2dc   : > { %3475 = vadd.xlane.f32.xlu2 %v3461_v20 }
 0x2df   : > { %3477 = vadd.xlane.f32.xlu0 %v3462_v14 }
 0x332   : > { %v3468_v54 = vpop.xlane.xlu1 %3467 }
 0x333   : > { %v3481_v47 = vmul.f32 0.125, %v3468_v54 }
 0x335   : > { %v3489_v36 = vadd.f32 1e-05, %v3481_v47 }
 0x337   : > { %5439 = vrsqrt.f32 %v3489_v36  ;;  %vm3521_vm2 = vweird.f32 %v3489_v36 }
 0x33a   : > { %v3470_v9 = vpop.xlane.xlu2 %3469 }
 0x33b   : > { %v3482_v40 = vmul.f32 0.125, %v3470_v9 }
 0x33d   : > { %v5440_v13 = vpop.eup %5439  ;;  %v3490_v5 = vadd.f32 1e-05, %v3482_v40 }
 0x33e   : > { %v3516_v60 = vmul.f32 %v5440_v13, %v3489_v36  ;;  %vm3522_vm1 = vweird.f32 %v5440_v13 }
 0x33f   : > { %5441 = vrsqrt.f32 %v3490_v5  ;;  %vm3523_vm3 = vmor %vm3521_vm2, %vm3522_vm1  ;;  %vm3531_vm5 = vweird.f32 %v3490_v5 }
 0x340   : > { %v3517_v55 = vmul.f32 %v5440_v13, %v3516_v60 }
 0x342   : > { %v3518_v10 = vmul.f32 0.5, %v3517_v55  ;;  %v3464_v22 = vpop.xlane.xlu2 %3463  ;;  %v3472_v4 = vpop.xlane.xlu0 %3471 }
 0x343   : > { %v3479_v39 = vmul.f32 0.125, %v3464_v22  ;;  %v3483_v34 = vmul.f32 0.125, %v3472_v4 }
 0x344   : > { %v3519_v26 = vsub.f32 1.5, %v3518_v10 }
 0x345   : > { %v5442_v23 = vpop.eup %5441  ;;  %v3487_v11 = vadd.f32 1e-05, %v3479_v39  ;;  %v6673_v8 = vadd.f32 1e-05, %v3483_v34 }
 0x346   : > { %v3520_v31 = vmul.f32 %v5440_v13, %v3519_v26  ;;  %v3526_v15 = vmul.f32 %v5442_v23, %v3490_v5  ;;  %vm3532_vm4 = vweird.f32 %v5442_v23 }
 0x347   : > { %5443 = vrsqrt.f32 %v3487_v11  ;;  %vm3533_vm6 = vmor %vm3531_vm5, %vm3532_vm4  ;;  %vm3501_vm9 = vweird.f32 %v3487_v11  ;;  %vm3541_vm11 = vweird.f32 %v6673_v8 }
 0x348   : > { %v3524_v18 = vsel %vm3523_vm3, %v5440_v13, %v3520_v31  ;;  %v3527_v25 = vmul.f32 %v5442_v23, %v3526_v15  ;;  %5445 = vrsqrt.f32 %v6673_v8 }
 0x349   : > { %v3577_v32 = vmul.f32 %v3524_v18, %v6633_v38 }
 0x34a   : > { %v3528_v37 = vmul.f32 0.5, %v3527_v25  ;;  %v3474_v33 = vpop.xlane.xlu1 %3473  ;;  %v3466_v29 = vpop.xlane.xlu0 %3465 }
 0x34b   : > { %v3588_v41 = vmul.f32 %v6678_v6, %v3577_v32  ;;  %v3484_v42 = vmul.f32 0.125, %v3474_v33  ;;  %v3480_v45 = vmul.f32 0.125, %v3466_v29 }
 0x34c   : > { %v3529_v27 = vsub.f32 1.5, %v3528_v37 }
 0x34d   : > { %v5444_v24 = vpop.eup %5443  ;;  %v6689_v21 = vadd.f32 %v6684_v30, %v3588_v41  ;;  %v6691_v43 = vadd.f32 1e-05, %v3484_v42  ;;  %v6693_v48 = vadd.f32 1e-05, %v3480_v45 }
 0x34e   : > { %v5446_v52 = vpop.eup %5445  ;;  %v3530_v28 = vmul.f32 %v5442_v23, %v3529_v27  ;;  %v3496_v38 = vmul.f32 %v5444_v24, %v3487_v11  ;;  %vm3502_vm7 = vweird.f32 %v5444_v24 }
 0x34f   : > { %v3615_v50 = vmul.f32 %v6689_v21, %v6689_v21  ;;  %v3536_v56 = vmul.f32 %v5446_v52, %v6673_v8  ;;  %v3476_v57 = vpop.xlane.xlu2 %3475  ;;  %5447 = vrsqrt.f32 %v6691_v43  ;;  %vm3542_vm8 = vweird.f32 %v5446_v52  ;;  %vm3503_vm10 = vmor %vm3501_vm9, %vm3502_vm7 }
 0x350   : > { %v3534_v44 = vsel %vm3533_vm6, %v5442_v23, %v3530_v28  ;;  %v3497_v61 = vmul.f32 %v5444_v24, %v3496_v38  ;;  %5449 = vrsqrt.f32 %v6693_v48  ;;  %v3485_v0 = vmul.f32 0.125, %v3476_v57  ;;  %vm3543_vm12 = vmor %vm3541_vm11, %vm3542_vm8 }
 0x351   : > { %v3623_v58 = vmul.f32 %v3615_v50, %v6689_v21  ;;  %v3578_v53 = vmul.f32 %v3534_v44, %v6638_v19  ;;  %v3537_v62 = vmul.f32 %v5446_v52, %v3536_v56  ;;  %vm3551_vm15 = vweird.f32 %v6691_v43 }
 0x352   : > { %v3498_v46 = vmul.f32 0.5, %v3497_v61  ;;  %v3478_v2 = vpop.xlane.xlu0 %3477  ;;  %v6703_v1 = vadd.f32 1e-05, %v3485_v0  ;;  %vm3511_vm0 = vweird.f32 %v6693_v48 }
 0x353   : > { %v3631_v7 = vmul.f32 0.044715, %v3623_v58  ;;  %v3589_v12 = vmul.f32 %v6678_v6, %v3578_v53  ;;  %v3538_v63 = vmul.f32 0.5, %v3537_v62  ;;  %v3486_v17 = vmul.f32 0.125, %v3478_v2 }
 0x354   : > { %v3499_v20 = vsub.f32 1.5, %v3498_v46  ;;  %5451 = vrsqrt.f32 %v6703_v1  ;;  %vm3561_vm4 = vweird.f32 %v6703_v1 }
 0x355   : > { %v3639_v14 = vadd.f32 %v3631_v7, %v6689_v21  ;;  %v6707_v54 = vadd.f32 %v6684_v30, %v3589_v12  ;;  %v3539_v19 = vsub.f32 1.5, %v3538_v63  ;;  %v5448_v47 = vpop.eup %5447  ;;  %v6713_v5 = vadd.f32 1e-05, %v3486_v17 }
 0x356   : > { %v3500_v36 = vmul.f32 %v5444_v24, %v3499_v20  ;;  %v5450_v9 = vpop.eup %5449  ;;  %v3546_v55 = vmul.f32 %v5448_v47, %v6691_v43  ;;  %vm3552_vm13 = vweird.f32 %v5448_v47  ;;  %v3607_v63 = vmul.f32 0.5, %v6689_v21 }
 0x357   : > { %v3616_v40 = vmul.f32 %v6707_v54, %v6707_v54  ;;  %v3540_v13 = vmul.f32 %v5446_v52, %v3539_v19  ;;  %v3506_v10 = vmul.f32 %v5450_v9, %v6693_v48  ;;  %v3647_v22 = vmul.f32 0.7978846, %v3639_v14  ;;  %vm3553_vm1 = vmor %vm3551_vm15, %vm3552_vm13 }
 0x358   : > { %v3504_v60 = vsel %vm3503_vm10, %v5444_v24, %v3500_v36  ;;  %v3547_v23 = vmul.f32 %v5448_v47, %v3546_v55  ;;  %5453 = vrsqrt.f32 %v6713_v5  ;;  %vm3512_vm14 = vweird.f32 %v5450_v9 }
 0x359   : > { %v3624_v4 = vmul.f32 %v3616_v40, %v6707_v54  ;;  %v3575_v39 = vmul.f32 %v3504_v60, %v6643_v3  ;;  %v3544_v34 = vsel %vm3543_vm12, %v5446_v52, %v3540_v13  ;;  %v3507_v11 = vmul.f32 %v5450_v9, %v3506_v10  ;;  %vm3513_vm2 = vmor %vm3511_vm0, %vm3512_vm14 }
 0x35a   : > { %v3579_v26 = vmul.f32 %v3544_v34, %v6645_v51  ;;  %v5452_v15 = vpop.eup %5451  ;;  %v3548_v25 = vmul.f32 0.5, %v3547_v23  ;;  %5455 = vtanh.f32 %v3647_v22  ;;  %v3608_v19 = vmul.f32 0.5, %v6707_v54 }
 0x35b   : > { %v3632_v31 = vmul.f32 0.044715, %v3624_v4  ;;  %v3586_v8 = vmul.f32 %v6678_v6, %v3575_v39  ;;  %v3508_v32 = vmul.f32 0.5, %v3507_v11  ;;  %v3556_v51 = vmul.f32 %v5452_v15, %v6703_v1 }
 0x35c   : > { %v3590_v18 = vmul.f32 %v6678_v6, %v3579_v26  ;;  %v3549_v29 = vsub.f32 1.5, %v3548_v25  ;;  %vm3562_vm3 = vweird.f32 %v5452_v15  ;;  %vm3571_vm7 = vweird.f32 %v6713_v5 }
 0x35d   : > { %v3640_v37 = vadd.f32 %v3632_v31, %v6707_v54  ;;  %v6725_v3 = vadd.f32 %v6684_v30, %v3586_v8  ;;  %v3509_v41 = vsub.f32 1.5, %v3508_v32  ;;  %v3557_v27 = vmul.f32 %v5452_v15, %v3556_v51  ;;  %vm3563_vm5 = vmor %vm3561_vm4, %vm3562_vm3 }
 0x35e   : > { %v6729_v33 = vadd.f32 %v6684_v30, %v3590_v18  ;;  %v3550_v52 = vmul.f32 %v5448_v47, %v3549_v29  ;;  %v5454_v28 = vpop.eup %5453 }
 0x35f   : > { %v3648_v42 = vmul.f32 0.7978846, %v3640_v37  ;;  %v3613_v45 = vmul.f32 %v6725_v3, %v6725_v3  ;;  %v3510_v50 = vmul.f32 %v5450_v9, %v3509_v41  ;;  %v3558_v56 = vmul.f32 0.5, %v3557_v27 }
 0x360   : > { %v3617_v24 = vmul.f32 %v6729_v33, %v6729_v33  ;;  %v3554_v44 = vsel %vm3553_vm1, %v5448_v47, %v3550_v52  ;;  %v3566_v61 = vmul.f32 %v5454_v28, %v6713_v5  ;;  %v5456_v58 = vpop.eup %5455  ;;  %vm3572_vm6 = vweird.f32 %v5454_v28 }
 0x361   : > { %5457 = vtanh.f32 %v3648_v42  ;;  %v3621_v38 = vmul.f32 %v3613_v45, %v6725_v3  ;;  %v3580_v53 = vmul.f32 %v3554_v44, %v6655_v35  ;;  %v3514_v62 = vsel %vm3513_vm2, %v5450_v9, %v3510_v50  ;;  %vm3573_vm8 = vmor %vm3571_vm7, %vm3572_vm6 }
 0x362   : > { %v3625_v57 = vmul.f32 %v3617_v24, %v6729_v33  ;;  %v3559_v43 = vsub.f32 1.5, %v3558_v56  ;;  %v3576_v0 = vmul.f32 %v3514_v62, %v6653_v59  ;;  %v3567_v2 = vmul.f32 %v5454_v28, %v3566_v61 }
 0x363   : > { %v3629_v48 = vmul.f32 0.044715, %v3621_v38  ;;  %v3591_v7 = vmul.f32 %v6678_v6, %v3580_v53  ;;  %v3663_v17 = vadd.f32 1.0, %v5456_v58  ;;  %v3605_v62 = vmul.f32 0.5, %v6725_v3 }
 0x364   : > { %v3633_v46 = vmul.f32 0.044715, %v3625_v57  ;;  %v3560_v12 = vmul.f32 %v5452_v15, %v3559_v43  ;;  %v3587_v20 = vmul.f32 %v6678_v6, %v3576_v0  ;;  %v3568_v35 = vmul.f32 0.5, %v3567_v2 }
 0x365   : > { %v3602_v59 = vadd.f32 %v6684_v30, %v3591_v7  ;;  %v3637_v40 = vadd.f32 %v3629_v48, %v6725_v3  ;;  %v3671_v55 = vmul.f32 %v3663_v17, %v3607_v63 }
 0x366   : > { %v3641_v47 = vadd.f32 %v3633_v46, %v6729_v33  ;;  %v3564_v36 = vsel %vm3563_vm5, %v5452_v15, %v3560_v12  ;;  %v3598_v1 = vadd.f32 %v6684_v30, %v3587_v20  ;;  %v3569_v60 = vsub.f32 1.5, %v3568_v35 }
 0x367   : > { %v5458_v14 = vpop.eup %5457  ;;  %v3581_v21 = vmul.f32 %v3564_v36, %v6665_v16  ;;  %v3618_v13 = vmul.f32 %v3602_v59, %v3602_v59  ;;  %v3645_v26 = vmul.f32 0.7978846, %v3637_v40  ;;  %v3610_v58 = vmul.f32 0.5, %v3602_v59 }
 0x368   : > { %v3664_v9 = vadd.f32 1.0, %v5458_v14  ;;  %v3614_v22 = vmul.f32 %v3598_v1, %v3598_v1  ;;  %v3649_v54 = vmul.f32 0.7978846, %v3641_v47  ;;  %v3570_v34 = vmul.f32 %v5454_v28, %v3569_v60 }
 0x369   : > { %v3626_v4 = vmul.f32 %v3618_v13, %v3602_v59  ;;  %v3592_v39 = vmul.f32 %v6678_v6, %v3581_v21  ;;  %v3606_v43 = vmul.f32 0.5, %v3598_v1 }
 0x36a   : > { %v3672_v10 = vmul.f32 %v3664_v9, %v3608_v19  ;;  %v3622_v23 = vmul.f32 %v3614_v22, %v3598_v1  ;;  %v3574_v8 = vsel %vm3573_vm8, %v5454_v28, %v3570_v34  ;;  %5459 = vtanh.f32 %v3649_v54 }
 0x36b   : > { %v3634_v11 = vmul.f32 0.044715, %v3626_v4  ;;  %v3603_v31 = vadd.f32 %v6684_v30, %v3592_v39  ;;  %v3582_v15 = vmul.f32 %v3574_v8, %v6663_v49  ;;  %5461 = vtanh.f32 %v3645_v26 }
 0x36c   : > { %v5388_v16 = vpack.c.bf16 %v3672_v10, %v3671_v55  ;;  %v3630_v5 = vmul.f32 0.044715, %v3622_v23 }
 0x36d   : > { %v3642_v18 = vadd.f32 %v3634_v11, %v3602_v59  ;;  %v3619_v25 = vmul.f32 %v3603_v31, %v3603_v31  ;;  %v3593_v37 = vmul.f32 %v6678_v6, %v3582_v15  ;;  %v3609_v6 = vmul.f32 0.5, %v6729_v33 }
 0x36e   : > { %5400 = vst [vmem:[%s6757_s22 + $0x8] sm:$0xff] %v5388_v16   ;;  %v3638_v32 = vadd.f32 %v3630_v5, %v3598_v1  ;;  %v3611_v14 = vmul.f32 0.5, %v3603_v31 }
 0x36f   : > { %v3650_v51 = vmul.f32 0.7978846, %v3642_v18  ;;  %v3627_v29 = vmul.f32 %v3619_v25, %v3603_v31  ;;  %v3604_v42 = vadd.f32 %v6684_v30, %v3593_v37 }
 0x370   : > { %v3646_v41 = vmul.f32 0.7978846, %v3638_v32  ;;  %v5460_v24 = vpop.eup %5459 }
 0x371   : > { %5463 = vtanh.f32 %v3650_v51  ;;  %v3635_v45 = vmul.f32 0.044715, %v3627_v29  ;;  %v3620_v27 = vmul.f32 %v3604_v42, %v3604_v42  ;;  %v5462_v28 = vpop.eup %5461  ;;  %v3665_v50 = vadd.f32 1.0, %v5460_v24 }
 0x372   : > { %5465 = vtanh.f32 %v3646_v41  ;;  %v3661_v44 = vadd.f32 1.0, %v5462_v28  ;;  %v3612_v19 = vmul.f32 0.5, %v3604_v42 }
 0x373   : > { %v3643_v52 = vadd.f32 %v3635_v45, %v3603_v31  ;;  %v3628_v49 = vmul.f32 %v3620_v27, %v3604_v42  ;;  %v3673_v46 = vmul.f32 %v3665_v50, %v3609_v6 }
 0x374   : > { %v3669_v7 = vmul.f32 %v3661_v44, %v3605_v62 }
 0x375   : > { %v3651_v38 = vmul.f32 0.7978846, %v3643_v52  ;;  %v3636_v56 = vmul.f32 0.044715, %v3628_v49 }
 0x377   : > { %v5464_v57 = vpop.eup %5463  ;;  %5467 = vtanh.f32 %v3651_v38  ;;  %v3644_v30 = vadd.f32 %v3636_v56, %v3604_v42 }
 0x378   : > { %v5466_v61 = vpop.eup %5465  ;;  %v3666_v53 = vadd.f32 1.0, %v5464_v57 }
 0x379   : > { %v3662_v48 = vadd.f32 1.0, %v5466_v61  ;;  %v3652_v2 = vmul.f32 0.7978846, %v3644_v30 }
 0x37a   : > { %v3674_v0 = vmul.f32 %v3666_v53, %v3610_v58 }
 0x37b   : > { %v3670_v12 = vmul.f32 %v3662_v48, %v3606_v43  ;;  %5469 = vtanh.f32 %v3652_v2 }
 0x37c   : > { %v5393_v63 = vpack.c.bf16 %v3674_v0, %v3673_v46 }
 0x37d   : > { %v5383_v33 = vpack.c.bf16 %v3670_v12, %v3669_v7  ;;  %v5468_v17 = vpop.eup %5467 }
 0x37e   : > { %5401 = vst [vmem:[%s6757_s22 + $0x10] sm:$0xff] %v5393_v63   ;;  %v3667_v20 = vadd.f32 1.0, %v5468_v17 }
 0x37f   : > { %5384 = vst [vmem:[%s6757_s22] sm:$0xff] %v5383_v33  }
 0x380   : > { %v3675_v3 = vmul.f32 %v3667_v20, %v3611_v14 }
 0x381   : > { %v5470_v35 = vpop.eup %5469 }
 0x382   : > { %v3668_v47 = vadd.f32 1.0, %v5470_v35 }
 0x384   : > { %v3676_v59 = vmul.f32 %v3668_v47, %v3612_v19 }
 0x386   : > { %v5398_v36 = vpack.c.bf16 %v3676_v59, %v3675_v3 }
 0x388   : > { %5402 = vst [vmem:[%s6757_s22 + $0x18] sm:$0xff] %v5398_v36  }
 0x389 PF: > { %s15_s18 = sadd.s32 1, %s5477_s18  }
 0x38a   : > { %p12_p4 = scmp.ge.s32.totalorder %s15_s18, 4  }
 0x38c   :  { %14 = sbr.rel (!%p12_p4) target bundleno = 1 (0x1), region = 70 }

// kernel: era5_encode.6
= control target key start
LH: loop header
LB: loop body
LE: loop exit
PB: predicated region body
PF: predicated region fallthrough
CT: control target
= control target key end

     0   :  { %s1963_s18 = smov 0   ;;  %s2318_s0 = inlined_call_operand.vmem [shape: bf16[16,1664], index: 0, kind: input, shape index: {}]   ;;  %s2319_s1 = inlined_call_operand.vmem [shape: bf16[1664,128], index: 1, kind: input, shape index: {}]   ;;  %s2320_s2 = inlined_call_operand.vmem [shape: f32[1,128], index: 2, kind: input, shape index: {}]   ;;  %s2321_s3 = inlined_call_operand.vmem [shape: f32[1,128], index: 3, kind: input, shape index: {}]   ;;  %s2322_s4 = inlined_call_operand.vmem [shape: f32[1,128], index: 4, kind: input, shape index: {}]   ;;  %s2323_s5 = inlined_call_operand.vmem [shape: bf16[16,128], index: 5, kind: output, shape index: {}]  }
   0x1 LB: > { %s1380_s19 = sadd.s32 4294967295, %s1931_s18   ;;  %p1384_p0 = scmp.ge.s32.totalorder %s1931_s18, 1  ;;  %s1931_s18 = sphi %s1963_s18, %s15_s18  }
   0x2   : > { %p187_p1 = scmp.lt.s32.totalorder %s1931_s18, 3 }
   0x4   : > { %p188_p2 = pnand %p1384_p0, %p187_p1 }
   0x5   : > { %p214_p3 = scmp.lt.s32.totalorder (!%p188_p2), %s1380_s19, 1 }
   0x6   : > { %191 = sbr.rel (%p188_p2) target bundleno = 559 (0x22f), region = 40 }
   0xb   : > { %v1812_v0 = vld [vmem:[%s2319_s1 + $0x38] sm:$0xff]  ;;  %v1811_v4 = vld [vmem:[%s2319_s1 + $0x30] sm:$0xff]  ;;  %v1810_v8 = vld [vmem:[%s2319_s1 + $0x28] sm:$0xff]  ;;  %s2325_s19 = smov (!%p214_p3, %s1380_s19), 1 }
   0xc   : > { %v1828_v1 = vld [vmem:[%s2319_s1 + $0xb8] sm:$0xff]  ;;  %1112 = vmatpush.bf16.msra.mxu0 %v1812_v0  ;;  %v1827_v5 = vld [vmem:[%s2319_s1 + $0xb0] sm:$0xff]  ;;  %v1826_v9 = vld [vmem:[%s2319_s1 + $0xa8] sm:$0xff]  ;;  %s1909_s12 = smul.u32 52, %s2325_s19 }
   0xd   : > { %v1820_v2 = vld [vmem:[%s2319_s1 + $0x78] sm:$0xff]  ;;  %1138 = vmatpush.bf16.msra.mxu2 %v1828_v1  ;;  %v1819_v6 = vld [vmem:[%s2319_s1 + $0x70] sm:$0xff]  ;;  %v1818_v10 = vld [vmem:[%s2319_s1 + $0x68] sm:$0xff] }
   0xe   : > { %v1836_v3 = vld [vmem:[%s2319_s1 + $0xf8] sm:$0xff]  ;;  %1125 = vmatpush.bf16.msra.mxu1 %v1820_v2  ;;  %v1835_v7 = vld [vmem:[%s2319_s1 + $0xf0] sm:$0xff]  ;;  %v1834_v11 = vld [vmem:[%s2319_s1 + $0xe8] sm:$0xff]  ;;  %s2053_s25 = scalar_lea.vmem %s2318_s0, %s1909_s12  ;;  %s1386_s12 = sshll.u32 %s2325_s19, 2 }
   0xf   : > { %1151 = vmatpush.bf16.msra.mxu3 %v1836_v3  ;;  %v1809_v12 = vld [vmem:[%s2319_s1 + $0x20] sm:$0xff]  ;;  %v1808_v16 = vld [vmem:[%s2319_s1 + $0x18] sm:$0xff]  ;;  %v1807_v20 = vld [vmem:[%s2319_s1 + $0x10] sm:$0xff]  ;;  %s222_s15 = scalar_lea.vmem %s2323_s5, %s1386_s12 }
  0x10   : > { %1113 = vmatpush.bf16.msra.mxu0 %v1811_v4  ;;  %v1825_v13 = vld [vmem:[%s2319_s1 + $0xa0] sm:$0xff]  ;;  %v1824_v17 = vld [vmem:[%s2319_s1 + $0x98] sm:$0xff]  ;;  %v1823_v21 = vld [vmem:[%s2319_s1 + $0x90] sm:$0xff] }
  0x11   : > { %1139 = vmatpush.bf16.msra.mxu2 %v1827_v5  ;;  %v1817_v14 = vld [vmem:[%s2319_s1 + $0x60] sm:$0xff]  ;;  %v1816_v18 = vld [vmem:[%s2319_s1 + $0x58] sm:$0xff]  ;;  %v1815_v22 = vld [vmem:[%s2319_s1 + $0x50] sm:$0xff] }
  0x12   : > { %1126 = vmatpush.bf16.msra.mxu1 %v1819_v6  ;;  %v1833_v15 = vld [vmem:[%s2319_s1 + $0xe0] sm:$0xff]  ;;  %v1832_v19 = vld [vmem:[%s2319_s1 + $0xd8] sm:$0xff]  ;;  %v1831_v23 = vld [vmem:[%s2319_s1 + $0xd0] sm:$0xff] }
  0x13   : > { %1152 = vmatpush.bf16.msra.mxu3 %v1835_v7  ;;  %v1806_v24 = vld [vmem:[%s2319_s1 + $0x8] sm:$0xff]  ;;  %v223_v29 = vld [vmem:[%s2053_s25] sm:$0xff]  ;;  %v1844_v34 = vld [vmem:[%s2319_s1 + $0x138] sm:$0xff] }
  0x14   : > { %1114 = vmatpush.bf16.msra.mxu0 %v1810_v8  ;;  %v1822_v25 = vld [vmem:[%s2319_s1 + $0x88] sm:$0xff]  ;;  %v1805_v30 = vld [vmem:[%s2319_s1] sm:$0xff]  ;;  %v449_v33 = vunpack.c.l.b16 %v223_v29  ;;  %v1860_v35 = vld [vmem:[%s2319_s1 + $0x1b8] sm:$0xff]  ;;  %v450_v39 = vunpack.c.h.b16 %v223_v29 }
  0x15   : > { %1140 = vmatpush.bf16.msra.mxu2 %v1826_v9  ;;  %v1814_v26 = vld [vmem:[%s2319_s1 + $0x48] sm:$0xff]  ;;  %v1821_v31 = vld [vmem:[%s2319_s1 + $0x80] sm:$0xff]  ;;  %v1852_v40 = vld [vmem:[%s2319_s1 + $0x178] sm:$0xff] }
  0x16   : > { %1127 = vmatpush.bf16.msra.mxu1 %v1818_v10  ;;  %v1830_v27 = vld [vmem:[%s2319_s1 + $0xc8] sm:$0xff]  ;;  %v1813_v36 = vld [vmem:[%s2319_s1 + $0x40] sm:$0xff]  ;;  %v1868_v41 = vld [vmem:[%s2319_s1 + $0x1f8] sm:$0xff]  ;;  %v462_v43 = vpack.c.b16 %v449_v33, %v449_v33  ;;  %v463_v47 = vpack.c.b16 %v450_v39, %v450_v39 }
  0x17   : > { %1153 = vmatpush.bf16.msra.mxu3 %v1834_v11  ;;  %v224_v28 = vld [vmem:[%s2053_s25 + $0x8] sm:$0xff]  ;;  %v1829_v37 = vld [vmem:[%s2319_s1 + $0xc0] sm:$0xff]  ;;  %v1843_v44 = vld [vmem:[%s2319_s1 + $0x130] sm:$0xff] }
  0x18   : > { %1115 = vmatpush.bf16.msra.mxu0 %v1809_v12  ;;  %v451_v32 = vunpack.c.l.b16 %v224_v28  ;;  %v452_v38 = vunpack.c.h.b16 %v224_v28  ;;  %v1859_v45 = vld [vmem:[%s2319_s1 + $0x1b0] sm:$0xff]  ;;  %v1842_v50 = vld [vmem:[%s2319_s1 + $0x128] sm:$0xff]  ;;  %v1841_v54 = vld [vmem:[%s2319_s1 + $0x120] sm:$0xff] }
  0x19   : > { %1141 = vmatpush.bf16.msra.mxu2 %v1825_v13  ;;  %v1851_v48 = vld [vmem:[%s2319_s1 + $0x170] sm:$0xff]  ;;  %v1858_v51 = vld [vmem:[%s2319_s1 + $0x1a8] sm:$0xff]  ;;  %v1857_v55 = vld [vmem:[%s2319_s1 + $0x1a0] sm:$0xff] }
  0x1a   : > { %1128 = vmatpush.bf16.msra.mxu1 %v1817_v14  ;;  %v464_v42 = vpack.c.b16 %v451_v32, %v451_v32  ;;  %v465_v46 = vpack.c.b16 %v452_v38, %v452_v38  ;;  %v1867_v49 = vld [vmem:[%s2319_s1 + $0x1f0] sm:$0xff]  ;;  %v1850_v52 = vld [vmem:[%s2319_s1 + $0x168] sm:$0xff]  ;;  %v1849_v56 = vld [vmem:[%s2319_s1 + $0x160] sm:$0xff] }
  0x1b   : > { %1154 = vmatpush.bf16.msra.mxu3 %v1833_v15  ;;  %v1866_v53 = vld [vmem:[%s2319_s1 + $0x1e8] sm:$0xff]  ;;  %v1865_v57 = vld [vmem:[%s2319_s1 + $0x1e0] sm:$0xff]  ;;  %v1840_v58 = vld [vmem:[%s2319_s1 + $0x118] sm:$0xff] }
  0x1c   : > { %1116 = vmatpush.bf16.msra.mxu0 %v1808_v16  ;;  %v1856_v59 = vld [vmem:[%s2319_s1 + $0x198] sm:$0xff]  ;;  %v1839_v62 = vld [vmem:[%s2319_s1 + $0x110] sm:$0xff]  ;;  %v1838_v2 = vld [vmem:[%s2319_s1 + $0x108] sm:$0xff] }
  0x1d   : > { %1142 = vmatpush.bf16.msra.mxu2 %v1824_v17  ;;  %v1848_v60 = vld [vmem:[%s2319_s1 + $0x158] sm:$0xff]  ;;  %v1855_v63 = vld [vmem:[%s2319_s1 + $0x190] sm:$0xff]  ;;  %v1854_v3 = vld [vmem:[%s2319_s1 + $0x188] sm:$0xff] }
  0x1e   : > { %1129 = vmatpush.bf16.msra.mxu1 %v1816_v18  ;;  %v1864_v61 = vld [vmem:[%s2319_s1 + $0x1d8] sm:$0xff]  ;;  %v1847_v0 = vld [vmem:[%s2319_s1 + $0x150] sm:$0xff]  ;;  %v1846_v6 = vld [vmem:[%s2319_s1 + $0x148] sm:$0xff] }
  0x1f   : > { %1155 = vmatpush.bf16.msra.mxu3 %v1832_v19  ;;  %v1863_v1 = vld [vmem:[%s2319_s1 + $0x1d0] sm:$0xff]  ;;  %v226_v4 = vld [vmem:[%s2053_s25 + $0x18] sm:$0xff]  ;;  %v1862_v7 = vld [vmem:[%s2319_s1 + $0x1c8] sm:$0xff] }
  0x20   : > { %1117 = vmatpush.bf16.msra.mxu0 %v1807_v20  ;;  %v225_v5 = vld [vmem:[%s2053_s25 + $0x10] sm:$0xff]  ;;  %v1837_v8 = vld [vmem:[%s2319_s1 + $0x100] sm:$0xff]  ;;  %v455_v10 = vunpack.c.l.b16 %v226_v4  ;;  %v1876_v12 = vld [vmem:[%s2319_s1 + $0x238] sm:$0xff]  ;;  %v456_v16 = vunpack.c.h.b16 %v226_v4 }
  0x21   : > { %1143 = vmatpush.bf16.msra.mxu2 %v1823_v21  ;;  %v1853_v9 = vld [vmem:[%s2319_s1 + $0x180] sm:$0xff]  ;;  %v453_v11 = vunpack.c.l.b16 %v225_v5  ;;  %v1892_v13 = vld [vmem:[%s2319_s1 + $0x2b8] sm:$0xff]  ;;  %v454_v17 = vunpack.c.h.b16 %v225_v5  ;;  %v1874_v28 = vld [vmem:[%s2319_s1 + $0x228] sm:$0xff] }
  0x22   : > { %1130 = vmatpush.bf16.msra.mxu1 %v1815_v22  ;;  %v1845_v14 = vld [vmem:[%s2319_s1 + $0x140] sm:$0xff]  ;;  %v1884_v18 = vld [vmem:[%s2319_s1 + $0x278] sm:$0xff]  ;;  %v468_v20 = vpack.c.b16 %v455_v10, %v455_v10  ;;  %v1875_v22 = vld [vmem:[%s2319_s1 + $0x230] sm:$0xff] }
  0x23   : > { %1156 = vmatpush.bf16.msra.mxu3 %v1831_v23  ;;  %v1861_v15 = vld [vmem:[%s2319_s1 + $0x1c0] sm:$0xff]  ;;  %v1900_v19 = vld [vmem:[%s2319_s1 + $0x2f8] sm:$0xff]  ;;  %v466_v21 = vpack.c.b16 %v453_v11, %v453_v11  ;;  %v1891_v23 = vld [vmem:[%s2319_s1 + $0x2b0] sm:$0xff] }
  0x24   : > { %1118 = vmatpush.bf16.msra.mxu0 %v1806_v24  ;;  %v469_v24 = vpack.c.b16 %v456_v16, %v456_v16  ;;  %v1890_v29 = vld [vmem:[%s2319_s1 + $0x2a8] sm:$0xff]  ;;  %v1873_v32 = vld [vmem:[%s2319_s1 + $0x220] sm:$0xff]  ;;  %v1880_v38 = vld [vmem:[%s2319_s1 + $0x258] sm:$0xff] }
  0x25   : > { %1144 = vmatpush.bf16.msra.mxu2 %v1822_v25  ;;  %v467_v25 = vpack.c.b16 %v454_v17, %v454_v17  ;;  %v1889_v33 = vld [vmem:[%s2319_s1 + $0x2a0] sm:$0xff]  ;;  %v1896_v39 = vld [vmem:[%s2319_s1 + $0x2d8] sm:$0xff]  ;;  %v1902_v4 = vld [vmem:[%s2319_s1 + $0x308] sm:$0xff] }
  0x26   : > { %1131 = vmatpush.bf16.msra.mxu1 %v1814_v26  ;;  %v1883_v26 = vld [vmem:[%s2319_s1 + $0x270] sm:$0xff] }
  0x27   : > { %1157 = vmatpush.bf16.msra.mxu3 %v1830_v27  ;;  %v1899_v27 = vld [vmem:[%s2319_s1 + $0x2f0] sm:$0xff] }
  0x28   : > { %1119 = vmatpush.bf16.msra.mxu0 %v1805_v30  ;;  %v1882_v30 = vld [vmem:[%s2319_s1 + $0x268] sm:$0xff]  ;;  %v229_v5 = vld [vmem:[%s2053_s25 + $0x30] sm:$0xf] }
  0x29   : > { %1145 = vmatpush.bf16.msra.mxu2 %v1821_v31  ;;  %v1898_v31 = vld [vmem:[%s2319_s1 + $0x2e8] sm:$0xff] }
  0x2a   : > { %1132 = vmatpush.bf16.msra.mxu1 %v1813_v36  ;;  %v1872_v36 = vld [vmem:[%s2319_s1 + $0x218] sm:$0xff] }
  0x2b   : > { %1158 = vmatpush.bf16.msra.mxu3 %v1829_v37  ;;  %1120 = vmatmul.bf16.vlgmr.msra.gmra.mxu0 %v462_v43  ;;  %v1888_v37 = vld [vmem:[%s2319_s1 + $0x298] sm:$0xff]  ;;  %v1895_v43 = vld [vmem:[%s2319_s1 + $0x2d0] sm:$0xff] }
  0x2c   : > { %1164 = vmatpush.bf16.msrb.mxu0 %v1844_v34  ;;  %1146 = vmatmul.bf16.vlgmr.msra.gmra.mxu2 %v464_v42  ;;  %v1881_v34 = vld [vmem:[%s2319_s1 + $0x260] sm:$0xff]  ;;  %v1879_v42 = vld [vmem:[%s2319_s1 + $0x250] sm:$0xff] }
  0x2d   : > { %1190 = vmatpush.bf16.msrb.mxu2 %v1860_v35  ;;  %1133 = vmatmul.bf16.vlgmr.msra.gmra.mxu1 %v463_v47  ;;  %v1897_v35 = vld [vmem:[%s2319_s1 + $0x2e0] sm:$0xff]  ;;  %v228_v47 = vld [vmem:[%s2053_s25 + $0x28] sm:$0xff] }
  0x2e   : > { %1177 = vmatpush.bf16.msrb.mxu1 %v1852_v40  ;;  %1159 = vmatmul.bf16.vlgmr.msra.gmra.mxu3 %v465_v46  ;;  %v1871_v40 = vld [vmem:[%s2319_s1 + $0x210] sm:$0xff]  ;;  %v227_v46 = vld [vmem:[%s2053_s25 + $0x20] sm:$0xff] }
  0x2f   : > { %1203 = vmatpush.bf16.msrb.mxu3 %v1868_v41  ;;  %v1887_v41 = vld [vmem:[%s2319_s1 + $0x290] sm:$0xff] }
  0x30   : > { %1165 = vmatpush.bf16.msrb.mxu0 %v1843_v44  ;;  %v1870_v44 = vld [vmem:[%s2319_s1 + $0x208] sm:$0xff] }
  0x31   : > { %1191 = vmatpush.bf16.msrb.mxu2 %v1859_v45  ;;  %v1886_v45 = vld [vmem:[%s2319_s1 + $0x288] sm:$0xff] }
  0x32   : > { %1178 = vmatpush.bf16.msrb.mxu1 %v1851_v48  ;;  %v1878_v48 = vld [vmem:[%s2319_s1 + $0x248] sm:$0xff] }
  0x33   : > { %1204 = vmatpush.bf16.msrb.mxu3 %v1867_v49  ;;  %v1894_v49 = vld [vmem:[%s2319_s1 + $0x2c8] sm:$0xff] }
  0x34   : > { %1166 = vmatpush.bf16.msrb.mxu0 %v1842_v50  ;;  %v457_v50 = vunpack.c.l.b16 %v227_v46 }
  0x35   : > { %1192 = vmatpush.bf16.msrb.mxu2 %v1858_v51  ;;  %v459_v51 = vunpack.c.l.b16 %v228_v47 }
  0x36   : > { %1179 = vmatpush.bf16.msrb.mxu1 %v1850_v52  ;;  %v1869_v52 = vld [vmem:[%s2319_s1 + $0x200] sm:$0xff] }
  0x37   : > { %1205 = vmatpush.bf16.msrb.mxu3 %v1866_v53  ;;  %v1885_v53 = vld [vmem:[%s2319_s1 + $0x280] sm:$0xff] }
  0x38   : > { %1167 = vmatpush.bf16.msrb.mxu0 %v1841_v54  ;;  %v1908_v54 = vld [vmem:[%s2319_s1 + $0x338] sm:$0xff] }
  0x39   : > { %1193 = vmatpush.bf16.msrb.mxu2 %v1857_v55  ;;  %v458_v55 = vunpack.c.h.b16 %v227_v46 }
  0x3a   : > { %1180 = vmatpush.bf16.msrb.mxu1 %v1849_v56  ;;  %v460_v56 = vunpack.c.h.b16 %v228_v47 }
  0x3b   : > { %1206 = vmatpush.bf16.msrb.mxu3 %v1865_v57  ;;  %v1877_v57 = vld [vmem:[%s2319_s1 + $0x240] sm:$0xff] }
  0x3c   : > { %1168 = vmatpush.bf16.msrb.mxu0 %v1840_v58  ;;  %v1893_v58 = vld [vmem:[%s2319_s1 + $0x2c0] sm:$0xff] }
  0x3d   : > { %1194 = vmatpush.bf16.msrb.mxu2 %v1856_v59  ;;  %v470_v59 = vpack.c.b16 %v457_v50, %v457_v50 }
  0x3e   : > { %1181 = vmatpush.bf16.msrb.mxu1 %v1848_v60  ;;  %v472_v60 = vpack.c.b16 %v459_v51, %v459_v51 }
  0x3f   : > { %1207 = vmatpush.bf16.msrb.mxu3 %v1864_v61  ;;  %v471_v61 = vpack.c.b16 %v458_v55, %v458_v55 }
  0x40   : > { %1169 = vmatpush.bf16.msrb.mxu0 %v1839_v62  ;;  %v473_v62 = vpack.c.b16 %v460_v56, %v460_v56 }
  0x41   : > { %1195 = vmatpush.bf16.msrb.mxu2 %v1855_v63  ;;  %v1907_v63 = vld [vmem:[%s2319_s1 + $0x330] sm:$0xff] }
  0x42   : > { %1182 = vmatpush.bf16.msrb.mxu1 %v1847_v0  ;;  %v1906_v0 = vld [vmem:[%s2319_s1 + $0x328] sm:$0xff] }
  0x43   : > { %1208 = vmatpush.bf16.msrb.mxu3 %v1863_v1  ;;  %v1905_v1 = vld [vmem:[%s2319_s1 + $0x320] sm:$0xff] }
  0x44   : > { %1170 = vmatpush.bf16.msrb.mxu0 %v1838_v2  ;;  %v1904_v2 = vld [vmem:[%s2319_s1 + $0x318] sm:$0xff] }
  0x45   : > { %1196 = vmatpush.bf16.msrb.mxu2 %v1854_v3  ;;  %v1903_v3 = vld [vmem:[%s2319_s1 + $0x310] sm:$0xff] }
  0x46   : > { %1183 = vmatpush.bf16.msrb.mxu1 %v1846_v6  ;;  %v461_v6 = vunpack.c.l.b16 %v229_v5 }
  0x47   : > { %1209 = vmatpush.bf16.msrb.mxu3 %v1862_v7  ;;  %v1901_v7 = vld [vmem:[%s2319_s1 + $0x300] sm:$0xff] }
  0x48   : > { %1171 = vmatpush.bf16.msrb.mxu0 %v1837_v8  ;;  %v474_v8 = vpack.c.b16 %v461_v6, %v461_v6 }
  0x49   : > { %1197 = vmatpush.bf16.msrb.mxu2 %v1853_v9 }
  0x4a   : > { %1184 = vmatpush.bf16.msrb.mxu1 %v1845_v14 }
  0x4b   : > { %1210 = vmatpush.bf16.msrb.mxu3 %v1861_v15  ;;  %1172 = vmatmul.bf16.vlgmr.msrb.gmra.mxu0 %v466_v21 }
  0x4c   : > { %1216 = vmatpush.bf16.msra.mxu0 %v1876_v12  ;;  %1198 = vmatmul.bf16.vlgmr.msrb.gmra.mxu2 %v468_v20 }
  0x4d   : > { %1242 = vmatpush.bf16.msra.mxu2 %v1892_v13  ;;  %1185 = vmatmul.bf16.vlgmr.msrb.gmra.mxu1 %v467_v25 }
  0x4e   : > { %1229 = vmatpush.bf16.msra.mxu1 %v1884_v18  ;;  %1211 = vmatmul.bf16.vlgmr.msrb.gmra.mxu3 %v469_v24 }
  0x4f   : > { %1255 = vmatpush.bf16.msra.mxu3 %v1900_v19 }
  0x50   : > { %1217 = vmatpush.bf16.msra.mxu0 %v1875_v22 }
  0x51   : > { %1243 = vmatpush.bf16.msra.mxu2 %v1891_v23  ;;  %v1918_v23 = vld [vmem:[%s2320_s2] ss:$0 sm:$0xff] }
  0x52   : > { %1230 = vmatpush.bf16.msra.mxu1 %v1883_v26 }
  0x53   : > { %1256 = vmatpush.bf16.msra.mxu3 %v1899_v27 }
  0x54   : > { %1218 = vmatpush.bf16.msra.mxu0 %v1874_v28 }
  0x55   : > { %1244 = vmatpush.bf16.msra.mxu2 %v1890_v29 }
  0x56   : > { %1231 = vmatpush.bf16.msra.mxu1 %v1882_v30 }
  0x57   : > { %1257 = vmatpush.bf16.msra.mxu3 %v1898_v31 }
  0x58   : > { %1219 = vmatpush.bf16.msra.mxu0 %v1873_v32 }
  0x59   : > { %1245 = vmatpush.bf16.msra.mxu2 %v1889_v33 }
  0x5a   : > { %1232 = vmatpush.bf16.msra.mxu1 %v1881_v34 }
  0x5b   : > { %1258 = vmatpush.bf16.msra.mxu3 %v1897_v35 }
  0x5c   : > { %1220 = vmatpush.bf16.msra.mxu0 %v1872_v36 }
  0x5d   : > { %1246 = vmatpush.bf16.msra.mxu2 %v1888_v37 }
  0x5e   : > { %1233 = vmatpush.bf16.msra.mxu1 %v1880_v38 }
  0x5f   : > { %1259 = vmatpush.bf16.msra.mxu3 %v1896_v39 }
  0x60   : > { %1221 = vmatpush.bf16.msra.mxu0 %v1871_v40 }
  0x61   : > { %1247 = vmatpush.bf16.msra.mxu2 %v1887_v41 }
  0x62   : > { %1234 = vmatpush.bf16.msra.mxu1 %v1879_v42 }
  0x63   : > { %1260 = vmatpush.bf16.msra.mxu3 %v1895_v43  ;;  %v1283_v43 = vlaneseq }
  0x64   : > { %1222 = vmatpush.bf16.msra.mxu0 %v1870_v44 }
  0x65   : > { %1248 = vmatpush.bf16.msra.mxu2 %v1886_v45  ;;  %v1284_v46 = vand.u32 127, %v1283_v43 }
  0x66   : > { %1235 = vmatpush.bf16.msra.mxu1 %v1878_v48 }
  0x67   : > { %1261 = vmatpush.bf16.msra.mxu3 %v1894_v49  ;;  %vm1285_vm0 = vcmp.lt.s32.totalorder %v1284_v46, 8 }
  0x68   : > { %1223 = vmatpush.bf16.msra.mxu0 %v1869_v52 }
  0x69   : > { %1249 = vmatpush.bf16.msra.mxu2 %v1885_v53 }
  0x6a   : > { %1236 = vmatpush.bf16.msra.mxu1 %v1877_v57 }
  0x6b   : > { %1262 = vmatpush.bf16.msra.mxu3 %v1893_v58  ;;  %1224 = vmatmul.bf16.vlgmr.msra.gmra.mxu0 %v470_v59 }
  0x6c   : > { %1268 = vmatpush.bf16.msrb.mxu0 %v1908_v54  ;;  %1250 = vmatmul.bf16.vlgmr.msra.gmra.mxu2 %v472_v60 }
  0x6d   : > { %1237 = vmatmul.bf16.vlgmr.msra.gmra.mxu1 %v471_v61 }
  0x6e   : > { %1263 = vmatmul.bf16.vlgmr.msra.gmra.mxu3 %v473_v62 }
  0x70   : > { %1269 = vmatpush.bf16.msrb.mxu0 %v1907_v63 }
  0x74   : > { %1270 = vmatpush.bf16.msrb.mxu0 %v1906_v0 }
  0x78   : > { %1271 = vmatpush.bf16.msrb.mxu0 %v1905_v1 }
  0x7c   : > { %1272 = vmatpush.bf16.msrb.mxu0 %v1904_v2  ;;  %v1919_v2 = vld [vmem:[%s2321_s3] ss:$0 sm:$0xff] }
  0x80   : > { %1273 = vmatpush.bf16.msrb.mxu0 %v1903_v3 }
  0x84   : > { %1274 = vmatpush.bf16.msrb.mxu0 %v1902_v4  ;;  %v1920_v4 = vld [vmem:[%s2322_s4] ss:$0 sm:$0xff] }
  0x88   : > { %1275 = vmatpush.bf16.msrb.mxu0 %v1901_v7 }
  0x8b   : > { %1276 = vmatmul.bf16.vlgmr.msrb.gmra.mxu0 %v474_v8 }
  0xa8   : > { %v1121_v9 = vpop.f32.mrf.mxu0 }
  0xa9   : > { %v1122_v26 = vadd.f32 %v1918_v23, %v1121_v9 }
  0xaa   : > { %v1134_v10 = vpop.f32.mrf.mxu1 }
  0xab   : > { %v1135_v27 = vadd.f32 %v1134_v10, %v1122_v26 }
  0xaf   : > { %v1147_v11 = vpop.f32.mrf.mxu2 }
  0xb0   : > { %v1123_v13 = vpop.f32.mrf.mxu0  ;;  %v1148_v28 = vadd.f32 %v1147_v11, %v1135_v27 }
  0xb1   : > { %v1160_v12 = vpop.f32.mrf.mxu3 }
  0xb2   : > { %v1136_v14 = vpop.f32.mrf.mxu1  ;;  %v1161_v30 = vadd.f32 %v1160_v12, %v1148_v28 }
  0xb7   : > { %v1149_v15 = vpop.f32.mrf.mxu2 }
  0xb9   : > { %v1162_v16 = vpop.f32.mrf.mxu3 }
  0xc8   : > { %v1173_v17 = vpop.f32.mrf.mxu0 }
  0xc9   : > { %v1174_v32 = vadd.f32 %v1173_v17, %v1161_v30 }
  0xca   : > { %v1186_v18 = vpop.f32.mrf.mxu1 }
  0xcb   : > { %v1187_v36 = vadd.f32 %v1186_v18, %v1174_v32 }
  0xcf   : > { %v1199_v19 = vpop.f32.mrf.mxu2 }
  0xd0   : > { %v1175_v21 = vpop.f32.mrf.mxu0  ;;  %v1200_v38 = vadd.f32 %v1199_v19, %v1187_v36 }
  0xd1   : > { %v1212_v20 = vpop.f32.mrf.mxu3 }
  0xd2   : > { %v1188_v22 = vpop.f32.mrf.mxu1  ;;  %v1213_v41 = vadd.f32 %v1212_v20, %v1200_v38 }
  0xd7   : > { %v1201_v24 = vpop.f32.mrf.mxu2 }
  0xd9   : > { %v1214_v25 = vpop.f32.mrf.mxu3 }
  0xe8   : > { %v1225_v29 = vpop.f32.mrf.mxu0 }
  0xe9   : > { %v1226_v42 = vadd.f32 %v1225_v29, %v1213_v41 }
  0xea   : > { %v1238_v31 = vpop.f32.mrf.mxu1 }
  0xeb   : > { %v1239_v44 = vadd.f32 %v1238_v31, %v1226_v42 }
  0xef   : > { %v1251_v33 = vpop.f32.mrf.mxu2 }
  0xf0   : > { %v1227_v35 = vpop.f32.mrf.mxu0  ;;  %v1252_v45 = vadd.f32 %v1251_v33, %v1239_v44 }
  0xf1   : > { %v1264_v34 = vpop.f32.mrf.mxu3 }
  0xf2   : > { %v1240_v37 = vpop.f32.mrf.mxu1  ;;  %v1265_v47 = vadd.f32 %v1264_v34, %v1252_v45 }
  0xf7   : > { %v1253_v39 = vpop.f32.mrf.mxu2 }
  0xf9   : > { %v1266_v40 = vpop.f32.mrf.mxu3 }
 0x108   : > { %v1277_v48 = vpop.f32.mrf.mxu0 }
 0x109   : > { %v1278_v49 = vadd.f32 %v1277_v48, %v1265_v47 }
 0x10b   : > { %v1286_v50 = vsel %vm1285_vm0, %v1278_v49, 0.0 }
 0x10c   : > { %1287 = vadd.xlane.f32.xlu0 %v1286_v50 }
 0x110   : > { %v1279_v51 = vpop.f32.mrf.mxu0 }
 0x17f   : > { %v1288_v52 = vpop.xlane.xlu0 %1287 }
 0x180   : > { %v1289_v53 = vmul.f32 0.125, %v1288_v52 }
 0x182   : > { %v1290_v54 = vsub.f32 %v1278_v49, %v1289_v53 }
 0x184   : > { %v1291_v55 = vsel %vm1285_vm0, %v1290_v54, 0.0 }
 0x185   : > { %v1292_v56 = vmul.f32 %v1291_v55, %v1291_v55 }
 0x187   : > { %1293 = vadd.xlane.f32.xlu0 %v1292_v56 }
 0x1fa   : > { %v1294_v57 = vpop.xlane.xlu0 %1293 }
 0x1fb   : > { %v1295_v58 = vmul.f32 0.125, %v1294_v57 }
 0x1fd   : > { %v1296_v59 = vadd.f32 1e-05, %v1295_v58 }
 0x1ff   : > { %1921 = vrsqrt.f32 %v1296_v59  ;;  %vm1303_vm2 = vweird.f32 %v1296_v59 }
 0x205   : > { %v1922_v60 = vpop.eup %1921 }
 0x206   : > { %v1298_v61 = vmul.f32 %v1922_v60, %v1296_v59  ;;  %vm1304_vm1 = vweird.f32 %v1922_v60 }
 0x207   : > { %vm1305_vm3 = vmor %vm1303_vm2, %vm1304_vm1 }
 0x208   : > { %v1299_v62 = vmul.f32 %v1922_v60, %v1298_v61 }
 0x20a   : > { %v1300_v63 = vmul.f32 0.5, %v1299_v62 }
 0x20c   : > { %v1301_v0 = vsub.f32 1.5, %v1300_v63 }
 0x20e   : > { %v1302_v1 = vmul.f32 %v1922_v60, %v1301_v0 }
 0x210   : > { %v1306_v3 = vsel %vm1305_vm3, %v1922_v60, %v1302_v1 }
 0x211   : > { %v1307_v5 = vmul.f32 %v1306_v3, %v1290_v54 }
 0x213   : > { %v1311_v6 = vmul.f32 %v1919_v2, %v1307_v5 }
 0x215   : > { %v1315_v7 = vadd.f32 %v1920_v4, %v1311_v6 }
 0x217   : > { %v1317_v8 = vmul.f32 %v1315_v7, %v1315_v7  ;;  %v1316_v14 = vmul.f32 0.5, %v1315_v7 }
 0x219   : > { %v1318_v9 = vmul.f32 %v1317_v8, %v1315_v7 }
 0x21b   : > { %v1319_v10 = vmul.f32 0.044715, %v1318_v9 }
 0x21d   : > { %v1320_v11 = vadd.f32 %v1319_v10, %v1315_v7 }
 0x21f   : > { %v1321_v12 = vmul.f32 0.7978846, %v1320_v11 }
 0x221   : > { %1923 = vtanh.f32 %v1321_v12 }
 0x227   : > { %v1924_v13 = vpop.eup %1923 }
 0x228   : > { %v1323_v15 = vadd.f32 1.0, %v1924_v13 }
 0x22a   : > { %v1324_v16 = vmul.f32 %v1323_v15, %v1316_v14 }
 0x22c   : > { %v1325_v17 = vpack.c.bf16 %v1324_v16, %v1324_v16 }
 0x22e   : > { %1326 = vst [vmem:[%s222_s15] sm:$0xf] %v1325_v17 }
 0x22f PF: > { %s15_s18 = sadd.s32 1, %s1931_s18  }
 0x230   : > { %p12_p4 = scmp.ge.s32.totalorder %s15_s18, 4  }
 0x232   :  { %14 = sbr.rel (!%p12_p4) target bundleno = 1 (0x1), region = 70 }

// kernel: era5_encode.8
= control target key start
LH: loop header
LB: loop body
LE: loop exit
PB: predicated region body
PF: predicated region fallthrough
CT: control target
= control target key end

     0   :  { %s1599_s18 = smov 0   ;;  %s1880_s0 = inlined_call_operand.vmem [shape: bf16[16,1280], index: 0, kind: input, shape index: {}]   ;;  %s1881_s1 = inlined_call_operand.vmem [shape: bf16[1280,128], index: 1, kind: input, shape index: {}]   ;;  %s1882_s2 = inlined_call_operand.vmem [shape: f32[1,128], index: 2, kind: input, shape index: {}]   ;;  %s1883_s3 = inlined_call_operand.vmem [shape: f32[1,128], index: 3, kind: input, shape index: {}]   ;;  %s1884_s4 = inlined_call_operand.vmem [shape: f32[1,128], index: 4, kind: input, shape index: {}]   ;;  %s1885_s5 = inlined_call_operand.vmem [shape: bf16[16,128], index: 5, kind: output, shape index: {}]  }
   0x1 LB: > { %s1136_s19 = sadd.s32 4294967295, %s1567_s18   ;;  %p1140_p0 = scmp.ge.s32.totalorder %s1567_s18, 1  ;;  %s1567_s18 = sphi %s1599_s18, %s15_s18  }
   0x2   : > { %p187_p1 = scmp.lt.s32.totalorder %s1567_s18, 3 }
   0x4   : > { %p188_p2 = pnand %p1140_p0, %p187_p1 }
   0x5   : > { %p214_p3 = scmp.lt.s32.totalorder (!%p188_p2), %s1136_s19, 1 }
   0x6   : > { %191 = sbr.rel (%p188_p2) target bundleno = 529 (0x211), region = 40 }
   0xb   : > { %v1472_v0 = vld [vmem:[%s1881_s1 + $0x38] sm:$0xff]  ;;  %v1471_v4 = vld [vmem:[%s1881_s1 + $0x30] sm:$0xff]  ;;  %v1470_v8 = vld [vmem:[%s1881_s1 + $0x28] sm:$0xff]  ;;  %s1887_s19 = smov (!%p214_p3, %s1136_s19), 1 }
   0xc   : > { %v1480_v1 = vld [vmem:[%s1881_s1 + $0x78] sm:$0xff]  ;;  %907 = vmatpush.bf16.msra.mxu0 %v1472_v0  ;;  %v1479_v5 = vld [vmem:[%s1881_s1 + $0x70] sm:$0xff]  ;;  %v1478_v9 = vld [vmem:[%s1881_s1 + $0x68] sm:$0xff]  ;;  %s1545_s20 = smul.u32 40, %s1887_s19  ;;  %s1142_s8 = sshll.u32 %s1887_s19, 2 }
   0xd   : > { %v1488_v2 = vld [vmem:[%s1881_s1 + $0xb8] sm:$0xff]  ;;  %920 = vmatpush.bf16.msra.mxu1 %v1480_v1  ;;  %v1487_v6 = vld [vmem:[%s1881_s1 + $0xb0] sm:$0xff]  ;;  %v1486_v10 = vld [vmem:[%s1881_s1 + $0xa8] sm:$0xff]  ;;  %s222_s11 = scalar_lea.vmem %s1885_s5, %s1142_s8 }
   0xe   : > { %v1496_v3 = vld [vmem:[%s1881_s1 + $0xf8] sm:$0xff]  ;;  %933 = vmatpush.bf16.msra.mxu2 %v1488_v2  ;;  %v1495_v7 = vld [vmem:[%s1881_s1 + $0xf0] sm:$0xff]  ;;  %v1494_v11 = vld [vmem:[%s1881_s1 + $0xe8] sm:$0xff]  ;;  %s1695_s29 = scalar_lea.vmem %s1880_s0, %s1545_s20 }
   0xf   : > { %946 = vmatpush.bf16.msra.mxu3 %v1496_v3  ;;  %v1469_v12 = vld [vmem:[%s1881_s1 + $0x20] sm:$0xff]  ;;  %v1468_v16 = vld [vmem:[%s1881_s1 + $0x18] sm:$0xff]  ;;  %v1467_v20 = vld [vmem:[%s1881_s1 + $0x10] sm:$0xff] }
  0x10   : > { %908 = vmatpush.bf16.msra.mxu0 %v1471_v4  ;;  %v1477_v13 = vld [vmem:[%s1881_s1 + $0x60] sm:$0xff]  ;;  %v1476_v17 = vld [vmem:[%s1881_s1 + $0x58] sm:$0xff]  ;;  %v1475_v21 = vld [vmem:[%s1881_s1 + $0x50] sm:$0xff] }
  0x11   : > { %921 = vmatpush.bf16.msra.mxu1 %v1479_v5  ;;  %v1485_v14 = vld [vmem:[%s1881_s1 + $0xa0] sm:$0xff]  ;;  %v1484_v18 = vld [vmem:[%s1881_s1 + $0x98] sm:$0xff]  ;;  %v1483_v22 = vld [vmem:[%s1881_s1 + $0x90] sm:$0xff] }
  0x12   : > { %934 = vmatpush.bf16.msra.mxu2 %v1487_v6  ;;  %v1493_v15 = vld [vmem:[%s1881_s1 + $0xe0] sm:$0xff]  ;;  %v1492_v19 = vld [vmem:[%s1881_s1 + $0xd8] sm:$0xff]  ;;  %v1491_v23 = vld [vmem:[%s1881_s1 + $0xd0] sm:$0xff] }
  0x13   : > { %947 = vmatpush.bf16.msra.mxu3 %v1495_v7  ;;  %v1466_v24 = vld [vmem:[%s1881_s1 + $0x8] sm:$0xff]  ;;  %v223_v28 = vld [vmem:[%s1695_s29] sm:$0xff]  ;;  %v1504_v34 = vld [vmem:[%s1881_s1 + $0x138] sm:$0xff] }
  0x14   : > { %909 = vmatpush.bf16.msra.mxu0 %v1470_v8  ;;  %v1474_v25 = vld [vmem:[%s1881_s1 + $0x48] sm:$0xff]  ;;  %v1465_v30 = vld [vmem:[%s1881_s1] sm:$0xff]  ;;  %v397_v32 = vunpack.c.l.b16 %v223_v28  ;;  %v398_v33 = vunpack.c.h.b16 %v223_v28  ;;  %v1512_v35 = vld [vmem:[%s1881_s1 + $0x178] sm:$0xff] }
  0x15   : > { %922 = vmatpush.bf16.msra.mxu1 %v1478_v9  ;;  %v1482_v26 = vld [vmem:[%s1881_s1 + $0x88] sm:$0xff]  ;;  %v1473_v31 = vld [vmem:[%s1881_s1 + $0x40] sm:$0xff]  ;;  %v1520_v40 = vld [vmem:[%s1881_s1 + $0x1b8] sm:$0xff] }
  0x16   : > { %935 = vmatpush.bf16.msra.mxu2 %v1486_v10  ;;  %v1490_v27 = vld [vmem:[%s1881_s1 + $0xc8] sm:$0xff]  ;;  %v1481_v36 = vld [vmem:[%s1881_s1 + $0x80] sm:$0xff]  ;;  %v1528_v41 = vld [vmem:[%s1881_s1 + $0x1f8] sm:$0xff]  ;;  %v407_v42 = vpack.c.b16 %v397_v32, %v397_v32  ;;  %v408_v43 = vpack.c.b16 %v398_v33, %v398_v33 }
  0x17   : > { %948 = vmatpush.bf16.msra.mxu3 %v1494_v11  ;;  %v224_v29 = vld [vmem:[%s1695_s29 + $0x8] sm:$0xff]  ;;  %v1489_v37 = vld [vmem:[%s1881_s1 + $0xc0] sm:$0xff]  ;;  %v1503_v44 = vld [vmem:[%s1881_s1 + $0x130] sm:$0xff] }
  0x18   : > { %910 = vmatpush.bf16.msra.mxu0 %v1469_v12  ;;  %v399_v38 = vunpack.c.l.b16 %v224_v29  ;;  %v400_v39 = vunpack.c.h.b16 %v224_v29  ;;  %v1511_v45 = vld [vmem:[%s1881_s1 + $0x170] sm:$0xff]  ;;  %v1502_v50 = vld [vmem:[%s1881_s1 + $0x128] sm:$0xff]  ;;  %v1501_v54 = vld [vmem:[%s1881_s1 + $0x120] sm:$0xff] }
  0x19   : > { %923 = vmatpush.bf16.msra.mxu1 %v1477_v13  ;;  %v1519_v48 = vld [vmem:[%s1881_s1 + $0x1b0] sm:$0xff]  ;;  %v1510_v51 = vld [vmem:[%s1881_s1 + $0x168] sm:$0xff]  ;;  %v1509_v55 = vld [vmem:[%s1881_s1 + $0x160] sm:$0xff] }
  0x1a   : > { %936 = vmatpush.bf16.msra.mxu2 %v1485_v14  ;;  %v409_v46 = vpack.c.b16 %v399_v38, %v399_v38  ;;  %v410_v47 = vpack.c.b16 %v400_v39, %v400_v39  ;;  %v1527_v49 = vld [vmem:[%s1881_s1 + $0x1f0] sm:$0xff]  ;;  %v1518_v52 = vld [vmem:[%s1881_s1 + $0x1a8] sm:$0xff]  ;;  %v1517_v56 = vld [vmem:[%s1881_s1 + $0x1a0] sm:$0xff] }
  0x1b   : > { %949 = vmatpush.bf16.msra.mxu3 %v1493_v15  ;;  %v1526_v53 = vld [vmem:[%s1881_s1 + $0x1e8] sm:$0xff]  ;;  %v1525_v57 = vld [vmem:[%s1881_s1 + $0x1e0] sm:$0xff]  ;;  %v1500_v58 = vld [vmem:[%s1881_s1 + $0x118] sm:$0xff] }
  0x1c   : > { %911 = vmatpush.bf16.msra.mxu0 %v1468_v16  ;;  %v1508_v59 = vld [vmem:[%s1881_s1 + $0x158] sm:$0xff]  ;;  %v1499_v62 = vld [vmem:[%s1881_s1 + $0x110] sm:$0xff]  ;;  %v1498_v2 = vld [vmem:[%s1881_s1 + $0x108] sm:$0xff] }
  0x1d   : > { %924 = vmatpush.bf16.msra.mxu1 %v1476_v17  ;;  %v1516_v60 = vld [vmem:[%s1881_s1 + $0x198] sm:$0xff]  ;;  %v1507_v63 = vld [vmem:[%s1881_s1 + $0x150] sm:$0xff]  ;;  %v1506_v3 = vld [vmem:[%s1881_s1 + $0x148] sm:$0xff] }
  0x1e   : > { %937 = vmatpush.bf16.msra.mxu2 %v1484_v18  ;;  %v1524_v61 = vld [vmem:[%s1881_s1 + $0x1d8] sm:$0xff]  ;;  %v1515_v0 = vld [vmem:[%s1881_s1 + $0x190] sm:$0xff]  ;;  %v1514_v5 = vld [vmem:[%s1881_s1 + $0x188] sm:$0xff] }
  0x1f   : > { %950 = vmatpush.bf16.msra.mxu3 %v1492_v19  ;;  %v1523_v1 = vld [vmem:[%s1881_s1 + $0x1d0] sm:$0xff]  ;;  %v1522_v6 = vld [vmem:[%s1881_s1 + $0x1c8] sm:$0xff]  ;;  %v226_v7 = vld [vmem:[%s1695_s29 + $0x18] sm:$0xff] }
  0x20   : > { %912 = vmatpush.bf16.msra.mxu0 %v1467_v20  ;;  %v225_v4 = vld [vmem:[%s1695_s29 + $0x10] sm:$0xff]  ;;  %v1497_v10 = vld [vmem:[%s1881_s1 + $0x100] sm:$0xff]  ;;  %v1536_v12 = vld [vmem:[%s1881_s1 + $0x238] sm:$0xff]  ;;  %v403_v16 = vunpack.c.l.b16 %v226_v7  ;;  %v404_v17 = vunpack.c.h.b16 %v226_v7 }
  0x21   : > { %925 = vmatpush.bf16.msra.mxu1 %v1475_v21  ;;  %v401_v8 = vunpack.c.l.b16 %v225_v4  ;;  %v402_v9 = vunpack.c.h.b16 %v225_v4  ;;  %v1505_v11 = vld [vmem:[%s1881_s1 + $0x140] sm:$0xff]  ;;  %v1544_v13 = vld [vmem:[%s1881_s1 + $0x278] sm:$0xff]  ;;  %v1535_v20 = vld [vmem:[%s1881_s1 + $0x230] sm:$0xff] }
  0x22   : > { %938 = vmatpush.bf16.msra.mxu2 %v1483_v22  ;;  %v1513_v14 = vld [vmem:[%s1881_s1 + $0x180] sm:$0xff]  ;;  %v1543_v21 = vld [vmem:[%s1881_s1 + $0x270] sm:$0xff]  ;;  %v413_v22 = vpack.c.b16 %v403_v16, %v403_v16  ;;  %v1532_v28 = vld [vmem:[%s1881_s1 + $0x218] sm:$0xff] }
  0x23   : > { %951 = vmatpush.bf16.msra.mxu3 %v1491_v23  ;;  %v1521_v15 = vld [vmem:[%s1881_s1 + $0x1c0] sm:$0xff]  ;;  %v411_v18 = vpack.c.b16 %v401_v8, %v401_v8  ;;  %v412_v19 = vpack.c.b16 %v402_v9, %v402_v9  ;;  %v414_v23 = vpack.c.b16 %v404_v17, %v404_v17  ;;  %v1540_v29 = vld [vmem:[%s1881_s1 + $0x258] sm:$0xff]  ;;  %v1530_v32 = vld [vmem:[%s1881_s1 + $0x208] sm:$0xff] }
  0x24   : > { %913 = vmatpush.bf16.msra.mxu0 %v1466_v24  ;;  %v1534_v24 = vld [vmem:[%s1881_s1 + $0x228] sm:$0xff]  ;;  %v1537_v38 = vld [vmem:[%s1881_s1 + $0x240] sm:$0xff] }
  0x25   : > { %926 = vmatpush.bf16.msra.mxu1 %v1474_v25  ;;  %v1542_v25 = vld [vmem:[%s1881_s1 + $0x268] sm:$0xff] }
  0x26   : > { %939 = vmatpush.bf16.msra.mxu2 %v1482_v26  ;;  %v1533_v26 = vld [vmem:[%s1881_s1 + $0x220] sm:$0xff]  ;;  %v1538_v33 = vld [vmem:[%s1881_s1 + $0x248] sm:$0xff] }
  0x27   : > { %952 = vmatpush.bf16.msra.mxu3 %v1490_v27  ;;  %v1541_v27 = vld [vmem:[%s1881_s1 + $0x260] sm:$0xff] }
  0x28   : > { %914 = vmatpush.bf16.msra.mxu0 %v1465_v30  ;;  %v1531_v30 = vld [vmem:[%s1881_s1 + $0x210] sm:$0xff] }
  0x29   : > { %927 = vmatpush.bf16.msra.mxu1 %v1473_v31  ;;  %v1539_v31 = vld [vmem:[%s1881_s1 + $0x250] sm:$0xff] }
  0x2a   : > { %940 = vmatpush.bf16.msra.mxu2 %v1481_v36 }
  0x2b   : > { %953 = vmatpush.bf16.msra.mxu3 %v1489_v37  ;;  %915 = vmatmul.bf16.vlgmr.msra.gmra.mxu0 %v407_v42  ;;  %v1529_v37 = vld [vmem:[%s1881_s1 + $0x200] sm:$0xff] }
  0x2c   : > { %959 = vmatpush.bf16.msrb.mxu0 %v1504_v34  ;;  %928 = vmatmul.bf16.vlgmr.msra.gmra.mxu1 %v408_v43  ;;  %v227_v34 = vld [vmem:[%s1695_s29 + $0x20] sm:$0xff] }
  0x2d   : > { %972 = vmatpush.bf16.msrb.mxu1 %v1512_v35  ;;  %941 = vmatmul.bf16.vlgmr.msra.gmra.mxu2 %v409_v46  ;;  %v405_v35 = vunpack.c.l.b16 %v227_v34  ;;  %v406_v36 = vunpack.c.h.b16 %v227_v34 }
  0x2e   : > { %985 = vmatpush.bf16.msrb.mxu2 %v1520_v40  ;;  %954 = vmatmul.bf16.vlgmr.msra.gmra.mxu3 %v410_v47 }
  0x2f   : > { %998 = vmatpush.bf16.msrb.mxu3 %v1528_v41  ;;  %v415_v39 = vpack.c.b16 %v405_v35, %v405_v35  ;;  %v416_v40 = vpack.c.b16 %v406_v36, %v406_v36 }
  0x30   : > { %960 = vmatpush.bf16.msrb.mxu0 %v1503_v44 }
  0x31   : > { %973 = vmatpush.bf16.msrb.mxu1 %v1511_v45 }
  0x32   : > { %986 = vmatpush.bf16.msrb.mxu2 %v1519_v48 }
  0x33   : > { %999 = vmatpush.bf16.msrb.mxu3 %v1527_v49  ;;  %v1554_v49 = vld [vmem:[%s1882_s2] ss:$0 sm:$0xff] }
  0x34   : > { %961 = vmatpush.bf16.msrb.mxu0 %v1502_v50 }
  0x35   : > { %974 = vmatpush.bf16.msrb.mxu1 %v1510_v51 }
  0x36   : > { %987 = vmatpush.bf16.msrb.mxu2 %v1518_v52 }
  0x37   : > { %1000 = vmatpush.bf16.msrb.mxu3 %v1526_v53 }
  0x38   : > { %962 = vmatpush.bf16.msrb.mxu0 %v1501_v54 }
  0x39   : > { %975 = vmatpush.bf16.msrb.mxu1 %v1509_v55 }
  0x3a   : > { %988 = vmatpush.bf16.msrb.mxu2 %v1517_v56 }
  0x3b   : > { %1001 = vmatpush.bf16.msrb.mxu3 %v1525_v57 }
  0x3c   : > { %963 = vmatpush.bf16.msrb.mxu0 %v1500_v58 }
  0x3d   : > { %976 = vmatpush.bf16.msrb.mxu1 %v1508_v59 }
  0x3e   : > { %989 = vmatpush.bf16.msrb.mxu2 %v1516_v60 }
  0x3f   : > { %1002 = vmatpush.bf16.msrb.mxu3 %v1524_v61 }
  0x40   : > { %964 = vmatpush.bf16.msrb.mxu0 %v1499_v62 }
  0x41   : > { %977 = vmatpush.bf16.msrb.mxu1 %v1507_v63 }
  0x42   : > { %990 = vmatpush.bf16.msrb.mxu2 %v1515_v0  ;;  %v1039_v0 = vlaneseq }
  0x43   : > { %1003 = vmatpush.bf16.msrb.mxu3 %v1523_v1 }
  0x44   : > { %965 = vmatpush.bf16.msrb.mxu0 %v1498_v2  ;;  %v1040_v2 = vand.u32 127, %v1039_v0 }
  0x45   : > { %978 = vmatpush.bf16.msrb.mxu1 %v1506_v3 }
  0x46   : > { %991 = vmatpush.bf16.msrb.mxu2 %v1514_v5  ;;  %vm1041_vm0 = vcmp.lt.s32.totalorder %v1040_v2, 16 }
  0x47   : > { %1004 = vmatpush.bf16.msrb.mxu3 %v1522_v6 }
  0x48   : > { %966 = vmatpush.bf16.msrb.mxu0 %v1497_v10 }
  0x49   : > { %979 = vmatpush.bf16.msrb.mxu1 %v1505_v11 }
  0x4a   : > { %992 = vmatpush.bf16.msrb.mxu2 %v1513_v14 }
  0x4b   : > { %1005 = vmatpush.bf16.msrb.mxu3 %v1521_v15  ;;  %967 = vmatmul.bf16.vlgmr.msrb.gmra.mxu0 %v411_v18 }
  0x4c   : > { %1011 = vmatpush.bf16.msra.mxu0 %v1536_v12  ;;  %980 = vmatmul.bf16.vlgmr.msrb.gmra.mxu1 %v412_v19 }
  0x4d   : > { %1024 = vmatpush.bf16.msra.mxu1 %v1544_v13  ;;  %993 = vmatmul.bf16.vlgmr.msrb.gmra.mxu2 %v413_v22 }
  0x4e   : > { %1006 = vmatmul.bf16.vlgmr.msrb.gmra.mxu3 %v414_v23 }
  0x50   : > { %1012 = vmatpush.bf16.msra.mxu0 %v1535_v20 }
  0x51   : > { %1025 = vmatpush.bf16.msra.mxu1 %v1543_v21 }
  0x54   : > { %1013 = vmatpush.bf16.msra.mxu0 %v1534_v24 }
  0x55   : > { %1026 = vmatpush.bf16.msra.mxu1 %v1542_v25  ;;  %v1555_v25 = vld [vmem:[%s1883_s3] ss:$0 sm:$0xff] }
  0x58   : > { %1014 = vmatpush.bf16.msra.mxu0 %v1533_v26 }
  0x59   : > { %1027 = vmatpush.bf16.msra.mxu1 %v1541_v27  ;;  %v1556_v27 = vld [vmem:[%s1884_s4] ss:$0 sm:$0xff] }
  0x5c   : > { %1015 = vmatpush.bf16.msra.mxu0 %v1532_v28 }
  0x5d   : > { %1028 = vmatpush.bf16.msra.mxu1 %v1540_v29 }
  0x60   : > { %1016 = vmatpush.bf16.msra.mxu0 %v1531_v30 }
  0x61   : > { %1029 = vmatpush.bf16.msra.mxu1 %v1539_v31 }
  0x64   : > { %1017 = vmatpush.bf16.msra.mxu0 %v1530_v32 }
  0x65   : > { %1030 = vmatpush.bf16.msra.mxu1 %v1538_v33 }
  0x68   : > { %1018 = vmatpush.bf16.msra.mxu0 %v1529_v37 }
  0x69   : > { %1031 = vmatpush.bf16.msra.mxu1 %v1537_v38 }
  0x6b   : > { %1019 = vmatmul.bf16.vlgmr.msra.gmra.mxu0 %v415_v39 }
  0x6c   : > { %1032 = vmatmul.bf16.vlgmr.msra.gmra.mxu1 %v416_v40 }
  0xa8   : > { %v916_v41 = vpop.f32.mrf.mxu0 }
  0xa9   : > { %v929_v42 = vpop.f32.mrf.mxu1  ;;  %v917_v50 = vadd.f32 %v1554_v49, %v916_v41 }
  0xab   : > { %v930_v53 = vadd.f32 %v929_v42, %v917_v50 }
  0xb0   : > { %v942_v43 = vpop.f32.mrf.mxu2  ;;  %v918_v45 = vpop.f32.mrf.mxu0 }
  0xb1   : > { %v955_v44 = vpop.f32.mrf.mxu3  ;;  %v931_v46 = vpop.f32.mrf.mxu1  ;;  %v943_v54 = vadd.f32 %v942_v43, %v930_v53 }
  0xb3   : > { %v956_v59 = vadd.f32 %v955_v44, %v943_v54 }
  0xb8   : > { %v944_v47 = vpop.f32.mrf.mxu2 }
  0xb9   : > { %v957_v48 = vpop.f32.mrf.mxu3 }
  0xc8   : > { %v968_v51 = vpop.f32.mrf.mxu0 }
  0xc9   : > { %v981_v52 = vpop.f32.mrf.mxu1  ;;  %v969_v60 = vadd.f32 %v968_v51, %v956_v59 }
  0xcb   : > { %v982_v63 = vadd.f32 %v981_v52, %v969_v60 }
  0xd0   : > { %v970_v55 = vpop.f32.mrf.mxu0  ;;  %v994_v57 = vpop.f32.mrf.mxu2 }
  0xd1   : > { %v983_v56 = vpop.f32.mrf.mxu1  ;;  %v1007_v58 = vpop.f32.mrf.mxu3  ;;  %v995_v1 = vadd.f32 %v994_v57, %v982_v63 }
  0xd3   : > { %v1008_v3 = vadd.f32 %v1007_v58, %v995_v1 }
  0xd8   : > { %v996_v61 = vpop.f32.mrf.mxu2 }
  0xd9   : > { %v1009_v62 = vpop.f32.mrf.mxu3 }
  0xe8   : > { %v1020_v4 = vpop.f32.mrf.mxu0 }
  0xe9   : > { %v1033_v5 = vpop.f32.mrf.mxu1  ;;  %v1021_v6 = vadd.f32 %v1020_v4, %v1008_v3 }
  0xeb   : > { %v1034_v7 = vadd.f32 %v1033_v5, %v1021_v6 }
  0xed   : > { %v1042_v8 = vsel %vm1041_vm0, %v1034_v7, 0.0 }
  0xee   : > { %1043 = vadd.xlane.f32.xlu0 %v1042_v8 }
  0xf0   : > { %v1022_v9 = vpop.f32.mrf.mxu0 }
  0xf1   : > { %v1035_v10 = vpop.f32.mrf.mxu1 }
 0x161   : > { %v1044_v11 = vpop.xlane.xlu0 %1043 }
 0x162   : > { %v1045_v12 = vmul.f32 0.0625, %v1044_v11 }
 0x164   : > { %v1046_v13 = vsub.f32 %v1034_v7, %v1045_v12 }
 0x166   : > { %v1047_v14 = vsel %vm1041_vm0, %v1046_v13, 0.0 }
 0x167   : > { %v1048_v15 = vmul.f32 %v1047_v14, %v1047_v14 }
 0x169   : > { %1049 = vadd.xlane.f32.xlu0 %v1048_v15 }
 0x1dc   : > { %v1050_v16 = vpop.xlane.xlu0 %1049 }
 0x1dd   : > { %v1051_v17 = vmul.f32 0.0625, %v1050_v16 }
 0x1df   : > { %v1052_v18 = vadd.f32 1e-05, %v1051_v17 }
 0x1e1   : > { %1557 = vrsqrt.f32 %v1052_v18  ;;  %vm1059_vm2 = vweird.f32 %v1052_v18 }
 0x1e7   : > { %v1558_v19 = vpop.eup %1557 }
 0x1e8   : > { %v1054_v20 = vmul.f32 %v1558_v19, %v1052_v18  ;;  %vm1060_vm1 = vweird.f32 %v1558_v19 }
 0x1e9   : > { %vm1061_vm3 = vmor %vm1059_vm2, %vm1060_vm1 }
 0x1ea   : > { %v1055_v21 = vmul.f32 %v1558_v19, %v1054_v20 }
 0x1ec   : > { %v1056_v22 = vmul.f32 0.5, %v1055_v21 }
 0x1ee   : > { %v1057_v23 = vsub.f32 1.5, %v1056_v22 }
 0x1f0   : > { %v1058_v24 = vmul.f32 %v1558_v19, %v1057_v23 }
 0x1f2   : > { %v1062_v26 = vsel %vm1061_vm3, %v1558_v19, %v1058_v24 }
 0x1f3   : > { %v1063_v28 = vmul.f32 %v1062_v26, %v1046_v13 }
 0x1f5   : > { %v1067_v29 = vmul.f32 %v1555_v25, %v1063_v28 }
 0x1f7   : > { %v1071_v30 = vadd.f32 %v1556_v27, %v1067_v29 }
 0x1f9   : > { %v1073_v31 = vmul.f32 %v1071_v30, %v1071_v30  ;;  %v1072_v37 = vmul.f32 0.5, %v1071_v30 }
 0x1fb   : > { %v1074_v32 = vmul.f32 %v1073_v31, %v1071_v30 }
 0x1fd   : > { %v1075_v33 = vmul.f32 0.044715, %v1074_v32 }
 0x1ff   : > { %v1076_v34 = vadd.f32 %v1075_v33, %v1071_v30 }
 0x201   : > { %v1077_v35 = vmul.f32 0.7978846, %v1076_v34 }
 0x203   : > { %1559 = vtanh.f32 %v1077_v35 }
 0x209   : > { %v1560_v36 = vpop.eup %1559 }
 0x20a   : > { %v1079_v38 = vadd.f32 1.0, %v1560_v36 }
 0x20c   : > { %v1080_v39 = vmul.f32 %v1079_v38, %v1072_v37 }
 0x20e   : > { %v1081_v40 = vpack.c.bf16 %v1080_v39, %v1080_v39 }
 0x210   : > { %1082 = vst [vmem:[%s222_s11] sm:$0xf] %v1081_v40 }
 0x211 PF: > { %s15_s18 = sadd.s32 1, %s1567_s18  }
 0x212   : > { %p12_p4 = scmp.ge.s32.totalorder %s15_s18, 4  }
 0x214   :  { %14 = sbr.rel (!%p12_p4) target bundleno = 1 (0x1), region = 70 }

// kernel: era5_encode.9
= control target key start
LH: loop header
LB: loop body
LE: loop exit
PB: predicated region body
PF: predicated region fallthrough
CT: control target
= control target key end

     0   :  { %s1963_s18 = smov 0   ;;  %s2318_s0 = inlined_call_operand.vmem [shape: bf16[16,1664], index: 0, kind: input, shape index: {}]   ;;  %s2319_s1 = inlined_call_operand.vmem [shape: bf16[1664,128], index: 1, kind: input, shape index: {}]   ;;  %s2320_s2 = inlined_call_operand.vmem [shape: f32[1,128], index: 2, kind: input, shape index: {}]   ;;  %s2321_s3 = inlined_call_operand.vmem [shape: f32[1,128], index: 3, kind: input, shape index: {}]   ;;  %s2322_s4 = inlined_call_operand.vmem [shape: f32[1,128], index: 4, kind: input, shape index: {}]   ;;  %s2323_s5 = inlined_call_operand.vmem [shape: bf16[16,128], index: 5, kind: output, shape index: {}]  }
   0x1 LB: > { %s1380_s19 = sadd.s32 4294967295, %s1931_s18   ;;  %p1384_p0 = scmp.ge.s32.totalorder %s1931_s18, 1  ;;  %s1931_s18 = sphi %s1963_s18, %s15_s18  }
   0x2   : > { %p187_p1 = scmp.lt.s32.totalorder %s1931_s18, 3 }
   0x4   : > { %p188_p2 = pnand %p1384_p0, %p187_p1 }
   0x5   : > { %p214_p3 = scmp.lt.s32.totalorder (!%p188_p2), %s1380_s19, 1 }
   0x6   : > { %191 = sbr.rel (%p188_p2) target bundleno = 559 (0x22f), region = 40 }
   0xb   : > { %v1812_v0 = vld [vmem:[%s2319_s1 + $0x38] sm:$0xff]  ;;  %v1811_v4 = vld [vmem:[%s2319_s1 + $0x30] sm:$0xff]  ;;  %v1810_v8 = vld [vmem:[%s2319_s1 + $0x28] sm:$0xff]  ;;  %s2325_s19 = smov (!%p214_p3, %s1380_s19), 1 }
   0xc   : > { %v1828_v1 = vld [vmem:[%s2319_s1 + $0xb8] sm:$0xff]  ;;  %1112 = vmatpush.bf16.msra.mxu0 %v1812_v0  ;;  %v1827_v5 = vld [vmem:[%s2319_s1 + $0xb0] sm:$0xff]  ;;  %v1826_v9 = vld [vmem:[%s2319_s1 + $0xa8] sm:$0xff]  ;;  %s1909_s12 = smul.u32 52, %s2325_s19 }
   0xd   : > { %v1820_v2 = vld [vmem:[%s2319_s1 + $0x78] sm:$0xff]  ;;  %1138 = vmatpush.bf16.msra.mxu2 %v1828_v1  ;;  %v1819_v6 = vld [vmem:[%s2319_s1 + $0x70] sm:$0xff]  ;;  %v1818_v10 = vld [vmem:[%s2319_s1 + $0x68] sm:$0xff] }
   0xe   : > { %v1836_v3 = vld [vmem:[%s2319_s1 + $0xf8] sm:$0xff]  ;;  %1125 = vmatpush.bf16.msra.mxu1 %v1820_v2  ;;  %v1835_v7 = vld [vmem:[%s2319_s1 + $0xf0] sm:$0xff]  ;;  %v1834_v11 = vld [vmem:[%s2319_s1 + $0xe8] sm:$0xff]  ;;  %s2053_s25 = scalar_lea.vmem %s2318_s0, %s1909_s12  ;;  %s1386_s12 = sshll.u32 %s2325_s19, 2 }
   0xf   : > { %1151 = vmatpush.bf16.msra.mxu3 %v1836_v3  ;;  %v1809_v12 = vld [vmem:[%s2319_s1 + $0x20] sm:$0xff]  ;;  %v1808_v16 = vld [vmem:[%s2319_s1 + $0x18] sm:$0xff]  ;;  %v1807_v20 = vld [vmem:[%s2319_s1 + $0x10] sm:$0xff]  ;;  %s222_s15 = scalar_lea.vmem %s2323_s5, %s1386_s12 }
  0x10   : > { %1113 = vmatpush.bf16.msra.mxu0 %v1811_v4  ;;  %v1825_v13 = vld [vmem:[%s2319_s1 + $0xa0] sm:$0xff]  ;;  %v1824_v17 = vld [vmem:[%s2319_s1 + $0x98] sm:$0xff]  ;;  %v1823_v21 = vld [vmem:[%s2319_s1 + $0x90] sm:$0xff] }
  0x11   : > { %1139 = vmatpush.bf16.msra.mxu2 %v1827_v5  ;;  %v1817_v14 = vld [vmem:[%s2319_s1 + $0x60] sm:$0xff]  ;;  %v1816_v18 = vld [vmem:[%s2319_s1 + $0x58] sm:$0xff]  ;;  %v1815_v22 = vld [vmem:[%s2319_s1 + $0x50] sm:$0xff] }
  0x12   : > { %1126 = vmatpush.bf16.msra.mxu1 %v1819_v6  ;;  %v1833_v15 = vld [vmem:[%s2319_s1 + $0xe0] sm:$0xff]  ;;  %v1832_v19 = vld [vmem:[%s2319_s1 + $0xd8] sm:$0xff]  ;;  %v1831_v23 = vld [vmem:[%s2319_s1 + $0xd0] sm:$0xff] }
  0x13   : > { %1152 = vmatpush.bf16.msra.mxu3 %v1835_v7  ;;  %v1806_v24 = vld [vmem:[%s2319_s1 + $0x8] sm:$0xff]  ;;  %v223_v29 = vld [vmem:[%s2053_s25] sm:$0xff]  ;;  %v1844_v34 = vld [vmem:[%s2319_s1 + $0x138] sm:$0xff] }
  0x14   : > { %1114 = vmatpush.bf16.msra.mxu0 %v1810_v8  ;;  %v1822_v25 = vld [vmem:[%s2319_s1 + $0x88] sm:$0xff]  ;;  %v1805_v30 = vld [vmem:[%s2319_s1] sm:$0xff]  ;;  %v449_v33 = vunpack.c.l.b16 %v223_v29  ;;  %v1860_v35 = vld [vmem:[%s2319_s1 + $0x1b8] sm:$0xff]  ;;  %v450_v39 = vunpack.c.h.b16 %v223_v29 }
  0x15   : > { %1140 = vmatpush.bf16.msra.mxu2 %v1826_v9  ;;  %v1814_v26 = vld [vmem:[%s2319_s1 + $0x48] sm:$0xff]  ;;  %v1821_v31 = vld [vmem:[%s2319_s1 + $0x80] sm:$0xff]  ;;  %v1852_v40 = vld [vmem:[%s2319_s1 + $0x178] sm:$0xff] }
  0x16   : > { %1127 = vmatpush.bf16.msra.mxu1 %v1818_v10  ;;  %v1830_v27 = vld [vmem:[%s2319_s1 + $0xc8] sm:$0xff]  ;;  %v1813_v36 = vld [vmem:[%s2319_s1 + $0x40] sm:$0xff]  ;;  %v1868_v41 = vld [vmem:[%s2319_s1 + $0x1f8] sm:$0xff]  ;;  %v462_v43 = vpack.c.b16 %v449_v33, %v449_v33  ;;  %v463_v47 = vpack.c.b16 %v450_v39, %v450_v39 }
  0x17   : > { %1153 = vmatpush.bf16.msra.mxu3 %v1834_v11  ;;  %v224_v28 = vld [vmem:[%s2053_s25 + $0x8] sm:$0xff]  ;;  %v1829_v37 = vld [vmem:[%s2319_s1 + $0xc0] sm:$0xff]  ;;  %v1843_v44 = vld [vmem:[%s2319_s1 + $0x130] sm:$0xff] }
  0x18   : > { %1115 = vmatpush.bf16.msra.mxu0 %v1809_v12  ;;  %v451_v32 = vunpack.c.l.b16 %v224_v28  ;;  %v452_v38 = vunpack.c.h.b16 %v224_v28  ;;  %v1859_v45 = vld [vmem:[%s2319_s1 + $0x1b0] sm:$0xff]  ;;  %v1842_v50 = vld [vmem:[%s2319_s1 + $0x128] sm:$0xff]  ;;  %v1841_v54 = vld [vmem:[%s2319_s1 + $0x120] sm:$0xff] }
  0x19   : > { %1141 = vmatpush.bf16.msra.mxu2 %v1825_v13  ;;  %v1851_v48 = vld [vmem:[%s2319_s1 + $0x170] sm:$0xff]  ;;  %v1858_v51 = vld [vmem:[%s2319_s1 + $0x1a8] sm:$0xff]  ;;  %v1857_v55 = vld [vmem:[%s2319_s1 + $0x1a0] sm:$0xff] }
  0x1a   : > { %1128 = vmatpush.bf16.msra.mxu1 %v1817_v14  ;;  %v464_v42 = vpack.c.b16 %v451_v32, %v451_v32  ;;  %v465_v46 = vpack.c.b16 %v452_v38, %v452_v38  ;;  %v1867_v49 = vld [vmem:[%s2319_s1 + $0x1f0] sm:$0xff]  ;;  %v1850_v52 = vld [vmem:[%s2319_s1 + $0x168] sm:$0xff]  ;;  %v1849_v56 = vld [vmem:[%s2319_s1 + $0x160] sm:$0xff] }
  0x1b   : > { %1154 = vmatpush.bf16.msra.mxu3 %v1833_v15  ;;  %v1866_v53 = vld [vmem:[%s2319_s1 + $0x1e8] sm:$0xff]  ;;  %v1865_v57 = vld [vmem:[%s2319_s1 + $0x1e0] sm:$0xff]  ;;  %v1840_v58 = vld [vmem:[%s2319_s1 + $0x118] sm:$0xff] }
  0x1c   : > { %1116 = vmatpush.bf16.msra.mxu0 %v1808_v16  ;;  %v1856_v59 = vld [vmem:[%s2319_s1 + $0x198] sm:$0xff]  ;;  %v1839_v62 = vld [vmem:[%s2319_s1 + $0x110] sm:$0xff]  ;;  %v1838_v2 = vld [vmem:[%s2319_s1 + $0x108] sm:$0xff] }
  0x1d   : > { %1142 = vmatpush.bf16.msra.mxu2 %v1824_v17  ;;  %v1848_v60 = vld [vmem:[%s2319_s1 + $0x158] sm:$0xff]  ;;  %v1855_v63 = vld [vmem:[%s2319_s1 + $0x190] sm:$0xff]  ;;  %v1854_v3 = vld [vmem:[%s2319_s1 + $0x188] sm:$0xff] }
  0x1e   : > { %1129 = vmatpush.bf16.msra.mxu1 %v1816_v18  ;;  %v1864_v61 = vld [vmem:[%s2319_s1 + $0x1d8] sm:$0xff]  ;;  %v1847_v0 = vld [vmem:[%s2319_s1 + $0x150] sm:$0xff]  ;;  %v1846_v6 = vld [vmem:[%s2319_s1 + $0x148] sm:$0xff] }
  0x1f   : > { %1155 = vmatpush.bf16.msra.mxu3 %v1832_v19  ;;  %v1863_v1 = vld [vmem:[%s2319_s1 + $0x1d0] sm:$0xff]  ;;  %v226_v4 = vld [vmem:[%s2053_s25 + $0x18] sm:$0xff]  ;;  %v1862_v7 = vld [vmem:[%s2319_s1 + $0x1c8] sm:$0xff] }
  0x20   : > { %1117 = vmatpush.bf16.msra.mxu0 %v1807_v20  ;;  %v225_v5 = vld [vmem:[%s2053_s25 + $0x10] sm:$0xff]  ;;  %v1837_v8 = vld [vmem:[%s2319_s1 + $0x100] sm:$0xff]  ;;  %v455_v10 = vunpack.c.l.b16 %v226_v4  ;;  %v1876_v12 = vld [vmem:[%s2319_s1 + $0x238] sm:$0xff]  ;;  %v456_v16 = vunpack.c.h.b16 %v226_v4 }
  0x21   : > { %1143 = vmatpush.bf16.msra.mxu2 %v1823_v21  ;;  %v1853_v9 = vld [vmem:[%s2319_s1 + $0x180] sm:$0xff]  ;;  %v453_v11 = vunpack.c.l.b16 %v225_v5  ;;  %v1892_v13 = vld [vmem:[%s2319_s1 + $0x2b8] sm:$0xff]  ;;  %v454_v17 = vunpack.c.h.b16 %v225_v5  ;;  %v1874_v28 = vld [vmem:[%s2319_s1 + $0x228] sm:$0xff] }
  0x22   : > { %1130 = vmatpush.bf16.msra.mxu1 %v1815_v22  ;;  %v1845_v14 = vld [vmem:[%s2319_s1 + $0x140] sm:$0xff]  ;;  %v1884_v18 = vld [vmem:[%s2319_s1 + $0x278] sm:$0xff]  ;;  %v468_v20 = vpack.c.b16 %v455_v10, %v455_v10  ;;  %v1875_v22 = vld [vmem:[%s2319_s1 + $0x230] sm:$0xff] }
  0x23   : > { %1156 = vmatpush.bf16.msra.mxu3 %v1831_v23  ;;  %v1861_v15 = vld [vmem:[%s2319_s1 + $0x1c0] sm:$0xff]  ;;  %v1900_v19 = vld [vmem:[%s2319_s1 + $0x2f8] sm:$0xff]  ;;  %v466_v21 = vpack.c.b16 %v453_v11, %v453_v11  ;;  %v1891_v23 = vld [vmem:[%s2319_s1 + $0x2b0] sm:$0xff] }
  0x24   : > { %1118 = vmatpush.bf16.msra.mxu0 %v1806_v24  ;;  %v469_v24 = vpack.c.b16 %v456_v16, %v456_v16  ;;  %v1890_v29 = vld [vmem:[%s2319_s1 + $0x2a8] sm:$0xff]  ;;  %v1873_v32 = vld [vmem:[%s2319_s1 + $0x220] sm:$0xff]  ;;  %v1880_v38 = vld [vmem:[%s2319_s1 + $0x258] sm:$0xff] }
  0x25   : > { %1144 = vmatpush.bf16.msra.mxu2 %v1822_v25  ;;  %v467_v25 = vpack.c.b16 %v454_v17, %v454_v17  ;;  %v1889_v33 = vld [vmem:[%s2319_s1 + $0x2a0] sm:$0xff]  ;;  %v1896_v39 = vld [vmem:[%s2319_s1 + $0x2d8] sm:$0xff]  ;;  %v1902_v4 = vld [vmem:[%s2319_s1 + $0x308] sm:$0xff] }
  0x26   : > { %1131 = vmatpush.bf16.msra.mxu1 %v1814_v26  ;;  %v1883_v26 = vld [vmem:[%s2319_s1 + $0x270] sm:$0xff] }
  0x27   : > { %1157 = vmatpush.bf16.msra.mxu3 %v1830_v27  ;;  %v1899_v27 = vld [vmem:[%s2319_s1 + $0x2f0] sm:$0xff] }
  0x28   : > { %1119 = vmatpush.bf16.msra.mxu0 %v1805_v30  ;;  %v1882_v30 = vld [vmem:[%s2319_s1 + $0x268] sm:$0xff]  ;;  %v229_v5 = vld [vmem:[%s2053_s25 + $0x30] sm:$0xf] }
  0x29   : > { %1145 = vmatpush.bf16.msra.mxu2 %v1821_v31  ;;  %v1898_v31 = vld [vmem:[%s2319_s1 + $0x2e8] sm:$0xff] }
  0x2a   : > { %1132 = vmatpush.bf16.msra.mxu1 %v1813_v36  ;;  %v1872_v36 = vld [vmem:[%s2319_s1 + $0x218] sm:$0xff] }
  0x2b   : > { %1158 = vmatpush.bf16.msra.mxu3 %v1829_v37  ;;  %1120 = vmatmul.bf16.vlgmr.msra.gmra.mxu0 %v462_v43  ;;  %v1888_v37 = vld [vmem:[%s2319_s1 + $0x298] sm:$0xff]  ;;  %v1895_v43 = vld [vmem:[%s2319_s1 + $0x2d0] sm:$0xff] }
  0x2c   : > { %1164 = vmatpush.bf16.msrb.mxu0 %v1844_v34  ;;  %1146 = vmatmul.bf16.vlgmr.msra.gmra.mxu2 %v464_v42  ;;  %v1881_v34 = vld [vmem:[%s2319_s1 + $0x260] sm:$0xff]  ;;  %v1879_v42 = vld [vmem:[%s2319_s1 + $0x250] sm:$0xff] }
  0x2d   : > { %1190 = vmatpush.bf16.msrb.mxu2 %v1860_v35  ;;  %1133 = vmatmul.bf16.vlgmr.msra.gmra.mxu1 %v463_v47  ;;  %v1897_v35 = vld [vmem:[%s2319_s1 + $0x2e0] sm:$0xff]  ;;  %v228_v47 = vld [vmem:[%s2053_s25 + $0x28] sm:$0xff] }
  0x2e   : > { %1177 = vmatpush.bf16.msrb.mxu1 %v1852_v40  ;;  %1159 = vmatmul.bf16.vlgmr.msra.gmra.mxu3 %v465_v46  ;;  %v1871_v40 = vld [vmem:[%s2319_s1 + $0x210] sm:$0xff]  ;;  %v227_v46 = vld [vmem:[%s2053_s25 + $0x20] sm:$0xff] }
  0x2f   : > { %1203 = vmatpush.bf16.msrb.mxu3 %v1868_v41  ;;  %v1887_v41 = vld [vmem:[%s2319_s1 + $0x290] sm:$0xff] }
  0x30   : > { %1165 = vmatpush.bf16.msrb.mxu0 %v1843_v44  ;;  %v1870_v44 = vld [vmem:[%s2319_s1 + $0x208] sm:$0xff] }
  0x31   : > { %1191 = vmatpush.bf16.msrb.mxu2 %v1859_v45  ;;  %v1886_v45 = vld [vmem:[%s2319_s1 + $0x288] sm:$0xff] }
  0x32   : > { %1178 = vmatpush.bf16.msrb.mxu1 %v1851_v48  ;;  %v1878_v48 = vld [vmem:[%s2319_s1 + $0x248] sm:$0xff] }
  0x33   : > { %1204 = vmatpush.bf16.msrb.mxu3 %v1867_v49  ;;  %v1894_v49 = vld [vmem:[%s2319_s1 + $0x2c8] sm:$0xff] }
  0x34   : > { %1166 = vmatpush.bf16.msrb.mxu0 %v1842_v50  ;;  %v457_v50 = vunpack.c.l.b16 %v227_v46 }
  0x35   : > { %1192 = vmatpush.bf16.msrb.mxu2 %v1858_v51  ;;  %v459_v51 = vunpack.c.l.b16 %v228_v47 }
  0x36   : > { %1179 = vmatpush.bf16.msrb.mxu1 %v1850_v52  ;;  %v1869_v52 = vld [vmem:[%s2319_s1 + $0x200] sm:$0xff] }
  0x37   : > { %1205 = vmatpush.bf16.msrb.mxu3 %v1866_v53  ;;  %v1885_v53 = vld [vmem:[%s2319_s1 + $0x280] sm:$0xff] }
  0x38   : > { %1167 = vmatpush.bf16.msrb.mxu0 %v1841_v54  ;;  %v1908_v54 = vld [vmem:[%s2319_s1 + $0x338] sm:$0xff] }
  0x39   : > { %1193 = vmatpush.bf16.msrb.mxu2 %v1857_v55  ;;  %v458_v55 = vunpack.c.h.b16 %v227_v46 }
  0x3a   : > { %1180 = vmatpush.bf16.msrb.mxu1 %v1849_v56  ;;  %v460_v56 = vunpack.c.h.b16 %v228_v47 }
  0x3b   : > { %1206 = vmatpush.bf16.msrb.mxu3 %v1865_v57  ;;  %v1877_v57 = vld [vmem:[%s2319_s1 + $0x240] sm:$0xff] }
  0x3c   : > { %1168 = vmatpush.bf16.msrb.mxu0 %v1840_v58  ;;  %v1893_v58 = vld [vmem:[%s2319_s1 + $0x2c0] sm:$0xff] }
  0x3d   : > { %1194 = vmatpush.bf16.msrb.mxu2 %v1856_v59  ;;  %v470_v59 = vpack.c.b16 %v457_v50, %v457_v50 }
  0x3e   : > { %1181 = vmatpush.bf16.msrb.mxu1 %v1848_v60  ;;  %v472_v60 = vpack.c.b16 %v459_v51, %v459_v51 }
  0x3f   : > { %1207 = vmatpush.bf16.msrb.mxu3 %v1864_v61  ;;  %v471_v61 = vpack.c.b16 %v458_v55, %v458_v55 }
  0x40   : > { %1169 = vmatpush.bf16.msrb.mxu0 %v1839_v62  ;;  %v473_v62 = vpack.c.b16 %v460_v56, %v460_v56 }
  0x41   : > { %1195 = vmatpush.bf16.msrb.mxu2 %v1855_v63  ;;  %v1907_v63 = vld [vmem:[%s2319_s1 + $0x330] sm:$0xff] }
  0x42   : > { %1182 = vmatpush.bf16.msrb.mxu1 %v1847_v0  ;;  %v1906_v0 = vld [vmem:[%s2319_s1 + $0x328] sm:$0xff] }
  0x43   : > { %1208 = vmatpush.bf16.msrb.mxu3 %v1863_v1  ;;  %v1905_v1 = vld [vmem:[%s2319_s1 + $0x320] sm:$0xff] }
  0x44   : > { %1170 = vmatpush.bf16.msrb.mxu0 %v1838_v2  ;;  %v1904_v2 = vld [vmem:[%s2319_s1 + $0x318] sm:$0xff] }
  0x45   : > { %1196 = vmatpush.bf16.msrb.mxu2 %v1854_v3  ;;  %v1903_v3 = vld [vmem:[%s2319_s1 + $0x310] sm:$0xff] }
  0x46   : > { %1183 = vmatpush.bf16.msrb.mxu1 %v1846_v6  ;;  %v461_v6 = vunpack.c.l.b16 %v229_v5 }
  0x47   : > { %1209 = vmatpush.bf16.msrb.mxu3 %v1862_v7  ;;  %v1901_v7 = vld [vmem:[%s2319_s1 + $0x300] sm:$0xff] }
  0x48   : > { %1171 = vmatpush.bf16.msrb.mxu0 %v1837_v8  ;;  %v474_v8 = vpack.c.b16 %v461_v6, %v461_v6 }
  0x49   : > { %1197 = vmatpush.bf16.msrb.mxu2 %v1853_v9 }
  0x4a   : > { %1184 = vmatpush.bf16.msrb.mxu1 %v1845_v14 }
  0x4b   : > { %1210 = vmatpush.bf16.msrb.mxu3 %v1861_v15  ;;  %1172 = vmatmul.bf16.vlgmr.msrb.gmra.mxu0 %v466_v21 }
  0x4c   : > { %1216 = vmatpush.bf16.msra.mxu0 %v1876_v12  ;;  %1198 = vmatmul.bf16.vlgmr.msrb.gmra.mxu2 %v468_v20 }
  0x4d   : > { %1242 = vmatpush.bf16.msra.mxu2 %v1892_v13  ;;  %1185 = vmatmul.bf16.vlgmr.msrb.gmra.mxu1 %v467_v25 }
  0x4e   : > { %1229 = vmatpush.bf16.msra.mxu1 %v1884_v18  ;;  %1211 = vmatmul.bf16.vlgmr.msrb.gmra.mxu3 %v469_v24 }
  0x4f   : > { %1255 = vmatpush.bf16.msra.mxu3 %v1900_v19 }
  0x50   : > { %1217 = vmatpush.bf16.msra.mxu0 %v1875_v22 }
  0x51   : > { %1243 = vmatpush.bf16.msra.mxu2 %v1891_v23  ;;  %v1918_v23 = vld [vmem:[%s2320_s2] ss:$0 sm:$0xff] }
  0x52   : > { %1230 = vmatpush.bf16.msra.mxu1 %v1883_v26 }
  0x53   : > { %1256 = vmatpush.bf16.msra.mxu3 %v1899_v27 }
  0x54   : > { %1218 = vmatpush.bf16.msra.mxu0 %v1874_v28 }
  0x55   : > { %1244 = vmatpush.bf16.msra.mxu2 %v1890_v29 }
  0x56   : > { %1231 = vmatpush.bf16.msra.mxu1 %v1882_v30 }
  0x57   : > { %1257 = vmatpush.bf16.msra.mxu3 %v1898_v31 }
  0x58   : > { %1219 = vmatpush.bf16.msra.mxu0 %v1873_v32 }
  0x59   : > { %1245 = vmatpush.bf16.msra.mxu2 %v1889_v33 }
  0x5a   : > { %1232 = vmatpush.bf16.msra.mxu1 %v1881_v34 }
  0x5b   : > { %1258 = vmatpush.bf16.msra.mxu3 %v1897_v35 }
  0x5c   : > { %1220 = vmatpush.bf16.msra.mxu0 %v1872_v36 }
  0x5d   : > { %1246 = vmatpush.bf16.msra.mxu2 %v1888_v37 }
  0x5e   : > { %1233 = vmatpush.bf16.msra.mxu1 %v1880_v38 }
  0x5f   : > { %1259 = vmatpush.bf16.msra.mxu3 %v1896_v39 }
  0x60   : > { %1221 = vmatpush.bf16.msra.mxu0 %v1871_v40 }
  0x61   : > { %1247 = vmatpush.bf16.msra.mxu2 %v1887_v41 }
  0x62   : > { %1234 = vmatpush.bf16.msra.mxu1 %v1879_v42 }
  0x63   : > { %1260 = vmatpush.bf16.msra.mxu3 %v1895_v43  ;;  %v1283_v43 = vlaneseq }
  0x64   : > { %1222 = vmatpush.bf16.msra.mxu0 %v1870_v44 }
  0x65   : > { %1248 = vmatpush.bf16.msra.mxu2 %v1886_v45  ;;  %v1284_v46 = vand.u32 127, %v1283_v43 }
  0x66   : > { %1235 = vmatpush.bf16.msra.mxu1 %v1878_v48 }
  0x67   : > { %1261 = vmatpush.bf16.msra.mxu3 %v1894_v49  ;;  %vm1285_vm0 = vcmp.lt.s32.totalorder %v1284_v46, 32 }
  0x68   : > { %1223 = vmatpush.bf16.msra.mxu0 %v1869_v52 }
  0x69   : > { %1249 = vmatpush.bf16.msra.mxu2 %v1885_v53 }
  0x6a   : > { %1236 = vmatpush.bf16.msra.mxu1 %v1877_v57 }
  0x6b   : > { %1262 = vmatpush.bf16.msra.mxu3 %v1893_v58  ;;  %1224 = vmatmul.bf16.vlgmr.msra.gmra.mxu0 %v470_v59 }
  0x6c   : > { %1268 = vmatpush.bf16.msrb.mxu0 %v1908_v54  ;;  %1250 = vmatmul.bf16.vlgmr.msra.gmra.mxu2 %v472_v60 }
  0x6d   : > { %1237 = vmatmul.bf16.vlgmr.msra.gmra.mxu1 %v471_v61 }
  0x6e   : > { %1263 = vmatmul.bf16.vlgmr.msra.gmra.mxu3 %v473_v62 }
  0x70   : > { %1269 = vmatpush.bf16.msrb.mxu0 %v1907_v63 }
  0x74   : > { %1270 = vmatpush.bf16.msrb.mxu0 %v1906_v0 }
  0x78   : > { %1271 = vmatpush.bf16.msrb.mxu0 %v1905_v1 }
  0x7c   : > { %1272 = vmatpush.bf16.msrb.mxu0 %v1904_v2  ;;  %v1919_v2 = vld [vmem:[%s2321_s3] ss:$0 sm:$0xff] }
  0x80   : > { %1273 = vmatpush.bf16.msrb.mxu0 %v1903_v3 }
  0x84   : > { %1274 = vmatpush.bf16.msrb.mxu0 %v1902_v4  ;;  %v1920_v4 = vld [vmem:[%s2322_s4] ss:$0 sm:$0xff] }
  0x88   : > { %1275 = vmatpush.bf16.msrb.mxu0 %v1901_v7 }
  0x8b   : > { %1276 = vmatmul.bf16.vlgmr.msrb.gmra.mxu0 %v474_v8 }
  0xa8   : > { %v1121_v9 = vpop.f32.mrf.mxu0 }
  0xa9   : > { %v1122_v26 = vadd.f32 %v1918_v23, %v1121_v9 }
  0xaa   : > { %v1134_v10 = vpop.f32.mrf.mxu1 }
  0xab   : > { %v1135_v27 = vadd.f32 %v1134_v10, %v1122_v26 }
  0xaf   : > { %v1147_v11 = vpop.f32.mrf.mxu2 }
  0xb0   : > { %v1123_v13 = vpop.f32.mrf.mxu0  ;;  %v1148_v28 = vadd.f32 %v1147_v11, %v1135_v27 }
  0xb1   : > { %v1160_v12 = vpop.f32.mrf.mxu3 }
  0xb2   : > { %v1136_v14 = vpop.f32.mrf.mxu1  ;;  %v1161_v30 = vadd.f32 %v1160_v12, %v1148_v28 }
  0xb7   : > { %v1149_v15 = vpop.f32.mrf.mxu2 }
  0xb9   : > { %v1162_v16 = vpop.f32.mrf.mxu3 }
  0xc8   : > { %v1173_v17 = vpop.f32.mrf.mxu0 }
  0xc9   : > { %v1174_v32 = vadd.f32 %v1173_v17, %v1161_v30 }
  0xca   : > { %v1186_v18 = vpop.f32.mrf.mxu1 }
  0xcb   : > { %v1187_v36 = vadd.f32 %v1186_v18, %v1174_v32 }
  0xcf   : > { %v1199_v19 = vpop.f32.mrf.mxu2 }
  0xd0   : > { %v1175_v21 = vpop.f32.mrf.mxu0  ;;  %v1200_v38 = vadd.f32 %v1199_v19, %v1187_v36 }
  0xd1   : > { %v1212_v20 = vpop.f32.mrf.mxu3 }
  0xd2   : > { %v1188_v22 = vpop.f32.mrf.mxu1  ;;  %v1213_v41 = vadd.f32 %v1212_v20, %v1200_v38 }
  0xd7   : > { %v1201_v24 = vpop.f32.mrf.mxu2 }
  0xd9   : > { %v1214_v25 = vpop.f32.mrf.mxu3 }
  0xe8   : > { %v1225_v29 = vpop.f32.mrf.mxu0 }
  0xe9   : > { %v1226_v42 = vadd.f32 %v1225_v29, %v1213_v41 }
  0xea   : > { %v1238_v31 = vpop.f32.mrf.mxu1 }
  0xeb   : > { %v1239_v44 = vadd.f32 %v1238_v31, %v1226_v42 }
  0xef   : > { %v1251_v33 = vpop.f32.mrf.mxu2 }
  0xf0   : > { %v1227_v35 = vpop.f32.mrf.mxu0  ;;  %v1252_v45 = vadd.f32 %v1251_v33, %v1239_v44 }
  0xf1   : > { %v1264_v34 = vpop.f32.mrf.mxu3 }
  0xf2   : > { %v1240_v37 = vpop.f32.mrf.mxu1  ;;  %v1265_v47 = vadd.f32 %v1264_v34, %v1252_v45 }
  0xf7   : > { %v1253_v39 = vpop.f32.mrf.mxu2 }
  0xf9   : > { %v1266_v40 = vpop.f32.mrf.mxu3 }
 0x108   : > { %v1277_v48 = vpop.f32.mrf.mxu0 }
 0x109   : > { %v1278_v49 = vadd.f32 %v1277_v48, %v1265_v47 }
 0x10b   : > { %v1286_v50 = vsel %vm1285_vm0, %v1278_v49, 0.0 }
 0x10c   : > { %1287 = vadd.xlane.f32.xlu0 %v1286_v50 }
 0x110   : > { %v1279_v51 = vpop.f32.mrf.mxu0 }
 0x17f   : > { %v1288_v52 = vpop.xlane.xlu0 %1287 }
 0x180   : > { %v1289_v53 = vmul.f32 0.03125, %v1288_v52 }
 0x182   : > { %v1290_v54 = vsub.f32 %v1278_v49, %v1289_v53 }
 0x184   : > { %v1291_v55 = vsel %vm1285_vm0, %v1290_v54, 0.0 }
 0x185   : > { %v1292_v56 = vmul.f32 %v1291_v55, %v1291_v55 }
 0x187   : > { %1293 = vadd.xlane.f32.xlu0 %v1292_v56 }
 0x1fa   : > { %v1294_v57 = vpop.xlane.xlu0 %1293 }
 0x1fb   : > { %v1295_v58 = vmul.f32 0.03125, %v1294_v57 }
 0x1fd   : > { %v1296_v59 = vadd.f32 1e-05, %v1295_v58 }
 0x1ff   : > { %1921 = vrsqrt.f32 %v1296_v59  ;;  %vm1303_vm2 = vweird.f32 %v1296_v59 }
 0x205   : > { %v1922_v60 = vpop.eup %1921 }
 0x206   : > { %v1298_v61 = vmul.f32 %v1922_v60, %v1296_v59  ;;  %vm1304_vm1 = vweird.f32 %v1922_v60 }
 0x207   : > { %vm1305_vm3 = vmor %vm1303_vm2, %vm1304_vm1 }
 0x208   : > { %v1299_v62 = vmul.f32 %v1922_v60, %v1298_v61 }
 0x20a   : > { %v1300_v63 = vmul.f32 0.5, %v1299_v62 }
 0x20c   : > { %v1301_v0 = vsub.f32 1.5, %v1300_v63 }
 0x20e   : > { %v1302_v1 = vmul.f32 %v1922_v60, %v1301_v0 }
 0x210   : > { %v1306_v3 = vsel %vm1305_vm3, %v1922_v60, %v1302_v1 }
 0x211   : > { %v1307_v5 = vmul.f32 %v1306_v3, %v1290_v54 }
 0x213   : > { %v1311_v6 = vmul.f32 %v1919_v2, %v1307_v5 }
 0x215   : > { %v1315_v7 = vadd.f32 %v1920_v4, %v1311_v6 }
 0x217   : > { %v1317_v8 = vmul.f32 %v1315_v7, %v1315_v7  ;;  %v1316_v14 = vmul.f32 0.5, %v1315_v7 }
 0x219   : > { %v1318_v9 = vmul.f32 %v1317_v8, %v1315_v7 }
 0x21b   : > { %v1319_v10 = vmul.f32 0.044715, %v1318_v9 }
 0x21d   : > { %v1320_v11 = vadd.f32 %v1319_v10, %v1315_v7 }
 0x21f   : > { %v1321_v12 = vmul.f32 0.7978846, %v1320_v11 }
 0x221   : > { %1923 = vtanh.f32 %v1321_v12 }
 0x227   : > { %v1924_v13 = vpop.eup %1923 }
 0x228   : > { %v1323_v15 = vadd.f32 1.0, %v1924_v13 }
 0x22a   : > { %v1324_v16 = vmul.f32 %v1323_v15, %v1316_v14 }
 0x22c   : > { %v1325_v17 = vpack.c.bf16 %v1324_v16, %v1324_v16 }
 0x22e   : > { %1326 = vst [vmem:[%s222_s15] sm:$0xf] %v1325_v17 }
 0x22f PF: > { %s15_s18 = sadd.s32 1, %s1931_s18  }
 0x230   : > { %p12_p4 = scmp.ge.s32.totalorder %s15_s18, 4  }
 0x232   :  { %14 = sbr.rel (!%p12_p4) target bundleno = 1 (0x1), region = 70 }

// kernel: era5_encode.11
= control target key start
LH: loop header
LB: loop body
LE: loop exit
PB: predicated region body
PF: predicated region fallthrough
CT: control target
= control target key end

     0   :  { %s195_s1 = inlined_call_operand.vmem [shape: bf16[128,128], index: 1, kind: input, shape index: {}]   ;;  %s196_s2 = inlined_call_operand.vmem [shape: f32[1,128], index: 2, kind: input, shape index: {}]   ;;  %s197_s0 = inlined_call_operand.vmem [shape: bf16[8,128], index: 0, kind: input, shape index: {}]   ;;  %s198_s3 = inlined_call_operand.vmem [shape: f32[8,128], index: 3, kind: output, shape index: {}]  }
   0x1   :  { %v140_v0 = vld [vmem:[%s195_s1 + $0x38] sm:$0xff]  ;;  %v139_v1 = vld [vmem:[%s195_s1 + $0x30] sm:$0xff]  ;;  %v138_v2 = vld [vmem:[%s195_s1 + $0x28] sm:$0xff] }
   0x2   :  { %83 = vmatpush.bf16.msra.mxu0 %v140_v0  ;;  %v137_v3 = vld [vmem:[%s195_s1 + $0x20] sm:$0xff]  ;;  %v136_v4 = vld [vmem:[%s195_s1 + $0x18] sm:$0xff]  ;;  %v135_v5 = vld [vmem:[%s195_s1 + $0x10] sm:$0xff] }
   0x3   :  { %v134_v6 = vld [vmem:[%s195_s1 + $0x8] sm:$0xff]  ;;  %v133_v7 = vld [vmem:[%s195_s1] sm:$0xff] }
   0x4   :  { %v14_v8 = vld [vmem:[%s197_s0] sm:$0xf] }
   0x5   :  { %v141_v9 = vld [vmem:[%s196_s2] ss:$0 sm:$0xff] }
   0x6   :  { %84 = vmatpush.bf16.msra.mxu0 %v139_v1 }
   0xa   :  { %85 = vmatpush.bf16.msra.mxu0 %v138_v2 }
   0xe   :  { %86 = vmatpush.bf16.msra.mxu0 %v137_v3 }
  0x12   :  { %87 = vmatpush.bf16.msra.mxu0 %v136_v4 }
  0x16   :  { %88 = vmatpush.bf16.msra.mxu0 %v135_v5 }
  0x1a   :  { %89 = vmatpush.bf16.msra.mxu0 %v134_v6 }
  0x1e   :  { %90 = vmatpush.bf16.msra.mxu0 %v133_v7 }
  0x21   :  { %91 = vmatmul.bf16.vlgmr.msra.gmra.mxu0 %v14_v8 }
  0x9e   :  { %v92_v10 = vpop.f32.mrf.mxu0 }
  0x9f   :  { %v93_v11 = vadd.f32 %v141_v9, %v92_v10 }
  0xa1   :  { %96 = vst [vmem:[%s198_s3] sm:$0xff] %v93_v11 }
  0xa6   :  { %v94_v12 = vpop.f32.mrf.mxu0 }

// kernel: era5_encode.10
= control target key start
LH: loop header
LB: loop body
LE: loop exit
PB: predicated region body
PF: predicated region fallthrough
CT: control target
= control target key end

     0   :  { %s858_s1 = inlined_call_operand.vmem [shape: bf16[640,128], index: 1, kind: input, shape index: {}]   ;;  %s859_s2 = inlined_call_operand.vmem [shape: f32[1,128], index: 2, kind: input, shape index: {}]   ;;  %s860_s0 = inlined_call_operand.vmem [shape: bf16[8,640], index: 0, kind: input, shape index: {}]   ;;  %s861_s3 = inlined_call_operand.vmem [shape: f32[1,128], index: 3, kind: input, shape index: {}]   ;;  %s862_s4 = inlined_call_operand.vmem [shape: f32[1,128], index: 4, kind: input, shape index: {}]   ;;  %s863_s5 = inlined_call_operand.vmem [shape: bf16[8,128], index: 5, kind: output, shape index: {}]  }
   0x1   :  { %v647_v0 = vld [vmem:[%s858_s1 + $0x38] sm:$0xff]  ;;  %v646_v3 = vld [vmem:[%s858_s1 + $0x30] sm:$0xff]  ;;  %v645_v8 = vld [vmem:[%s858_s1 + $0x28] sm:$0xff] }
   0x2   :  { %v663_v1 = vld [vmem:[%s858_s1 + $0xb8] sm:$0xff]  ;;  %365 = vmatpush.bf16.msra.mxu0 %v647_v0  ;;  %v662_v5 = vld [vmem:[%s858_s1 + $0xb0] sm:$0xff]  ;;  %v661_v9 = vld [vmem:[%s858_s1 + $0xa8] sm:$0xff]  ;;  %v432_v0 = vlaneseq }
   0x3   :  { %v671_v2 = vld [vmem:[%s858_s1 + $0xf8] sm:$0xff]  ;;  %391 = vmatpush.bf16.msra.mxu2 %v663_v1  ;;  %v670_v6 = vld [vmem:[%s858_s1 + $0xf0] sm:$0xff]  ;;  %v669_v10 = vld [vmem:[%s858_s1 + $0xe8] sm:$0xff] }
   0x4   :  { %v655_v4 = vld [vmem:[%s858_s1 + $0x78] sm:$0xff]  ;;  %404 = vmatpush.bf16.msra.mxu3 %v671_v2  ;;  %v654_v7 = vld [vmem:[%s858_s1 + $0x70] sm:$0xff]  ;;  %v653_v11 = vld [vmem:[%s858_s1 + $0x68] sm:$0xff]  ;;  %v433_v2 = vand.u32 127, %v432_v0 }
   0x5   :  { %378 = vmatpush.bf16.msra.mxu1 %v655_v4  ;;  %v644_v12 = vld [vmem:[%s858_s1 + $0x20] sm:$0xff]  ;;  %v643_v16 = vld [vmem:[%s858_s1 + $0x18] sm:$0xff]  ;;  %v642_v20 = vld [vmem:[%s858_s1 + $0x10] sm:$0xff] }
   0x6   :  { %366 = vmatpush.bf16.msra.mxu0 %v646_v3  ;;  %v660_v13 = vld [vmem:[%s858_s1 + $0xa0] sm:$0xff]  ;;  %v659_v17 = vld [vmem:[%s858_s1 + $0x98] sm:$0xff]  ;;  %v658_v21 = vld [vmem:[%s858_s1 + $0x90] sm:$0xff]  ;;  %vm434_vm0 = vcmp.lt.s32.totalorder %v433_v2, 64 }
   0x7   :  { %392 = vmatpush.bf16.msra.mxu2 %v662_v5  ;;  %v668_v14 = vld [vmem:[%s858_s1 + $0xe0] sm:$0xff]  ;;  %v667_v18 = vld [vmem:[%s858_s1 + $0xd8] sm:$0xff]  ;;  %v666_v22 = vld [vmem:[%s858_s1 + $0xd0] sm:$0xff] }
   0x8   :  { %405 = vmatpush.bf16.msra.mxu3 %v670_v6  ;;  %v652_v15 = vld [vmem:[%s858_s1 + $0x60] sm:$0xff]  ;;  %v651_v19 = vld [vmem:[%s858_s1 + $0x58] sm:$0xff]  ;;  %v650_v23 = vld [vmem:[%s858_s1 + $0x50] sm:$0xff] }
   0x9   :  { %379 = vmatpush.bf16.msra.mxu1 %v654_v7  ;;  %v641_v24 = vld [vmem:[%s858_s1 + $0x8] sm:$0xff]  ;;  %v20_v25 = vld [vmem:[%s860_s0] sm:$0xff]  ;;  %v679_v33 = vld [vmem:[%s858_s1 + $0x138] sm:$0xff] }
   0xa   :  { %367 = vmatpush.bf16.msra.mxu0 %v645_v8  ;;  %v657_v26 = vld [vmem:[%s858_s1 + $0x88] sm:$0xff]  ;;  %v110_v30 = vunpack.c.l.b16 %v20_v25  ;;  %v640_v31 = vld [vmem:[%s858_s1] sm:$0xff]  ;;  %v111_v38 = vunpack.c.h.b16 %v20_v25  ;;  %v678_v41 = vld [vmem:[%s858_s1 + $0x130] sm:$0xff] }
   0xb   :  { %393 = vmatpush.bf16.msra.mxu2 %v661_v9  ;;  %v665_v27 = vld [vmem:[%s858_s1 + $0xc8] sm:$0xff]  ;;  %v656_v34 = vld [vmem:[%s858_s1 + $0x80] sm:$0xff]  ;;  %v675_v46 = vld [vmem:[%s858_s1 + $0x118] sm:$0xff] }
   0xc   :  { %406 = vmatpush.bf16.msra.mxu3 %v669_v10  ;;  %v21_v28 = vld [vmem:[%s860_s0 + $0x8] sm:$0xff]  ;;  %v664_v36 = vld [vmem:[%s858_s1 + $0xc0] sm:$0xff]  ;;  %v115_v39 = vpack.c.b16 %v110_v30, %v110_v30  ;;  %v116_v43 = vpack.c.b16 %v111_v38, %v111_v38  ;;  %v674_v47 = vld [vmem:[%s858_s1 + $0x110] sm:$0xff] }
   0xd   :  { %380 = vmatpush.bf16.msra.mxu1 %v653_v11  ;;  %v649_v29 = vld [vmem:[%s858_s1 + $0x48] sm:$0xff]  ;;  %v112_v32 = vunpack.c.l.b16 %v21_v28  ;;  %v113_v35 = vunpack.c.h.b16 %v21_v28  ;;  %v648_v37 = vld [vmem:[%s858_s1 + $0x40] sm:$0xff]  ;;  %v22_v49 = vld [vmem:[%s860_s0 + $0x10] sm:$0xf] }
   0xe   :  { %368 = vmatpush.bf16.msra.mxu0 %v644_v12  ;;  %v677_v44 = vld [vmem:[%s858_s1 + $0x128] sm:$0xff]  ;;  %v676_v45 = vld [vmem:[%s858_s1 + $0x120] sm:$0xff]  ;;  %v114_v50 = vunpack.c.l.b16 %v22_v49 }
   0xf   :  { %394 = vmatpush.bf16.msra.mxu2 %v660_v13  ;;  %v117_v40 = vpack.c.b16 %v112_v32, %v112_v32  ;;  %v118_v42 = vpack.c.b16 %v113_v35, %v113_v35  ;;  %v673_v48 = vld [vmem:[%s858_s1 + $0x108] sm:$0xff]  ;;  %v672_v51 = vld [vmem:[%s858_s1 + $0x100] sm:$0xff] }
  0x10   :  { %407 = vmatpush.bf16.msra.mxu3 %v668_v14  ;;  %v119_v52 = vpack.c.b16 %v114_v50, %v114_v50  ;;  %v680_v59 = vld [vmem:[%s859_s2] ss:$0 sm:$0xff] }
  0x11   :  { %381 = vmatpush.bf16.msra.mxu1 %v652_v15 }
  0x12   :  { %369 = vmatpush.bf16.msra.mxu0 %v643_v16 }
  0x13   :  { %395 = vmatpush.bf16.msra.mxu2 %v659_v17 }
  0x14   :  { %408 = vmatpush.bf16.msra.mxu3 %v667_v18 }
  0x15   :  { %382 = vmatpush.bf16.msra.mxu1 %v651_v19 }
  0x16   :  { %370 = vmatpush.bf16.msra.mxu0 %v642_v20 }
  0x17   :  { %396 = vmatpush.bf16.msra.mxu2 %v658_v21 }
  0x18   :  { %409 = vmatpush.bf16.msra.mxu3 %v666_v22  ;;  %v681_v22 = vld [vmem:[%s861_s3] ss:$0 sm:$0xff] }
  0x19   :  { %383 = vmatpush.bf16.msra.mxu1 %v650_v23 }
  0x1a   :  { %371 = vmatpush.bf16.msra.mxu0 %v641_v24  ;;  %v682_v24 = vld [vmem:[%s862_s4] ss:$0 sm:$0xff] }
  0x1b   :  { %397 = vmatpush.bf16.msra.mxu2 %v657_v26 }
  0x1c   :  { %410 = vmatpush.bf16.msra.mxu3 %v665_v27 }
  0x1d   :  { %384 = vmatpush.bf16.msra.mxu1 %v649_v29 }
  0x1e   :  { %372 = vmatpush.bf16.msra.mxu0 %v640_v31 }
  0x1f   :  { %398 = vmatpush.bf16.msra.mxu2 %v656_v34 }
  0x20   :  { %411 = vmatpush.bf16.msra.mxu3 %v664_v36 }
  0x21   :  { %385 = vmatpush.bf16.msra.mxu1 %v648_v37  ;;  %373 = vmatmul.bf16.vlgmr.msra.gmra.mxu0 %v115_v39 }
  0x22   :  { %417 = vmatpush.bf16.msrb.mxu0 %v679_v33  ;;  %399 = vmatmul.bf16.vlgmr.msra.gmra.mxu2 %v117_v40 }
  0x23   :  { %412 = vmatmul.bf16.vlgmr.msra.gmra.mxu3 %v118_v42 }
  0x24   :  { %386 = vmatmul.bf16.vlgmr.msra.gmra.mxu1 %v116_v43 }
  0x26   :  { %418 = vmatpush.bf16.msrb.mxu0 %v678_v41 }
  0x2a   :  { %419 = vmatpush.bf16.msrb.mxu0 %v677_v44 }
  0x2e   :  { %420 = vmatpush.bf16.msrb.mxu0 %v676_v45 }
  0x32   :  { %421 = vmatpush.bf16.msrb.mxu0 %v675_v46 }
  0x36   :  { %422 = vmatpush.bf16.msrb.mxu0 %v674_v47 }
  0x3a   :  { %423 = vmatpush.bf16.msrb.mxu0 %v673_v48 }
  0x3e   :  { %424 = vmatpush.bf16.msrb.mxu0 %v672_v51 }
  0x41   :  { %425 = vmatmul.bf16.vlgmr.msrb.gmra.mxu0 %v119_v52 }
  0x9e   :  { %v374_v53 = vpop.f32.mrf.mxu0 }
  0x9f   :  { %v375_v61 = vadd.f32 %v680_v59, %v374_v53 }
  0xa1   :  { %v387_v54 = vpop.f32.mrf.mxu1 }
  0xa2   :  { %v388_v63 = vadd.f32 %v387_v54, %v375_v61 }
  0xa5   :  { %v400_v55 = vpop.f32.mrf.mxu2 }
  0xa6   :  { %v376_v56 = vpop.f32.mrf.mxu0  ;;  %v413_v57 = vpop.f32.mrf.mxu3  ;;  %v401_v1 = vadd.f32 %v400_v55, %v388_v63 }
  0xa8   :  { %v414_v3 = vadd.f32 %v413_v57, %v401_v1 }
  0xa9   :  { %v389_v58 = vpop.f32.mrf.mxu1 }
  0xad   :  { %v402_v60 = vpop.f32.mrf.mxu2 }
  0xae   :  { %v415_v62 = vpop.f32.mrf.mxu3 }
  0xbe   :  { %v426_v4 = vpop.f32.mrf.mxu0 }
  0xbf   :  { %v427_v5 = vadd.f32 %v426_v4, %v414_v3 }
  0xc1   :  { %v435_v6 = vsel %vm434_vm0, %v427_v5, 0.0 }
  0xc2   :  { %436 = vadd.xlane.f32.xlu0 %v435_v6 }
  0xc6   :  { %v428_v7 = vpop.f32.mrf.mxu0 }
 0x135   :  { %v437_v8 = vpop.xlane.xlu0 %436 }
 0x136   :  { %v438_v9 = vmul.f32 0.015625, %v437_v8 }
 0x138   :  { %v439_v10 = vsub.f32 %v427_v5, %v438_v9 }
 0x13a   :  { %v440_v11 = vsel %vm434_vm0, %v439_v10, 0.0 }
 0x13b   :  { %v441_v12 = vmul.f32 %v440_v11, %v440_v11 }
 0x13d   :  { %442 = vadd.xlane.f32.xlu0 %v441_v12 }
 0x1b0   :  { %v443_v13 = vpop.xlane.xlu0 %442 }
 0x1b1   :  { %v444_v14 = vmul.f32 0.015625, %v443_v13 }
 0x1b3   :  { %v445_v15 = vadd.f32 1e-05, %v444_v14 }
 0x1b5   :  { %683 = vrsqrt.f32 %v445_v15  ;;  %vm452_vm2 = vweird.f32 %v445_v15 }
 0x1bb   :  { %v684_v16 = vpop.eup %683 }
 0x1bc   :  { %v447_v17 = vmul.f32 %v684_v16, %v445_v15  ;;  %vm453_vm1 = vweird.f32 %v684_v16 }
 0x1bd   :  { %vm454_vm3 = vmor %vm452_vm2, %vm453_vm1 }
 0x1be   :  { %v448_v18 = vmul.f32 %v684_v16, %v447_v17 }
 0x1c0   :  { %v449_v19 = vmul.f32 0.5, %v448_v18 }
 0x1c2   :  { %v450_v20 = vsub.f32 1.5, %v449_v19 }
 0x1c4   :  { %v451_v21 = vmul.f32 %v684_v16, %v450_v20 }
 0x1c6   :  { %v455_v23 = vsel %vm454_vm3, %v684_v16, %v451_v21 }
 0x1c7   :  { %v456_v25 = vmul.f32 %v455_v23, %v439_v10 }
 0x1c9   :  { %v460_v26 = vmul.f32 %v681_v22, %v456_v25 }
 0x1cb   :  { %v464_v27 = vadd.f32 %v682_v24, %v460_v26 }
 0x1cd   :  { %v466_v28 = vmul.f32 %v464_v27, %v464_v27  ;;  %v465_v34 = vmul.f32 0.5, %v464_v27 }
 0x1cf   :  { %v467_v29 = vmul.f32 %v466_v28, %v464_v27 }
 0x1d1   :  { %v468_v30 = vmul.f32 0.044715, %v467_v29 }
 0x1d3   :  { %v469_v31 = vadd.f32 %v468_v30, %v464_v27 }
 0x1d5   :  { %v470_v32 = vmul.f32 0.7978846, %v469_v31 }
 0x1d7   :  { %685 = vtanh.f32 %v470_v32 }
 0x1dd   :  { %v686_v33 = vpop.eup %685 }
 0x1de   :  { %v472_v35 = vadd.f32 1.0, %v686_v33 }
 0x1e0   :  { %v473_v36 = vmul.f32 %v472_v35, %v465_v34 }
 0x1e2   :  { %v474_v37 = vpack.c.bf16 %v473_v36, %v473_v36 }
 0x1e4   :  { %475 = vst [vmem:[%s863_s5] sm:$0xf] %v474_v37 }

</bundles_post_ra>
